<compile_context>
chip_gen: v6e
topology: v6e:2x2x1
jax: 0.10.0
libtpu: 0.0.40
codegen_flags: <defaults>
</compile_context>

<pallas_src>
import functools

import jax
import jax.numpy as jnp
import numpy as np
from jax import lax
from jax.experimental import pallas as pl
from jax.experimental.pallas import tpu as pltpu

EPS = 1e-5
NEG_SLOPE = 0.01                    # PyTorch LeakyReLU default
LANE = 128                          # channel padding granule (lane width)


def _round_up(v, m):
    return (v + m - 1) // m * m


def _device_tuning():
    """Per-generation: inter-stage activation dtype, f32 tile-bytes budget, VMEM limit."""
    try:
        kind = jax.devices()[0].device_kind.lower()
    except Exception:
        kind = ""
    if "v6" in kind:                           # v6e: 128 MiB VMEM, bf16 VPU
        return jnp.bfloat16, 6 << 20, 96 << 20
    if "v5 lite" in kind or "v5e" in kind:     # v5e: f32 activations, bf16 only at the MXU
        return jnp.float32, 6 << 20, 96 << 20
    if "7x" in kind or "v7" in kind:           # v7x: 64 MiB VMEM per TensorCore
        return jnp.bfloat16, 3 << 20, 48 << 20
    return jnp.float32, 2 << 20, None          # unknown chip: conservative defaults


# ---------------------------------------------------------------------------
# In-kernel helpers
# ---------------------------------------------------------------------------
def _pad_lanes(v, cp):
    cs = v.shape[-1]
    if cs == cp:
        return v
    return jnp.concatenate(
        [v, jnp.zeros(v.shape[:-1] + (cp - cs,), v.dtype)], axis=-1)


def _norm_act(v, scale, shift):
    a = v * scale + shift
    return jnp.where(a >= 0.0, a, NEG_SLOPE * a)


def _accum_stats(val_2d, stats_ref, is_first):
    """Accumulate per-channel [sum, sum-of-squares] into a grid-resident block (f32)."""
    cp = stats_ref.shape[-1]
    s = jnp.sum(val_2d, axis=0, keepdims=True)
    ss = jnp.sum(val_2d * val_2d, axis=0, keepdims=True)
    st = _pad_lanes(jnp.concatenate([s, ss], axis=0), cp)

    @pl.when(is_first)
    def _():
        stats_ref[...] = jnp.zeros_like(stats_ref)

    stats_ref[0] += st


def _bn_act_conv3x3(main, top, bot, scale, shift, w_all, bias, j, nj, cp):
    """Folded-BN + LeakyReLU + zero-pad + 3x3 conv on one halo'd H-tile.

    main: (TH, W, Cs) f32; top/bot: (1, W, Cs) neighbour rows (masked at image border);
    w_all: (3Cp, 3Cp) bf16 with W_all[dy*Cp+ci, dx*Cp+co] = W_torch[co, ci, dy, dx].
    Returns (TH, W, Cp) f32.
    """
    main = _pad_lanes(main, cp)
    top = _pad_lanes(top, cp)
    bot = _pad_lanes(bot, cp)
    th, w, _ = main.shape
    # Padding happens AFTER norm+activation in the PyTorch block, so halo rows
    # outside the image must be exactly zero.  bf16 only at the MXU boundary.
    top_a = jnp.where(j > 0, _norm_act(top, scale, shift), 0.0).astype(jnp.bfloat16)
    bot_a = jnp.where(j < nj - 1, _norm_act(bot, scale, shift), 0.0).astype(jnp.bfloat16)
    main_a = _norm_act(main, scale, shift).astype(jnp.bfloat16)
    stack = jnp.concatenate([top_a, main_a, bot_a], axis=0)           # (TH+2, W, Cp) bf16
    # dy taps stacked along lanes -> ONE (TH*W, 3Cp) x (3Cp, 3Cp) MXU matmul.
    rows = jnp.concatenate([stack[0:th], stack[1:th + 1], stack[2:th + 2]], axis=-1)
    p = jnp.dot(rows.reshape(th * w, 3 * cp), w_all,
                preferred_element_type=jnp.float32).reshape(th, w, 3 * cp)
    # The three Cp-wide output chunks are the dx taps; combine with +-1 W shifts.
    # The inserted zero columns realise the W image border (no W+2 pad anywhere).
    zcol = jnp.zeros((th, 1, cp), jnp.float32)
    left = jnp.concatenate([zcol, p[:, :w - 1, 0:cp]], axis=1)            # dx = 0 tap
    right = jnp.concatenate([p[:, 1:, 2 * cp:3 * cp], zcol], axis=1)      # dx = 2 tap
    return p[:, :, cp:2 * cp] + left + right + bias


# ---------------------------------------------------------------------------
# Kernel bodies
# ---------------------------------------------------------------------------
def _pre_conv_kernel(x_ref, wpre_ref, res_ref, stats_ref):
    """1x1 `pre` conv (bf16 channel matmul) + BN1 partial stats."""
    j = pl.program_id(1)
    _, th, w, cin = x_ref.shape
    cp = res_ref.shape[3]
    lhs = x_ref[0].reshape(th * w, cin).astype(jnp.bfloat16)
    res = jnp.dot(lhs, wpre_ref[...], preferred_element_type=jnp.float32)
    res_ref[0] = res.reshape(th, w, cp).astype(res_ref.dtype)
    _accum_stats(res, stats_ref, j == 0)


def _pre_stats_kernel(x_ref, stats_ref):
    """Identity `pre`: BN1 partial stats only (x is NOT copied through HBM)."""
    j = pl.program_id(1)
    _, th, w, cs = x_ref.shape
    v = x_ref[0].reshape(th * w, cs).astype(jnp.float32)
    _accum_stats(v, stats_ref, j == 0)


def _mid_kernel(main_ref, top_ref, bot_ref, scale_ref, shift_ref, wall_ref, bias_ref,
                out_ref, stats_ref):
    """BN1(folded) + LeakyReLU + conv1 + BN2 partial stats."""
    j = pl.program_id(1)
    nj = pl.num_programs(1)
    cp = out_ref.shape[3]
    y = _bn_act_conv3x3(main_ref[0].astype(jnp.float32),
                        top_ref[0].astype(jnp.float32),
                        bot_ref[0].astype(jnp.float32),
                        scale_ref[...], shift_ref[...],
                        wall_ref[...], bias_ref[...], j, nj, cp)
    out_ref[0] = y.astype(out_ref.dtype)
    th, w, _ = y.shape
    _accum_stats(y.reshape(th * w, cp), stats_ref, j == 0)


def _last_kernel(main_ref, top_ref, bot_ref, res_ref, scale_ref, shift_ref,
                 wall_ref, bias_ref, out_ref):
    """BN2(folded) + LeakyReLU + conv2 + residual add."""
    j = pl.program_id(1)
    nj = pl.num_programs(1)
    cp = out_ref.shape[3]
    y = _bn_act_conv3x3(main_ref[0].astype(jnp.float32),
                        top_ref[0].astype(jnp.float32),
                        bot_ref[0].astype(jnp.float32),
                        scale_ref[...], shift_ref[...],
                        wall_ref[...], bias_ref[...], j, nj, cp)
    res = _pad_lanes(res_ref[0].astype(jnp.float32), cp)
    out_ref[0] = (y + res).astype(out_ref.dtype)


# ---------------------------------------------------------------------------
# Wrapper helpers (tiny XLA-side prep; all heavy math is in the kernels)
# ---------------------------------------------------------------------------
def _pick_tile_h(h, w, cp, tile_bytes):
    # TODO(synk): cdiv grid + masked tail tile so awkward H (e.g. prime) does not
    # silently degrade toward 1-row tiles.
    max_rows = max(1, tile_bytes // (w * cp * 4))
    best = 1
    for t in range(1, h + 1):
        if h % t == 0 and t <= max_rows:
            best = t
    return best


def _fold_bn(stats, gamma, beta, count):
    """(N, 2, Cp) partial [sum, sumsq] -> per-channel (scale, shift), each (1, Cp) f32."""
    s = jnp.sum(stats, axis=0)
    mean = s[0] / count
    var = jnp.maximum(s[1] / count - mean * mean, 0.0)
    scale = gamma * lax.rsqrt(var + EPS)
    shift = beta - mean * scale
    return (scale.reshape(1, -1).astype(jnp.float32),
            shift.reshape(1, -1).astype(jnp.float32))


def _conv_w_all(w, cp):
    """PyTorch (Co, Ci, 3, 3) -> (3Cp, 3Cp) bf16 with [dy*Cp+ci, dx*Cp+co] layout."""
    co, ci = w.shape[0], w.shape[1]
    wp = jnp.pad(w.astype(jnp.float32), ((0, cp - co), (0, cp - ci), (0, 0), (0, 0)))
    return jnp.transpose(wp, (2, 1, 3, 0)).reshape(3 * cp, 3 * cp).astype(jnp.bfloat16)


# ---------------------------------------------------------------------------
# Public entry points
# ---------------------------------------------------------------------------
@functools.partial(jax.jit, static_argnames=("tile_h",))
def resblock2d_pallas_nhwc(x_nhwc, params, *, tile_h=None):
    n, h, w, c_in = x_nhwc.shape
    c_out = params["w1"].shape[0]
    cp = _round_up(c_out, LANE)                       # lane-dense padded channels

    act_dtype, tile_bytes, vmem_limit = _device_tuning()
    th = _pick_tile_h(h, w, cp, tile_bytes) if tile_h is None else tile_h
    assert h % th == 0, "tile_h must divide H"
    nh = h // th
    count = n * h * w

    x_nhwc = x_nhwc.astype(jnp.float32)

    def padvec(v):
        return jnp.pad(v.astype(jnp.float32), (0, cp - v.shape[0]))

    # NB: gamma/beta MUST be zero-padded so padded lanes fold to scale=shift=0.
    g1, bt1 = padvec(params["g1"]), padvec(params["bt1"])
    g2, bt2 = padvec(params["g2"]), padvec(params["bt2"])
    b1row = padvec(params["b1"]).reshape(1, cp)
    b2row = padvec(params["b2"]).reshape(1, cp)
    w1all = _conv_w_all(params["w1"], cp)
    w2all = _conv_w_all(params["w2"], cp)

    def cparams(sem):
        kw = dict(dimension_semantics=sem)
        if vmem_limit is not None:
            kw["vmem_limit_bytes"] = vmem_limit
        return pltpu.CompilerParams(**kw)

    cp_acc = cparams(("parallel", "arbitrary"))   # H axis carries the stats accumulator
    cp_par = cparams(("parallel", "parallel"))

    def tile_spec(c):
        return pl.BlockSpec((1, th, w, c), lambda ni, j: (ni, j, 0, 0))

    def halo_specs(c):
        # Single-row windows on the SAME array: halo reads stay inside the
        # pipelined DMA schedule (no wrapper-side gather pass between stages).
        top = pl.BlockSpec((1, 1, w, c),
                           lambda ni, j: (ni, jnp.maximum(j * th - 1, 0), 0, 0))
        bot = pl.BlockSpec((1, 1, w, c),
                           lambda ni, j: (ni, jnp.minimum((j + 1) * th, h - 1), 0, 0))
        return top, bot

    row_spec = pl.BlockSpec((1, cp), lambda ni, j: (0, 0))
    stats_spec = pl.BlockSpec((1, 2, cp), lambda ni, j: (ni, 0, 0))
    wall_spec = pl.BlockSpec((3 * cp, 3 * cp), lambda ni, j: (0, 0))
    stats_shape = jax.ShapeDtypeStruct((n, 2, cp), jnp.float32)
    act_shape = jax.ShapeDtypeStruct((n, h, w, cp), act_dtype)

    # ---- stage A: `pre` + BN1 stats ----------------------------------------
    if params.get("w_pre") is not None:
        wpre = jnp.transpose(params["w_pre"][:, :, 0, 0], (1, 0))          # (Ci, Co)
        wpre = jnp.pad(wpre, ((0, 0), (0, cp - c_out))).astype(jnp.bfloat16)
        res, stats1 = pl.pallas_call(
            _pre_conv_kernel,
            grid=(n, nh),
            in_specs=[tile_spec(c_in),
                      pl.BlockSpec((c_in, cp), lambda ni, j: (0, 0))],
            out_specs=(tile_spec(cp), stats_spec),
            out_shape=(act_shape, stats_shape),
            compiler_params=cp_acc,
        )(x_nhwc, wpre)
        src1, c_src1 = res, cp            # stage-B input and stage-C residual
    else:
        # Identity `pre`: stats-only pass; B and C read x directly (channels
        # padded in VMEM), saving the full res write + re-reads.
        stats1 = pl.pallas_call(
            _pre_stats_kernel,
            grid=(n, nh),
            in_specs=[tile_spec(c_in)],
            out_specs=stats_spec,
            out_shape=stats_shape,
            compiler_params=cp_acc,
        )(x_nhwc)
        src1, c_src1 = x_nhwc, c_in

    # ---- stage B: BN1 + LeakyReLU + conv1 + BN2 stats ----------------------
    scale1, shift1 = _fold_bn(stats1, g1, bt1, count)
    top1, bot1 = halo_specs(c_src1)
    h1, stats2 = pl.pallas_call(
        _mid_kernel,
        grid=(n, nh),
        in_specs=[tile_spec(c_src1), top1, bot1, row_spec, row_spec,
                  wall_spec, row_spec],
        out_specs=(tile_spec(cp), stats_spec),
        out_shape=(act_shape, stats_shape),
        compiler_params=cp_acc,
    )(src1, src1, src1, scale1, shift1, w1all, b1row)

    # ---- stage C: BN2 + LeakyReLU + conv2 + residual add -------------------
    scale2, shift2 = _fold_bn(stats2, g2, bt2, count)
    top2, bot2 = halo_specs(cp)
    out_p = pl.pallas_call(
        _last_kernel,
        grid=(n, nh),
        in_specs=[tile_spec(cp), top2, bot2, tile_spec(c_src1), row_spec, row_spec,
                  wall_spec, row_spec],
        out_specs=tile_spec(cp),
        out_shape=jax.ShapeDtypeStruct((n, h, w, cp), jnp.float32),
        compiler_params=cp_par,
    )(h1, h1, h1, src1, scale2, shift2, w2all, b2row)

    return out_p[..., :c_out]


@functools.partial(jax.jit, static_argnames=("tile_h",))
def resblock2d_pallas(x_nchw, params, *, tile_h=None):
    # NCHW shim for PyTorch parity; keep NHWC at the model level to avoid these
    # two full-HBM transposes around an otherwise memory-bound block.
    x_nhwc = jnp.transpose(x_nchw, (0, 2, 3, 1))
    out = resblock2d_pallas_nhwc(x_nhwc, params, tile_h=tile_h)
    return jnp.transpose(out, (0, 3, 1, 2))


# ---------------------------------------------------------------------------
# Parameters + pure-JAX reference (independent conv primitive) for the check
# ---------------------------------------------------------------------------
def make_params(key, in_channel, out_channel):
    ks = jax.random.split(key, 5)
    s = 0.1
    w_pre = None if in_channel == out_channel else \
        s * jax.random.normal(ks[0], (out_channel, in_channel, 1, 1), jnp.float32)
    w1 = s * jax.random.normal(ks[1], (out_channel, out_channel, 3, 3), jnp.float32)
    b1 = s * jax.random.normal(ks[2], (out_channel,), jnp.float32)
    w2 = s * jax.random.normal(ks[3], (out_channel, out_channel, 3, 3), jnp.float32)
    b2 = s * jax.random.normal(ks[4], (out_channel,), jnp.float32)
    ones = jnp.ones((out_channel,), jnp.float32)
    zeros = jnp.zeros((out_channel,), jnp.float32)
    # BatchNorm2d affine params at PyTorch default init (gamma=1, beta=0)
    return dict(w_pre=w_pre, w1=w1, b1=b1, w2=w2, b2=b2,
                g1=ones, bt1=zeros, g2=ones, bt2=zeros)


def resblock2d_ref(x, params):
    def conv(hh, wgt, b, pad):
        y = lax.conv_general_dilated(hh, wgt, (1, 1), [(pad, pad), (pad, pad)],
                                     dimension_numbers=("NCHW", "OIHW", "NCHW"))
        return y if b is None else y + b[None, :, None, None]

    def bn_lrelu(hh, g, b):
        m = jnp.mean(hh, axis=(0, 2, 3), keepdims=True)
        v = jnp.mean((hh - m) ** 2, axis=(0, 2, 3), keepdims=True)
        a = (hh - m) * lax.rsqrt(v + EPS) * g[None, :, None, None] + b[None, :, None, None]
        return jnp.where(a >= 0, a, NEG_SLOPE * a)

    res = x if params["w_pre"] is None else conv(x, params["w_pre"], None, 0)
    h1 = conv(bn_lrelu(res, params["g1"], params["bt1"]), params["w1"], params["b1"], 1)
    h2 = conv(bn_lrelu(h1, params["g2"], params["bt2"]), params["w2"], params["b2"], 1)
    return h2 + res


if __name__ == "__main__":
    key = jax.random.PRNGKey(0)
    # (N, C_in, C_out, H, W): one case with a real 1x1 `pre` conv, one identity `pre`.
    cases = [(2, 4, 8, 16, 16), (2, 8, 8, 16, 16)]
    for n_, ci, co, h_, w_ in cases:
        key, kx, kp = jax.random.split(key, 3)
        x = jax.random.normal(kx, (n_, ci, h_, w_), jnp.float32)    # PyTorch NCHW input
        params = make_params(kp, ci, co)
        # tile_h=8 -> 2 H-tiles per image: exercises halo rows + stats accumulation.
        out = resblock2d_pallas(x, params, tile_h=8)
        out = jax.block_until_ready(out)
        ref = resblock2d_ref(x, params)
        # bf16 MXU inputs (+ bf16 inter-stage activations on v6e/v7x) vs an f32
        # reference: typical max-abs error ~1e-2; real bugs show up as O(0.1-1).
        np.testing.assert_allclose(np.asarray(out), np.asarray(ref),
                                   rtol=5e-2, atol=5e-2)
    print("KERNEL_OK")
</pallas_src>

<mosaic_0001>
module attributes {stable_mosaic.version = 11 : i64} {
  func.func @_pre_conv_kernel(%arg0: i32, %arg1: i32, %arg2: memref<1x8x16x4xf32, #tpu.memory_space<vmem>>, %arg3: memref<4x128xbf16, #tpu.memory_space<vmem>>, %arg4: memref<1x8x16x128xf32, #tpu.memory_space<vmem>>, %arg5: memref<1x2x128xf32, #tpu.memory_space<vmem>>) attributes {dimension_semantics = [#tpu.dimension_semantics<parallel>, #tpu.dimension_semantics<arbitrary>], iteration_bounds = array<i64: 2, 2>, scalar_prefetch = 0 : i64, scratch_operands = 0 : i64, tpu.core_type = #tpu.core_type<tc>, window_params = [{transform_indices = @transform_0, window_bounds = array<i64: 1, 8, 16, 4>}, {pipeline_mode = #tpu.pipeline_mode<synchronous>, transform_indices = @transform_1, window_bounds = array<i64: 4, 128>}, {transform_indices = @transform_2, window_bounds = array<i64: 1, 8, 16, 128>}, {transform_indices = @transform_3, window_bounds = array<i64: 1, 2, 128>}]} {
    %c0 = arith.constant 0 : index
    %c0_0 = arith.constant 0 : index
    %c0_1 = arith.constant 0 : index
    %c0_2 = arith.constant 0 : index
    %0 = vector.load %arg2[%c0, %c0_0, %c0_1, %c0_2] : memref<1x8x16x4xf32, #tpu.memory_space<vmem>>, vector<1x8x16x4xf32>
    %1 = vector.shape_cast %0 : vector<1x8x16x4xf32> to vector<8x16x4xf32>
    %2 = vector.shape_cast %1 : vector<8x16x4xf32> to vector<128x4xf32>
    %3 = arith.truncf %2 : vector<128x4xf32> to vector<128x4xbf16>
    %c0_3 = arith.constant 0 : index
    %c0_4 = arith.constant 0 : index
    %4 = vector.load %arg3[%c0_3, %c0_4] : memref<4x128xbf16, #tpu.memory_space<vmem>>, vector<4x128xbf16>
    %cst = arith.constant dense<0.000000e+00> : vector<128x128xf32>
    %5 = tpu.matmul %3, %4, %cst {dimension_numbers = #tpu.dot_dimension_numbers<[1], [0], [0], [1], [0, 0, 1, 1], [], []>} : vector<128x4xbf16>, vector<4x128xbf16>, vector<128x128xf32> -> vector<128x128xf32>
    %6 = vector.shape_cast %5 : vector<128x128xf32> to vector<8x16x128xf32>
    %c0_5 = arith.constant 0 : index
    %c0_6 = arith.constant 0 : index
    %c0_7 = arith.constant 0 : index
    %c0_8 = arith.constant 0 : index
    %7 = vector.load %arg4[%c0_5, %c0_6, %c0_7, %c0_8] : memref<1x8x16x128xf32, #tpu.memory_space<vmem>>, vector<1x8x16x128xf32>
    %8 = vector.shape_cast %7 : vector<1x8x16x128xf32> to vector<8x16x128xf32>
    %9 = vector.shape_cast %6 : vector<8x16x128xf32> to vector<1x8x16x128xf32>
    tpu.vector_store %arg4[%c0_5, %c0_6, %c0_7, %c0_8], %9 {strides = array<i32>} : memref<1x8x16x128xf32, #tpu.memory_space<vmem>>, vector<1x8x16x128xf32>,
    %c0_i32 = arith.constant 0 : i32
    %10 = arith.cmpi eq, %arg1, %c0_i32 : i32
    %cst_9 = arith.constant dense<0.000000e+00> : vector<128xf32>
    %11 = vector.multi_reduction <add>, %5, %cst_9 [0] : vector<128x128xf32> to vector<128xf32>
    %12 = vector.shape_cast %11 : vector<128xf32> to vector<1x128xf32>
    %13 = arith.mulf %5, %5 : vector<128x128xf32>
    %cst_10 = arith.constant dense<0.000000e+00> : vector<128xf32>
    %14 = vector.multi_reduction <add>, %13, %cst_10 [0] : vector<128x128xf32> to vector<128xf32>
    %15 = vector.shape_cast %14 : vector<128xf32> to vector<1x128xf32>
    %16 = tpu.concatenate %12, %15 in 0 : vector<1x128xf32>, vector<1x128xf32> -> vector<2x128xf32>
    %17 = arith.extui %10 : i1 to i32
    %c0_i32_11 = arith.constant 0 : i32
    %18 = arith.cmpi ne, %17, %c0_i32_11 : i32
    scf.if %18 {
      %cst_18 = arith.constant 0.000000e+00 : f32
      %25 = vector.broadcast %cst_18 : f32 to vector<1x2x128xf32>
      %c0_19 = arith.constant 0 : index
      %c0_20 = arith.constant 0 : index
      %c0_21 = arith.constant 0 : index
      %26 = vector.load %arg5[%c0_19, %c0_20, %c0_21] : memref<1x2x128xf32, #tpu.memory_space<vmem>>, vector<1x2x128xf32>
      tpu.vector_store %arg5[%c0_19, %c0_20, %c0_21], %25 {strides = array<i32>} : memref<1x2x128xf32, #tpu.memory_space<vmem>>, vector<1x2x128xf32>,
    } else {
    }
    %c0_12 = arith.constant 0 : index
    %c0_13 = arith.constant 0 : index
    %c0_14 = arith.constant 0 : index
    %19 = vector.load %arg5[%c0_12, %c0_13, %c0_14] : memref<1x2x128xf32, #tpu.memory_space<vmem>>, vector<1x2x128xf32>
    %20 = vector.shape_cast %19 : vector<1x2x128xf32> to vector<2x128xf32>
    %21 = arith.addf %20, %16 : vector<2x128xf32>
    %c0_15 = arith.constant 0 : index
    %c0_16 = arith.constant 0 : index
    %c0_17 = arith.constant 0 : index
    %22 = vector.load %arg5[%c0_15, %c0_16, %c0_17] : memref<1x2x128xf32, #tpu.memory_space<vmem>>, vector<1x2x128xf32>
    %23 = vector.shape_cast %22 : vector<1x2x128xf32> to vector<2x128xf32>
    %24 = vector.shape_cast %21 : vector<2x128xf32> to vector<1x2x128xf32>
    tpu.vector_store %arg5[%c0_15, %c0_16, %c0_17], %24 {strides = array<i32>} : memref<1x2x128xf32, #tpu.memory_space<vmem>>, vector<1x2x128xf32>,
    return
  }
  func.func @transform_0(%arg0: i32, %arg1: i32) -> (i32, i32, i32, i32) {
    %c0_i32 = arith.constant 0 : i32
    %c0_i32_0 = arith.constant 0 : i32
    %c0_i32_1 = arith.constant 0 : i32
    return %arg0, %arg1, %c0_i32, %c0_i32_0 : i32, i32, i32, i32
  }
  func.func @transform_1(%arg0: i32, %arg1: i32) -> (i32, i32) {
    %c0_i32 = arith.constant 0 : i32
    %c0_i32_0 = arith.constant 0 : i32
    %c0_i32_1 = arith.constant 0 : i32
    return %c0_i32, %c0_i32_0 : i32, i32
  }
  func.func @transform_2(%arg0: i32, %arg1: i32) -> (i32, i32, i32, i32) {
    %c0_i32 = arith.constant 0 : i32
    %c0_i32_0 = arith.constant 0 : i32
    %c0_i32_1 = arith.constant 0 : i32
    return %arg0, %arg1, %c0_i32, %c0_i32_0 : i32, i32, i32, i32
  }
  func.func @transform_3(%arg0: i32, %arg1: i32) -> (i32, i32, i32) {
    %c0_i32 = arith.constant 0 : i32
    %c0_i32_0 = arith.constant 0 : i32
    %c0_i32_1 = arith.constant 0 : i32
    return %arg0, %c0_i32, %c0_i32_0 : i32, i32, i32
  }
}

module attributes {stable_mosaic.version = 11 : i64} {
  func.func @_mid_kernel(%arg0: i32, %arg1: i32, %arg2: memref<1x8x16x128xf32, #tpu.memory_space<vmem>>, %arg3: memref<1x1x16x128xf32, #tpu.memory_space<vmem>>, %arg4: memref<1x1x16x128xf32, #tpu.memory_space<vmem>>, %arg5: memref<1x128xf32, #tpu.memory_space<vmem>>, %arg6: memref<1x128xf32, #tpu.memory_space<vmem>>, %arg7: memref<384x384xbf16, #tpu.memory_space<vmem>>, %arg8: memref<1x128xf32, #tpu.memory_space<vmem>>, %arg9: memref<1x8x16x128xf32, #tpu.memory_space<vmem>>, %arg10: memref<1x2x128xf32, #tpu.memory_space<vmem>>) attributes {dimension_semantics = [#tpu.dimension_semantics<parallel>, #tpu.dimension_semantics<arbitrary>], iteration_bounds = array<i64: 2, 2>, scalar_prefetch = 0 : i64, scratch_operands = 0 : i64, tpu.core_type = #tpu.core_type<tc>, window_params = [{transform_indices = @transform_0, window_bounds = array<i64: 1, 8, 16, 128>}, {transform_indices = @transform_1, window_bounds = array<i64: 1, 1, 16, 128>}, {transform_indices = @transform_2, window_bounds = array<i64: 1, 1, 16, 128>}, {pipeline_mode = #tpu.pipeline_mode<synchronous>, transform_indices = @transform_3, window_bounds = array<i64: 1, 128>}, {pipeline_mode = #tpu.pipeline_mode<synchronous>, transform_indices = @transform_4, window_bounds = array<i64: 1, 128>}, {pipeline_mode = #tpu.pipeline_mode<synchronous>, transform_indices = @transform_5, window_bounds = array<i64: 384, 384>}, {pipeline_mode = #tpu.pipeline_mode<synchronous>, transform_indices = @transform_6, window_bounds = array<i64: 1, 128>}, {transform_indices = @transform_7, window_bounds = array<i64: 1, 8, 16, 128>}, {transform_indices = @transform_8, window_bounds = array<i64: 1, 2, 128>}]} {
    %c0 = arith.constant 0 : index
    %c0_0 = arith.constant 0 : index
    %c0_1 = arith.constant 0 : index
    %c0_2 = arith.constant 0 : index
    %0 = vector.load %arg2[%c0, %c0_0, %c0_1, %c0_2] : memref<1x8x16x128xf32, #tpu.memory_space<vmem>>, vector<1x8x16x128xf32>
    %1 = vector.shape_cast %0 : vector<1x8x16x128xf32> to vector<8x16x128xf32>
    %c0_3 = arith.constant 0 : index
    %c0_4 = arith.constant 0 : index
    %c0_5 = arith.constant 0 : index
    %c0_6 = arith.constant 0 : index
    %2 = vector.load %arg3[%c0_3, %c0_4, %c0_5, %c0_6] : memref<1x1x16x128xf32, #tpu.memory_space<vmem>>, vector<1x1x16x128xf32>
    %3 = vector.shape_cast %2 : vector<1x1x16x128xf32> to vector<1x16x128xf32>
    %c0_7 = arith.constant 0 : index
    %c0_8 = arith.constant 0 : index
    %c0_9 = arith.constant 0 : index
    %c0_10 = arith.constant 0 : index
    %4 = vector.load %arg4[%c0_7, %c0_8, %c0_9, %c0_10] : memref<1x1x16x128xf32, #tpu.memory_space<vmem>>, vector<1x1x16x128xf32>
    %5 = vector.shape_cast %4 : vector<1x1x16x128xf32> to vector<1x16x128xf32>
    %c0_11 = arith.constant 0 : index
    %c0_12 = arith.constant 0 : index
    %6 = vector.load %arg5[%c0_11, %c0_12] : memref<1x128xf32, #tpu.memory_space<vmem>>, vector<1x128xf32>
    %c0_13 = arith.constant 0 : index
    %c0_14 = arith.constant 0 : index
    %7 = vector.load %arg6[%c0_13, %c0_14] : memref<1x128xf32, #tpu.memory_space<vmem>>, vector<1x128xf32>
    %c0_15 = arith.constant 0 : index
    %c0_16 = arith.constant 0 : index
    %8 = vector.load %arg7[%c0_15, %c0_16] : memref<384x384xbf16, #tpu.memory_space<vmem>>, vector<384x384xbf16>
    %c0_17 = arith.constant 0 : index
    %c0_18 = arith.constant 0 : index
    %9 = vector.load %arg8[%c0_17, %c0_18] : memref<1x128xf32, #tpu.memory_space<vmem>>, vector<1x128xf32>
    %c0_i32 = arith.constant 0 : i32
    %10 = arith.cmpi sgt, %arg1, %c0_i32 : i32
    %11 = vector.shape_cast %6 : vector<1x128xf32> to vector<1x1x128xf32>
    %12 = vector.broadcast %11 : vector<1x1x128xf32> to vector<1x16x128xf32>
    %13 = arith.mulf %3, %12 : vector<1x16x128xf32>
    %14 = vector.shape_cast %7 : vector<1x128xf32> to vector<1x1x128xf32>
    %15 = vector.broadcast %14 : vector<1x1x128xf32> to vector<1x16x128xf32>
    %16 = arith.addf %13, %15 : vector<1x16x128xf32>
    %cst = arith.constant 0.000000e+00 : f32
    %17 = vector.broadcast %cst : f32 to vector<1x16x128xf32>
    %18 = arith.cmpf oge, %16, %17 : vector<1x16x128xf32>
    %cst_19 = arith.constant 0.00999999977 : f32
    %19 = vector.broadcast %cst_19 : f32 to vector<1x16x128xf32>
    %20 = arith.mulf %19, %16 : vector<1x16x128xf32>
    %21 = arith.select %18, %16, %20 : vector<1x16x128xi1>, vector<1x16x128xf32>
    %cst_20 = arith.constant 0.000000e+00 : f32
    %22 = vector.broadcast %cst_20 : f32 to vector<1x16x128xf32>
    %23 = arith.select %10, %21, %22 : vector<1x16x128xf32>
    %24 = arith.truncf %23 : vector<1x16x128xf32> to vector<1x16x128xbf16>
    %c1_i32 = arith.constant 1 : i32
    %25 = arith.cmpi slt, %arg1, %c1_i32 : i32
    %26 = vector.shape_cast %6 : vector<1x128xf32> to vector<1x1x128xf32>
    %27 = vector.broadcast %26 : vector<1x1x128xf32> to vector<1x16x128xf32>
    %28 = arith.mulf %5, %27 : vector<1x16x128xf32>
    %29 = vector.shape_cast %7 : vector<1x128xf32> to vector<1x1x128xf32>
    %30 = vector.broadcast %29 : vector<1x1x128xf32> to vector<1x16x128xf32>
    %31 = arith.addf %28, %30 : vector<1x16x128xf32>
    %cst_21 = arith.constant 0.000000e+00 : f32
    %32 = vector.broadcast %cst_21 : f32 to vector<1x16x128xf32>
    %33 = arith.cmpf oge, %31, %32 : vector<1x16x128xf32>
    %cst_22 = arith.constant 0.00999999977 : f32
    %34 = vector.broadcast %cst_22 : f32 to vector<1x16x128xf32>
    %35 = arith.mulf %34, %31 : vector<1x16x128xf32>
    %36 = arith.select %33, %31, %35 : vector<1x16x128xi1>, vector<1x16x128xf32>
    %cst_23 = arith.constant 0.000000e+00 : f32
    %37 = vector.broadcast %cst_23 : f32 to vector<1x16x128xf32>
    %38 = arith.select %25, %36, %37 : vector<1x16x128xf32>
    %39 = arith.truncf %38 : vector<1x16x128xf32> to vector<1x16x128xbf16>
    %40 = vector.shape_cast %6 : vector<1x128xf32> to vector<1x1x128xf32>
    %41 = vector.broadcast %40 : vector<1x1x128xf32> to vector<8x16x128xf32>
    %42 = arith.mulf %1, %41 : vector<8x16x128xf32>
    %43 = vector.shape_cast %7 : vector<1x128xf32> to vector<1x1x128xf32>
    %44 = vector.broadcast %43 : vector<1x1x128xf32> to vector<8x16x128xf32>
    %45 = arith.addf %42, %44 : vector<8x16x128xf32>
    %cst_24 = arith.constant 0.000000e+00 : f32
    %46 = vector.broadcast %cst_24 : f32 to vector<8x16x128xf32>
    %47 = arith.cmpf oge, %45, %46 : vector<8x16x128xf32>
    %cst_25 = arith.constant 0.00999999977 : f32
    %48 = vector.broadcast %cst_25 : f32 to vector<8x16x128xf32>
    %49 = arith.mulf %48, %45 : vector<8x16x128xf32>
    %50 = arith.select %47, %45, %49 : vector<8x16x128xi1>, vector<8x16x128xf32>
    %51 = arith.truncf %50 : vector<8x16x128xf32> to vector<8x16x128xbf16>
    %52 = tpu.concatenate %24, %51, %39 in 0 : vector<1x16x128xbf16>, vector<8x16x128xbf16>, vector<1x16x128xbf16> -> vector<10x16x128xbf16>
    %53 = vector.extract_strided_slice %52 {offsets = [0, 0, 0], sizes = [8, 16, 128], strides = [1, 1, 1]} : vector<10x16x128xbf16> to vector<8x16x128xbf16>
    %54 = vector.extract_strided_slice %52 {offsets = [1, 0, 0], sizes = [8, 16, 128], strides = [1, 1, 1]} : vector<10x16x128xbf16> to vector<8x16x128xbf16>
    %55 = vector.extract_strided_slice %52 {offsets = [2, 0, 0], sizes = [8, 16, 128], strides = [1, 1, 1]} : vector<10x16x128xbf16> to vector<8x16x128xbf16>
    %56 = tpu.concatenate %53, %54, %55 in 2 : vector<8x16x128xbf16>, vector<8x16x128xbf16>, vector<8x16x128xbf16> -> vector<8x16x384xbf16>
    %57 = vector.shape_cast %56 : vector<8x16x384xbf16> to vector<128x384xbf16>
    %cst_26 = arith.constant dense<0.000000e+00> : vector<128x384xf32>
    %58 = tpu.matmul %57, %8, %cst_26 {dimension_numbers = #tpu.dot_dimension_numbers<[1], [0], [0], [1], [0, 0, 1, 1], [], []>} : vector<128x384xbf16>, vector<384x384xbf16>, vector<128x384xf32> -> vector<128x384xf32>
    %59 = vector.shape_cast %58 : vector<128x384xf32> to vector<8x16x384xf32>
    %cst_27 = arith.constant 0.000000e+00 : f32
    %60 = vector.broadcast %cst_27 : f32 to vector<8x1x128xf32>
    %61 = vector.extract_strided_slice %59 {offsets = [0, 0, 0], sizes = [8, 15, 128], strides = [1, 1, 1]} : vector<8x16x384xf32> to vector<8x15x128xf32>
    %62 = tpu.concatenate %60, %61 in 1 : vector<8x1x128xf32>, vector<8x15x128xf32> -> vector<8x16x128xf32>
    %63 = vector.extract_strided_slice %59 {offsets = [0, 1, 256], sizes = [8, 15, 128], strides = [1, 1, 1]} : vector<8x16x384xf32> to vector<8x15x128xf32>
    %64 = tpu.concatenate %63, %60 in 1 : vector<8x15x128xf32>, vector<8x1x128xf32> -> vector<8x16x128xf32>
    %65 = vector.extract_strided_slice %59 {offsets = [0, 0, 128], sizes = [8, 16, 128], strides = [1, 1, 1]} : vector<8x16x384xf32> to vector<8x16x128xf32>
    %66 = arith.addf %65, %62 : vector<8x16x128xf32>
    %67 = arith.addf %66, %64 : vector<8x16x128xf32>
    %68 = vector.shape_cast %9 : vector<1x128xf32> to vector<1x1x128xf32>
    %69 = vector.broadcast %68 : vector<1x1x128xf32> to vector<8x16x128xf32>
    %70 = arith.addf %67, %69 : vector<8x16x128xf32>
    %c0_28 = arith.constant 0 : index
    %c0_29 = arith.constant 0 : index
    %c0_30 = arith.constant 0 : index
    %c0_31 = arith.constant 0 : index
    %71 = vector.load %arg9[%c0_28, %c0_29, %c0_30, %c0_31] : memref<1x8x16x128xf32, #tpu.memory_space<vmem>>, vector<1x8x16x128xf32>
    %72 = vector.shape_cast %71 : vector<1x8x16x128xf32> to vector<8x16x128xf32>
    %73 = vector.shape_cast %70 : vector<8x16x128xf32> to vector<1x8x16x128xf32>
    tpu.vector_store %arg9[%c0_28, %c0_29, %c0_30, %c0_31], %73 {strides = array<i32>} : memref<1x8x16x128xf32, #tpu.memory_space<vmem>>, vector<1x8x16x128xf32>,
    %74 = vector.shape_cast %70 : vector<8x16x128xf32> to vector<128x128xf32>
    %c0_i32_32 = arith.constant 0 : i32
    %75 = arith.cmpi eq, %arg1, %c0_i32_32 : i32
    %cst_33 = arith.constant dense<0.000000e+00> : vector<128xf32>
    %76 = vector.multi_reduction <add>, %74, %cst_33 [0] : vector<128x128xf32> to vector<128xf32>
    %77 = vector.shape_cast %76 : vector<128xf32> to vector<1x128xf32>
    %78 = arith.mulf %74, %74 : vector<128x128xf32>
    %cst_34 = arith.constant dense<0.000000e+00> : vector<128xf32>
    %79 = vector.multi_reduction <add>, %78, %cst_34 [0] : vector<128x128xf32> to vector<128xf32>
    %80 = vector.shape_cast %79 : vector<128xf32> to vector<1x128xf32>
    %81 = tpu.concatenate %77, %80 in 0 : vector<1x128xf32>, vector<1x128xf32> -> vector<2x128xf32>
    %82 = arith.extui %75 : i1 to i32
    %c0_i32_35 = arith.constant 0 : i32
    %83 = arith.cmpi ne, %82, %c0_i32_35 : i32
    scf.if %83 {
      %cst_42 = arith.constant 0.000000e+00 : f32
      %90 = vector.broadcast %cst_42 : f32 to vector<1x2x128xf32>
      %c0_43 = arith.constant 0 : index
      %c0_44 = arith.constant 0 : index
      %c0_45 = arith.constant 0 : index
      %91 = vector.load %arg10[%c0_43, %c0_44, %c0_45] : memref<1x2x128xf32, #tpu.memory_space<vmem>>, vector<1x2x128xf32>
      tpu.vector_store %arg10[%c0_43, %c0_44, %c0_45], %90 {strides = array<i32>} : memref<1x2x128xf32, #tpu.memory_space<vmem>>, vector<1x2x128xf32>,
    } else {
    }
    %c0_36 = arith.constant 0 : index
    %c0_37 = arith.constant 0 : index
    %c0_38 = arith.constant 0 : index
    %84 = vector.load %arg10[%c0_36, %c0_37, %c0_38] : memref<1x2x128xf32, #tpu.memory_space<vmem>>, vector<1x2x128xf32>
    %85 = vector.shape_cast %84 : vector<1x2x128xf32> to vector<2x128xf32>
    %86 = arith.addf %85, %81 : vector<2x128xf32>
    %c0_39 = arith.constant 0 : index
    %c0_40 = arith.constant 0 : index
    %c0_41 = arith.constant 0 : index
    %87 = vector.load %arg10[%c0_39, %c0_40, %c0_41] : memref<1x2x128xf32, #tpu.memory_space<vmem>>, vector<1x2x128xf32>
    %88 = vector.shape_cast %87 : vector<1x2x128xf32> to vector<2x128xf32>
    %89 = vector.shape_cast %86 : vector<2x128xf32> to vector<1x2x128xf32>
    tpu.vector_store %arg10[%c0_39, %c0_40, %c0_41], %89 {strides = array<i32>} : memref<1x2x128xf32, #tpu.memory_space<vmem>>, vector<1x2x128xf32>,
    return
  }
  func.func @transform_0(%arg0: i32, %arg1: i32) -> (i32, i32, i32, i32) {
    %c0_i32 = arith.constant 0 : i32
    %c0_i32_0 = arith.constant 0 : i32
    %c0_i32_1 = arith.constant 0 : i32
    return %arg0, %arg1, %c0_i32, %c0_i32_0 : i32, i32, i32, i32
  }
  func.func @transform_1(%arg0: i32, %arg1: i32) -> (i32, i32, i32, i32) {
    %c8_i32 = arith.constant 8 : i32
    %0 = arith.muli %arg1, %c8_i32 : i32
    %c1_i32 = arith.constant 1 : i32
    %1 = arith.subi %0, %c1_i32 : i32
    %c0_i32 = arith.constant 0 : i32
    %2 = arith.maxsi %1, %c0_i32 : i32
    %c0_i32_0 = arith.constant 0 : i32
    %c0_i32_1 = arith.constant 0 : i32
    %c0_i32_2 = arith.constant 0 : i32
    return %arg0, %2, %c0_i32_0, %c0_i32_1 : i32, i32, i32, i32
  }
  func.func @transform_2(%arg0: i32, %arg1: i32) -> (i32, i32, i32, i32) {
    %c1_i32 = arith.constant 1 : i32
    %0 = arith.addi %arg1, %c1_i32 : i32
    %c8_i32 = arith.constant 8 : i32
    %1 = arith.muli %0, %c8_i32 : i32
    %c15_i32 = arith.constant 15 : i32
    %2 = arith.minsi %1, %c15_i32 : i32
    %c0_i32 = arith.constant 0 : i32
    %c0_i32_0 = arith.constant 0 : i32
    %c0_i32_1 = arith.constant 0 : i32
    return %arg0, %2, %c0_i32, %c0_i32_0 : i32, i32, i32, i32
  }
  func.func @transform_3(%arg0: i32, %arg1: i32) -> (i32, i32) {
    %c0_i32 = arith.constant 0 : i32
    %c0_i32_0 = arith.constant 0 : i32
    %c0_i32_1 = arith.constant 0 : i32
    return %c0_i32, %c0_i32_0 : i32, i32
  }
  func.func @transform_4(%arg0: i32, %arg1: i32) -> (i32, i32) {
    %c0_i32 = arith.constant 0 : i32
    %c0_i32_0 = arith.constant 0 : i32
    %c0_i32_1 = arith.constant 0 : i32
    return %c0_i32, %c0_i32_0 : i32, i32
  }
  func.func @transform_5(%arg0: i32, %arg1: i32) -> (i32, i32) {
    %c0_i32 = arith.constant 0 : i32
    %c0_i32_0 = arith.constant 0 : i32
    %c0_i32_1 = arith.constant 0 : i32
    return %c0_i32, %c0_i32_0 : i32, i32
  }
  func.func @transform_6(%arg0: i32, %arg1: i32) -> (i32, i32) {
    %c0_i32 = arith.constant 0 : i32
    %c0_i32_0 = arith.constant 0 : i32
    %c0_i32_1 = arith.constant 0 : i32
    return %c0_i32, %c0_i32_0 : i32, i32
  }
  func.func @transform_7(%arg0: i32, %arg1: i32) -> (i32, i32, i32, i32) {
    %c0_i32 = arith.constant 0 : i32
    %c0_i32_0 = arith.constant 0 : i32
    %c0_i32_1 = arith.constant 0 : i32
    return %arg0, %arg1, %c0_i32, %c0_i32_0 : i32, i32, i32, i32
  }
  func.func @transform_8(%arg0: i32, %arg1: i32) -> (i32, i32, i32) {
    %c0_i32 = arith.constant 0 : i32
    %c0_i32_0 = arith.constant 0 : i32
    %c0_i32_1 = arith.constant 0 : i32
    return %arg0, %c0_i32, %c0_i32_0 : i32, i32, i32
  }
}

module attributes {stable_mosaic.version = 11 : i64} {
  func.func @_last_kernel(%arg0: i32, %arg1: i32, %arg2: memref<1x8x16x128xf32, #tpu.memory_space<vmem>>, %arg3: memref<1x1x16x128xf32, #tpu.memory_space<vmem>>, %arg4: memref<1x1x16x128xf32, #tpu.memory_space<vmem>>, %arg5: memref<1x8x16x128xf32, #tpu.memory_space<vmem>>, %arg6: memref<1x128xf32, #tpu.memory_space<vmem>>, %arg7: memref<1x128xf32, #tpu.memory_space<vmem>>, %arg8: memref<384x384xbf16, #tpu.memory_space<vmem>>, %arg9: memref<1x128xf32, #tpu.memory_space<vmem>>, %arg10: memref<1x8x16x128xf32, #tpu.memory_space<vmem>>) attributes {dimension_semantics = [#tpu.dimension_semantics<parallel>, #tpu.dimension_semantics<parallel>], iteration_bounds = array<i64: 2, 2>, scalar_prefetch = 0 : i64, scratch_operands = 0 : i64, tpu.core_type = #tpu.core_type<tc>, window_params = [{transform_indices = @transform_0, window_bounds = array<i64: 1, 8, 16, 128>}, {transform_indices = @transform_1, window_bounds = array<i64: 1, 1, 16, 128>}, {transform_indices = @transform_2, window_bounds = array<i64: 1, 1, 16, 128>}, {transform_indices = @transform_3, window_bounds = array<i64: 1, 8, 16, 128>}, {pipeline_mode = #tpu.pipeline_mode<synchronous>, transform_indices = @transform_4, window_bounds = array<i64: 1, 128>}, {pipeline_mode = #tpu.pipeline_mode<synchronous>, transform_indices = @transform_5, window_bounds = array<i64: 1, 128>}, {pipeline_mode = #tpu.pipeline_mode<synchronous>, transform_indices = @transform_6, window_bounds = array<i64: 384, 384>}, {pipeline_mode = #tpu.pipeline_mode<synchronous>, transform_indices = @transform_7, window_bounds = array<i64: 1, 128>}, {transform_indices = @transform_8, window_bounds = array<i64: 1, 8, 16, 128>}]} {
    %c0 = arith.constant 0 : index
    %c0_0 = arith.constant 0 : index
    %c0_1 = arith.constant 0 : index
    %c0_2 = arith.constant 0 : index
    %0 = vector.load %arg2[%c0, %c0_0, %c0_1, %c0_2] : memref<1x8x16x128xf32, #tpu.memory_space<vmem>>, vector<1x8x16x128xf32>
    %1 = vector.shape_cast %0 : vector<1x8x16x128xf32> to vector<8x16x128xf32>
    %c0_3 = arith.constant 0 : index
    %c0_4 = arith.constant 0 : index
    %c0_5 = arith.constant 0 : index
    %c0_6 = arith.constant 0 : index
    %2 = vector.load %arg3[%c0_3, %c0_4, %c0_5, %c0_6] : memref<1x1x16x128xf32, #tpu.memory_space<vmem>>, vector<1x1x16x128xf32>
    %3 = vector.shape_cast %2 : vector<1x1x16x128xf32> to vector<1x16x128xf32>
    %c0_7 = arith.constant 0 : index
    %c0_8 = arith.constant 0 : index
    %c0_9 = arith.constant 0 : index
    %c0_10 = arith.constant 0 : index
    %4 = vector.load %arg4[%c0_7, %c0_8, %c0_9, %c0_10] : memref<1x1x16x128xf32, #tpu.memory_space<vmem>>, vector<1x1x16x128xf32>
    %5 = vector.shape_cast %4 : vector<1x1x16x128xf32> to vector<1x16x128xf32>
    %c0_11 = arith.constant 0 : index
    %c0_12 = arith.constant 0 : index
    %6 = vector.load %arg6[%c0_11, %c0_12] : memref<1x128xf32, #tpu.memory_space<vmem>>, vector<1x128xf32>
    %c0_13 = arith.constant 0 : index
    %c0_14 = arith.constant 0 : index
    %7 = vector.load %arg7[%c0_13, %c0_14] : memref<1x128xf32, #tpu.memory_space<vmem>>, vector<1x128xf32>
    %c0_15 = arith.constant 0 : index
    %c0_16 = arith.constant 0 : index
    %8 = vector.load %arg8[%c0_15, %c0_16] : memref<384x384xbf16, #tpu.memory_space<vmem>>, vector<384x384xbf16>
    %c0_17 = arith.constant 0 : index
    %c0_18 = arith.constant 0 : index
    %9 = vector.load %arg9[%c0_17, %c0_18] : memref<1x128xf32, #tpu.memory_space<vmem>>, vector<1x128xf32>
    %c0_i32 = arith.constant 0 : i32
    %10 = arith.cmpi sgt, %arg1, %c0_i32 : i32
    %11 = vector.shape_cast %6 : vector<1x128xf32> to vector<1x1x128xf32>
    %12 = vector.broadcast %11 : vector<1x1x128xf32> to vector<1x16x128xf32>
    %13 = arith.mulf %3, %12 : vector<1x16x128xf32>
    %14 = vector.shape_cast %7 : vector<1x128xf32> to vector<1x1x128xf32>
    %15 = vector.broadcast %14 : vector<1x1x128xf32> to vector<1x16x128xf32>
    %16 = arith.addf %13, %15 : vector<1x16x128xf32>
    %cst = arith.constant 0.000000e+00 : f32
    %17 = vector.broadcast %cst : f32 to vector<1x16x128xf32>
    %18 = arith.cmpf oge, %16, %17 : vector<1x16x128xf32>
    %cst_19 = arith.constant 0.00999999977 : f32
    %19 = vector.broadcast %cst_19 : f32 to vector<1x16x128xf32>
    %20 = arith.mulf %19, %16 : vector<1x16x128xf32>
    %21 = arith.select %18, %16, %20 : vector<1x16x128xi1>, vector<1x16x128xf32>
    %cst_20 = arith.constant 0.000000e+00 : f32
    %22 = vector.broadcast %cst_20 : f32 to vector<1x16x128xf32>
    %23 = arith.select %10, %21, %22 : vector<1x16x128xf32>
    %24 = arith.truncf %23 : vector<1x16x128xf32> to vector<1x16x128xbf16>
    %c1_i32 = arith.constant 1 : i32
    %25 = arith.cmpi slt, %arg1, %c1_i32 : i32
    %26 = vector.shape_cast %6 : vector<1x128xf32> to vector<1x1x128xf32>
    %27 = vector.broadcast %26 : vector<1x1x128xf32> to vector<1x16x128xf32>
    %28 = arith.mulf %5, %27 : vector<1x16x128xf32>
    %29 = vector.shape_cast %7 : vector<1x128xf32> to vector<1x1x128xf32>
    %30 = vector.broadcast %29 : vector<1x1x128xf32> to vector<1x16x128xf32>
    %31 = arith.addf %28, %30 : vector<1x16x128xf32>
    %cst_21 = arith.constant 0.000000e+00 : f32
    %32 = vector.broadcast %cst_21 : f32 to vector<1x16x128xf32>
    %33 = arith.cmpf oge, %31, %32 : vector<1x16x128xf32>
    %cst_22 = arith.constant 0.00999999977 : f32
    %34 = vector.broadcast %cst_22 : f32 to vector<1x16x128xf32>
    %35 = arith.mulf %34, %31 : vector<1x16x128xf32>
    %36 = arith.select %33, %31, %35 : vector<1x16x128xi1>, vector<1x16x128xf32>
    %cst_23 = arith.constant 0.000000e+00 : f32
    %37 = vector.broadcast %cst_23 : f32 to vector<1x16x128xf32>
    %38 = arith.select %25, %36, %37 : vector<1x16x128xf32>
    %39 = arith.truncf %38 : vector<1x16x128xf32> to vector<1x16x128xbf16>
    %40 = vector.shape_cast %6 : vector<1x128xf32> to vector<1x1x128xf32>
    %41 = vector.broadcast %40 : vector<1x1x128xf32> to vector<8x16x128xf32>
    %42 = arith.mulf %1, %41 : vector<8x16x128xf32>
    %43 = vector.shape_cast %7 : vector<1x128xf32> to vector<1x1x128xf32>
    %44 = vector.broadcast %43 : vector<1x1x128xf32> to vector<8x16x128xf32>
    %45 = arith.addf %42, %44 : vector<8x16x128xf32>
    %cst_24 = arith.constant 0.000000e+00 : f32
    %46 = vector.broadcast %cst_24 : f32 to vector<8x16x128xf32>
    %47 = arith.cmpf oge, %45, %46 : vector<8x16x128xf32>
    %cst_25 = arith.constant 0.00999999977 : f32
    %48 = vector.broadcast %cst_25 : f32 to vector<8x16x128xf32>
    %49 = arith.mulf %48, %45 : vector<8x16x128xf32>
    %50 = arith.select %47, %45, %49 : vector<8x16x128xi1>, vector<8x16x128xf32>
    %51 = arith.truncf %50 : vector<8x16x128xf32> to vector<8x16x128xbf16>
    %52 = tpu.concatenate %24, %51, %39 in 0 : vector<1x16x128xbf16>, vector<8x16x128xbf16>, vector<1x16x128xbf16> -> vector<10x16x128xbf16>
    %53 = vector.extract_strided_slice %52 {offsets = [0, 0, 0], sizes = [8, 16, 128], strides = [1, 1, 1]} : vector<10x16x128xbf16> to vector<8x16x128xbf16>
    %54 = vector.extract_strided_slice %52 {offsets = [1, 0, 0], sizes = [8, 16, 128], strides = [1, 1, 1]} : vector<10x16x128xbf16> to vector<8x16x128xbf16>
    %55 = vector.extract_strided_slice %52 {offsets = [2, 0, 0], sizes = [8, 16, 128], strides = [1, 1, 1]} : vector<10x16x128xbf16> to vector<8x16x128xbf16>
    %56 = tpu.concatenate %53, %54, %55 in 2 : vector<8x16x128xbf16>, vector<8x16x128xbf16>, vector<8x16x128xbf16> -> vector<8x16x384xbf16>
    %57 = vector.shape_cast %56 : vector<8x16x384xbf16> to vector<128x384xbf16>
    %cst_26 = arith.constant dense<0.000000e+00> : vector<128x384xf32>
    %58 = tpu.matmul %57, %8, %cst_26 {dimension_numbers = #tpu.dot_dimension_numbers<[1], [0], [0], [1], [0, 0, 1, 1], [], []>} : vector<128x384xbf16>, vector<384x384xbf16>, vector<128x384xf32> -> vector<128x384xf32>
    %59 = vector.shape_cast %58 : vector<128x384xf32> to vector<8x16x384xf32>
    %cst_27 = arith.constant 0.000000e+00 : f32
    %60 = vector.broadcast %cst_27 : f32 to vector<8x1x128xf32>
    %61 = vector.extract_strided_slice %59 {offsets = [0, 0, 0], sizes = [8, 15, 128], strides = [1, 1, 1]} : vector<8x16x384xf32> to vector<8x15x128xf32>
    %62 = tpu.concatenate %60, %61 in 1 : vector<8x1x128xf32>, vector<8x15x128xf32> -> vector<8x16x128xf32>
    %63 = vector.extract_strided_slice %59 {offsets = [0, 1, 256], sizes = [8, 15, 128], strides = [1, 1, 1]} : vector<8x16x384xf32> to vector<8x15x128xf32>
    %64 = tpu.concatenate %63, %60 in 1 : vector<8x15x128xf32>, vector<8x1x128xf32> -> vector<8x16x128xf32>
    %65 = vector.extract_strided_slice %59 {offsets = [0, 0, 128], sizes = [8, 16, 128], strides = [1, 1, 1]} : vector<8x16x384xf32> to vector<8x16x128xf32>
    %66 = arith.addf %65, %62 : vector<8x16x128xf32>
    %67 = arith.addf %66, %64 : vector<8x16x128xf32>
    %68 = vector.shape_cast %9 : vector<1x128xf32> to vector<1x1x128xf32>
    %69 = vector.broadcast %68 : vector<1x1x128xf32> to vector<8x16x128xf32>
    %70 = arith.addf %67, %69 : vector<8x16x128xf32>
    %c0_28 = arith.constant 0 : index
    %c0_29 = arith.constant 0 : index
    %c0_30 = arith.constant 0 : index
    %c0_31 = arith.constant 0 : index
    %71 = vector.load %arg5[%c0_28, %c0_29, %c0_30, %c0_31] : memref<1x8x16x128xf32, #tpu.memory_space<vmem>>, vector<1x8x16x128xf32>
    %72 = vector.shape_cast %71 : vector<1x8x16x128xf32> to vector<8x16x128xf32>
    %73 = arith.addf %70, %72 : vector<8x16x128xf32>
    %c0_32 = arith.constant 0 : index
    %c0_33 = arith.constant 0 : index
    %c0_34 = arith.constant 0 : index
    %c0_35 = arith.constant 0 : index
    %74 = vector.load %arg10[%c0_32, %c0_33, %c0_34, %c0_35] : memref<1x8x16x128xf32, #tpu.memory_space<vmem>>, vector<1x8x16x128xf32>
    %75 = vector.shape_cast %74 : vector<1x8x16x128xf32> to vector<8x16x128xf32>
    %76 = vector.shape_cast %73 : vector<8x16x128xf32> to vector<1x8x16x128xf32>
    tpu.vector_store %arg10[%c0_32, %c0_33, %c0_34, %c0_35], %76 {strides = array<i32>} : memref<1x8x16x128xf32, #tpu.memory_space<vmem>>, vector<1x8x16x128xf32>,
    return
  }
  func.func @transform_0(%arg0: i32, %arg1: i32) -> (i32, i32, i32, i32) {
    %c0_i32 = arith.constant 0 : i32
    %c0_i32_0 = arith.constant 0 : i32
    %c0_i32_1 = arith.constant 0 : i32
    return %arg0, %arg1, %c0_i32, %c0_i32_0 : i32, i32, i32, i32
  }
  func.func @transform_1(%arg0: i32, %arg1: i32) -> (i32, i32, i32, i32) {
    %c8_i32 = arith.constant 8 : i32
    %0 = arith.muli %arg1, %c8_i32 : i32
    %c1_i32 = arith.constant 1 : i32
    %1 = arith.subi %0, %c1_i32 : i32
    %c0_i32 = arith.constant 0 : i32
    %2 = arith.maxsi %1, %c0_i32 : i32
    %c0_i32_0 = arith.constant 0 : i32
    %c0_i32_1 = arith.constant 0 : i32
    %c0_i32_2 = arith.constant 0 : i32
    return %arg0, %2, %c0_i32_0, %c0_i32_1 : i32, i32, i32, i32
  }
  func.func @transform_2(%arg0: i32, %arg1: i32) -> (i32, i32, i32, i32) {
    %c1_i32 = arith.constant 1 : i32
    %0 = arith.addi %arg1, %c1_i32 : i32
    %c8_i32 = arith.constant 8 : i32
    %1 = arith.muli %0, %c8_i32 : i32
    %c15_i32 = arith.constant 15 : i32
    %2 = arith.minsi %1, %c15_i32 : i32
    %c0_i32 = arith.constant 0 : i32
    %c0_i32_0 = arith.constant 0 : i32
    %c0_i32_1 = arith.constant 0 : i32
    return %arg0, %2, %c0_i32, %c0_i32_0 : i32, i32, i32, i32
  }
  func.func @transform_3(%arg0: i32, %arg1: i32) -> (i32, i32, i32, i32) {
    %c0_i32 = arith.constant 0 : i32
    %c0_i32_0 = arith.constant 0 : i32
    %c0_i32_1 = arith.constant 0 : i32
    return %arg0, %arg1, %c0_i32, %c0_i32_0 : i32, i32, i32, i32
  }
  func.func @transform_4(%arg0: i32, %arg1: i32) -> (i32, i32) {
    %c0_i32 = arith.constant 0 : i32
    %c0_i32_0 = arith.constant 0 : i32
    %c0_i32_1 = arith.constant 0 : i32
    return %c0_i32, %c0_i32_0 : i32, i32
  }
  func.func @transform_5(%arg0: i32, %arg1: i32) -> (i32, i32) {
    %c0_i32 = arith.constant 0 : i32
    %c0_i32_0 = arith.constant 0 : i32
    %c0_i32_1 = arith.constant 0 : i32
    return %c0_i32, %c0_i32_0 : i32, i32
  }
  func.func @transform_6(%arg0: i32, %arg1: i32) -> (i32, i32) {
    %c0_i32 = arith.constant 0 : i32
    %c0_i32_0 = arith.constant 0 : i32
    %c0_i32_1 = arith.constant 0 : i32
    return %c0_i32, %c0_i32_0 : i32, i32
  }
  func.func @transform_7(%arg0: i32, %arg1: i32) -> (i32, i32) {
    %c0_i32 = arith.constant 0 : i32
    %c0_i32_0 = arith.constant 0 : i32
    %c0_i32_1 = arith.constant 0 : i32
    return %c0_i32, %c0_i32_0 : i32, i32
  }
  func.func @transform_8(%arg0: i32, %arg1: i32) -> (i32, i32, i32, i32) {
    %c0_i32 = arith.constant 0 : i32
    %c0_i32_0 = arith.constant 0 : i32
    %c0_i32_1 = arith.constant 0 : i32
    return %arg0, %arg1, %c0_i32, %c0_i32_0 : i32, i32, i32, i32
  }
}

</mosaic_0001>

<bundles_post_ra>
// kernel: resblock2d_pallas_nhwc.3
= control target key start
LH: loop header
LB: loop body
LE: loop exit
PB: predicated region body
PF: predicated region fallthrough
CT: control target
= control target key end

     0   :  { %s750_s12 = smov 0   ;;  %s752_s13 = smov 0   ;;  %s849_s0 = inlined_call_operand.vmem [shape: f32[2,16,16,4], index: 0, kind: input, shape index: {}]   ;;  %s850_s1 = inlined_call_operand.vmem [shape: bf16[4,128], index: 1, kind: input, shape index: {}]   ;;  %s851_s2 = inlined_call_operand.vmem [shape: f32[2,16,16,128], index: 2, kind: output, shape index: {0}]   ;;  %s852_s3 = inlined_call_operand.vmem [shape: f32[2,2,128], index: 3, kind: output, shape index: {1}]  }
   0x1   :  { %s754_s14 = smov 0   ;;  %s756_s15 = smov 0  }
   0x2   :  { %s758_s16 = smov 0  }
   0x3 LB: > { %s23_s17 = sadd.s32 1, %s719_s14  ;;  %s26_s18 = sadd.s32 1, %s723_s15  ;;  %s727_s16 = sphi %s758_s16, %s14_s16   ;;  %s723_s15 = sphi %s756_s15, %s856_s15   ;;  %s719_s14 = sphi %s754_s14, %s855_s14   ;;  %s715_s13 = sphi %s752_s13, %s854_s13   ;;  %s711_s12 = sphi %s750_s12, %s853_s12  }
   0x4   : > { %p24_p0 = scmp.ge.s32.totalorder %s23_s17, 2  ;;  %p596_p1 = scmp.ge.s32.totalorder %s727_s16, 1 }
   0x5   : > { %p162_p2 = scmp.lt.s32.totalorder %s727_s16, 5 }
   0x6   : > { %s858_s17 = smov (%p24_p0, %s23_s17), 0  ;;  %s860_s18 = smov (!%p24_p0, %s26_s18), %s723_s15 }
   0x7   : > { %p163_p3 = pnand %p596_p1, %p162_p2  ;;  %p28_p4 = scmp.ge.s32.totalorder %s860_s18, 2 }
   0x8   : > { %s597_s21 = sshll.u32 (!%p163_p3), %s711_s12, 3  ;;  %p201_p5 = scmp.lt.s32.totalorder (!%p163_p3), %s715_s13, 1 }
   0x9   : > { %s862_s18 = smov (%p28_p4, %s860_s18), 0  ;;  %166 = sbr.rel (%p163_p3) target bundleno = 280 (0x118), region = 28 }
   0xa   : > { %p203_p6 = scmp.lt.s32.totalorder (!%p163_p3), %s597_s21, 15  ;;  %p614_p7 = scmp.ne.s32.totalorder (!%p163_p3), %s711_s12, 0 }
   0xe   : > { %v251_v0 = vld [vmem:[%s850_s1] sm:$0x3]  ;;  %vm277_vm0 = vcmask 1041408   ;;  %s864_s13 = smov (!%p201_p5, %s715_s13), 1  ;;  %s866_s21 = smov (!%p203_p6, %s597_s21), 15  ;;  %vm252_vm1 = vcmask 31744  }
   0xf   : > { %646 = vmatprep.subr.msk.bf16.mxu0 %vm277_vm0, %v251_v0  ;;  %v279_v1 = vsel %vm277_vm0, %v251_v0, 0  ;;  %647 = vmatprep.subr.msk.bf16.mxu1 %vm277_vm0, %v251_v0  ;;  %s599_s22 = sshll.u32 %s864_s13, 5  ;;  %s605_s23 = sshll.u32 %s864_s13, 1  ;;  %vm453_vm2 = vcmask 1040384  }
  0x10   : > { %627 = vmatpush3.bf16.msra.mxu0 %v279_v1  ;;  %645 = vmatpush3.bf16.msra.mxu1 %v279_v1  ;;  %s598_s24 = sshll.u32 %s866_s21, 1  ;;  %s789_s27 = scalar_lea.vmem %s852_s3, %s605_s23 }
  0x11   : > { %s791_s28 = sadd.s32 %s599_s22, %s598_s24 }
  0x12   : > { %s600_s29 = sshll.u32 %s791_s28, 3 }
  0x13   : > { %s209_s5 = scalar_lea.vmem %s849_s0, %s600_s29  ;;  %s812_s8 = scalar_lea.vmem %s851_s2, %s600_s29 }
  0x14   : > { %v227_v2 = vld [vmem:[%s209_s5] sm:$0xff]  ;;  %v228_v3 = vld [vmem:[%s209_s5 + $0x8] sm:$0xff]  ;;  %v229_v4 = vld [vmem:[%s209_s5 + $0x10] sm:$0xff] }
  0x15   : > { %v243_v5 = vpack.c.bf16 %v228_v3, %v227_v2  ;;  %v230_v6 = vld [vmem:[%s209_s5 + $0x18] sm:$0xff]  ;;  %v231_v7 = vld [vmem:[%s209_s5 + $0x20] sm:$0xff]  ;;  %v232_v8 = vld [vmem:[%s209_s5 + $0x28] sm:$0xff] }
  0x16   : > { %v244_v9 = vpack.c.bf16 %v230_v6, %v229_v4  ;;  %v245_v10 = vpack.c.bf16 %v232_v8, %v231_v7  ;;  %v235_v11 = vld [vmem:[%s209_s5 + $0x40] sm:$0xff]  ;;  %v236_v12 = vld [vmem:[%s209_s5 + $0x48] sm:$0xff]  ;;  %v237_v13 = vld [vmem:[%s209_s5 + $0x50] sm:$0xff] }
  0x17   : > { %628 = vmatprep.mubr.msk.bf16.mxu0 %vm252_vm1, %v243_v5  ;;  %v238_v14 = vld [vmem:[%s209_s5 + $0x58] sm:$0xff]  ;;  %v247_v15 = vpack.c.bf16 %v236_v12, %v235_v11  ;;  %v239_v17 = vld [vmem:[%s209_s5 + $0x60] sm:$0xff]  ;;  %v240_v18 = vld [vmem:[%s209_s5 + $0x68] sm:$0xff] }
  0x18   : > { %629 = vmatmul.mubr.msk.bf16.vlgmr.msra.gmra.mxu0 %vm252_vm1, %v244_v9  ;;  %v248_v16 = vpack.c.bf16 %v238_v14, %v237_v13  ;;  %v233_v19 = vld [vmem:[%s209_s5 + $0x30] sm:$0xff]  ;;  %v234_v20 = vld [vmem:[%s209_s5 + $0x38] sm:$0xff]  ;;  %v249_v21 = vpack.c.bf16 %v240_v18, %v239_v17 }
  0x19   : > { %632 = vmatprep.mubr.msk.bf16.mxu0 %vm252_vm1, %v245_v10  ;;  %636 = vmatprep.mubr.msk.bf16.mxu1 %vm252_vm1, %v247_v15  ;;  %v246_v22 = vpack.c.bf16 %v234_v20, %v233_v19  ;;  %v241_v23 = vld [vmem:[%s209_s5 + $0x70] sm:$0xff]  ;;  %v242_v24 = vld [vmem:[%s209_s5 + $0x78] sm:$0xff] }
  0x1a   : > { %637 = vmatmul.mubr.msk.bf16.vlgmr.msra.gmra.mxu1 %vm252_vm1, %v248_v16  ;;  %v250_v25 = vpack.c.bf16 %v242_v24, %v241_v23 }
  0x1b   : > { %640 = vmatprep.mubr.msk.bf16.mxu1 %vm252_vm1, %v249_v21 }
  0x20   : > { %633 = vmatmul.mubr.msk.bf16.gmra.mxu0 %vm252_vm1, %v246_v22 }
  0x22   : > { %641 = vmatmul.mubr.msk.bf16.gmra.mxu1 %vm252_vm1, %v250_v25 }
  0xd8   : > { %v630_v26 = vpop.f32.mrf.mxu0 }
  0xd9   : > { %380 = vst [vmem:[%s812_s8 + $0x10] sm:$0xff] %v630_v26  ;;  %v418_v37 = vmul.f32 %v630_v26, %v630_v26 }
  0xda   : > { %v315_v27 = vpop.f32.mrf.mxu0  ;;  %v638_v28 = vpop.f32.mrf.mxu1 }
  0xdb   : > { %378 = vst [vmem:[%s812_s8] sm:$0xff] %v315_v27  ;;  %388 = vst [vmem:[%s812_s8 + $0x50] sm:$0xff] %v638_v28  ;;  %v416_v32 = vmul.f32 %v315_v27, %v315_v27  ;;  %v426_v5 = vmul.f32 %v638_v28, %v638_v28 }
  0xdc   : > { %v631_v29 = vpop.f32.mrf.mxu0  ;;  %v347_v30 = vpop.f32.mrf.mxu1 }
  0xdd   : > { %381 = vst [vmem:[%s812_s8 + $0x18] sm:$0xff] %v631_v29  ;;  %386 = vst [vmem:[%s812_s8 + $0x40] sm:$0xff] %v347_v30  ;;  %v419_v42 = vmul.f32 %v631_v29, %v631_v29  ;;  %v424_v63 = vmul.f32 %v347_v30, %v347_v30 }
  0xde   : > { %v318_v31 = vpop.f32.mrf.mxu0  ;;  %v639_v35 = vpop.f32.mrf.mxu1 }
  0xdf   : > { %379 = vst [vmem:[%s812_s8 + $0x8] sm:$0xff] %v318_v31  ;;  %v395_v33 = vadd.f32 %v318_v31, %v315_v27  ;;  %v417_v34 = vmul.f32 %v318_v31, %v318_v31  ;;  %389 = vst [vmem:[%s812_s8 + $0x58] sm:$0xff] %v639_v35  ;;  %v427_v8 = vmul.f32 %v639_v35, %v639_v35 }
  0xe0   : > { %v634_v36 = vpop.f32.mrf.mxu0  ;;  %v350_v40 = vpop.f32.mrf.mxu1 }
  0xe1   : > { %v396_v38 = vadd.f32 %v630_v26, %v395_v33  ;;  %v432_v39 = vadd.f32 %v417_v34, %v416_v32  ;;  %384 = vst [vmem:[%s812_s8 + $0x30] sm:$0xff] %v634_v36  ;;  %387 = vst [vmem:[%s812_s8 + $0x48] sm:$0xff] %v350_v40  ;;  %v422_v56 = vmul.f32 %v634_v36, %v634_v36 }
  0xe2   : > { %v331_v41 = vpop.f32.mrf.mxu0  ;;  %v642_v45 = vpop.f32.mrf.mxu1  ;;  %v425_v3 = vmul.f32 %v350_v40, %v350_v40 }
  0xe3   : > { %v433_v43 = vadd.f32 %v432_v39, %v418_v37  ;;  %382 = vst [vmem:[%s812_s8 + $0x20] sm:$0xff] %v331_v41  ;;  %v397_v44 = vadd.f32 %v631_v29, %v396_v38  ;;  %392 = vst [vmem:[%s812_s8 + $0x70] sm:$0xff] %v642_v45  ;;  %v420_v48 = vmul.f32 %v331_v41, %v331_v41 }
  0xe4   : > { %v635_v46 = vpop.f32.mrf.mxu0  ;;  %v363_v50 = vpop.f32.mrf.mxu1  ;;  %v430_v17 = vmul.f32 %v642_v45, %v642_v45 }
  0xe5   : > { %v398_v47 = vadd.f32 %v397_v44, %v331_v41  ;;  %v434_v49 = vadd.f32 %v433_v43, %v419_v42  ;;  %385 = vst [vmem:[%s812_s8 + $0x38] sm:$0xff] %v635_v46  ;;  %390 = vst [vmem:[%s812_s8 + $0x60] sm:$0xff] %v363_v50  ;;  %v423_v60 = vmul.f32 %v635_v46, %v635_v46 }
  0xe6   : > { %v334_v51 = vpop.f32.mrf.mxu0  ;;  %v643_v55 = vpop.f32.mrf.mxu1  ;;  %v428_v12 = vmul.f32 %v363_v50, %v363_v50 }
  0xe7   : > { %v435_v52 = vadd.f32 %v434_v49, %v420_v48  ;;  %383 = vst [vmem:[%s812_s8 + $0x28] sm:$0xff] %v334_v51  ;;  %v399_v53 = vadd.f32 %v398_v47, %v334_v51  ;;  %v421_v54 = vmul.f32 %v334_v51, %v334_v51  ;;  %393 = vst [vmem:[%s812_s8 + $0x78] sm:$0xff] %v643_v55 }
  0xe8   : > { %v366_v59 = vpop.f32.mrf.mxu1  ;;  %v431_v20 = vmul.f32 %v643_v55, %v643_v55 }
  0xe9   : > { %v400_v57 = vadd.f32 %v634_v36, %v399_v53  ;;  %v436_v58 = vadd.f32 %v435_v52, %v421_v54  ;;  %391 = vst [vmem:[%s812_s8 + $0x68] sm:$0xff] %v366_v59  ;;  %v429_v16 = vmul.f32 %v366_v59, %v366_v59 }
  0xeb   : > { %v401_v61 = vadd.f32 %v635_v46, %v400_v57  ;;  %v437_v62 = vadd.f32 %v436_v58, %v422_v56 }
  0xed   : > { %v438_v0 = vadd.f32 %v437_v62, %v423_v60  ;;  %v402_v1 = vadd.f32 %v401_v61, %v347_v30 }
  0xef   : > { %v403_v2 = vadd.f32 %v402_v1, %v350_v40  ;;  %v439_v4 = vadd.f32 %v438_v0, %v424_v63 }
  0xf1   : > { %v404_v6 = vadd.f32 %v638_v28, %v403_v2  ;;  %v440_v7 = vadd.f32 %v439_v4, %v425_v3 }
  0xf3   : > { %v441_v9 = vadd.f32 %v440_v7, %v426_v5  ;;  %v405_v10 = vadd.f32 %v639_v35, %v404_v6 }
  0xf5   : > { %v406_v11 = vadd.f32 %v405_v10, %v363_v50  ;;  %v442_v13 = vadd.f32 %v441_v9, %v427_v8 }
  0xf7   : > { %v443_v14 = vadd.f32 %v442_v13, %v428_v12  ;;  %v407_v15 = vadd.f32 %v406_v11, %v366_v59 }
  0xf9   : > { %v408_v18 = vadd.f32 %v642_v45, %v407_v15  ;;  %v444_v19 = vadd.f32 %v443_v14, %v429_v16 }
  0xfb   : > { %v409_v21 = vadd.f32 %v643_v55, %v408_v18  ;;  %v445_v22 = vadd.f32 %v444_v19, %v430_v17 }
  0xfd   : > { %v410_v23 = vrot.slane %v409_v21, 4  ;;  %v446_v24 = vadd.f32 %v445_v22, %v431_v20 }
  0xff   : > { %v411_v25 = vadd.f32 %v410_v23, %v409_v21  ;;  %v447_v26 = vrot.slane %v446_v24, 4 }
 0x101   : > { %v412_v27 = vrot.slane %v411_v25, 2  ;;  %v448_v28 = vadd.f32 %v447_v26, %v446_v24 }
 0x103   : > { %v413_v29 = vadd.f32 %v412_v27, %v411_v25  ;;  %v449_v30 = vrot.slane %v448_v28, 2 }
 0x105   : > { %v414_v31 = vrot.slane %v413_v29, 1  ;;  %v450_v32 = vadd.f32 %v449_v30, %v448_v28 }
 0x107   : > { %v451_v33 = vrot.slane %v450_v32, 1  ;;  %v415_v34 = vadd.f32 %v414_v31, %v413_v29  ;;  %457 = sbr.rel (%p614_p7) target bundleno = 270 (0x10e), region = 32 }
 0x109   : > { %v452_v35 = vadd.f32 %v451_v33, %v450_v32 }
 0x10b   : > { %v454_v36 = vsel %vm453_vm2, %v415_v34, %v452_v35 }
 0x10c   : > { %v729_v37 = vmov 0.0  }
 0x10d   : > { %458 = vst [vmem:[%s789_s27] sm:$0x3] %v729_v37 }
 0x10e PF:  {}
 0x114   : > { %v459_v38 = vld [vmem:[%s789_s27] sm:$0x3] }
 0x115   : > { %v460_v39 = vadd.f32 %v459_v38, %v454_v36 }
 0x117   : > { %461 = vst [vmem:[%s789_s27] sm:$0x3] %v460_v39 }
 0x118 PF: > { %s14_s16 = sadd.s32 1, %s727_s16   ;;  %s853_s12 = smov %s719_s14 }
 0x119   : > { %p11_p8 = scmp.ge.s32.totalorder %s14_s16, 6   ;;  %s854_s13 = smov %s723_s15 }
 0x11a   : > { %s855_s14 = smov %s858_s17  ;;  %s856_s15 = smov %s862_s18 }
 0x11b   :  { %13 = sbr.rel (!%p11_p8) target bundleno = 3 (0x3), region = 74 }

// kernel: resblock2d_pallas_nhwc.4
= control target key start
LH: loop header
LB: loop body
LE: loop exit
PB: predicated region body
PF: predicated region fallthrough
CT: control target
= control target key end

     0   :  { %s2454_s27 = smov 0   ;;  %s2456_s28 = smov 0   ;;  %s3184_s0 = inlined_call_operand.vmem [shape: f32[2,16,16,128], index: 0, kind: input, shape index: {}, may-alias: {0,1,2}]   ;;  %s3185_s1 = inlined_call_operand.vmem [shape: f32[2,16,16,128], index: 1, kind: input, shape index: {}, may-alias: {0,1,2}]   ;;  %s3186_s2 = inlined_call_operand.vmem [shape: f32[2,16,16,128], index: 2, kind: input, shape index: {}, may-alias: {0,1,2}]   ;;  %s3187_s3 = inlined_call_operand.vmem [shape: f32[1,128], index: 3, kind: input, shape index: {}]   ;;  %s3188_s4 = inlined_call_operand.vmem [shape: f32[1,128], index: 4, kind: input, shape index: {}]   ;;  %s3189_s5 = inlined_call_operand.vmem [shape: bf16[384,384], index: 5, kind: input, shape index: {}]   ;;  %s3190_s6 = inlined_call_operand.vmem [shape: f32[1,128], index: 6, kind: input, shape index: {}]   ;;  %s3191_s7 = inlined_call_operand.vmem [shape: f32[2,16,16,128], index: 7, kind: output, shape index: {0}]   ;;  %s3192_s8 = inlined_call_operand.vmem [shape: f32[2,2,128], index: 8, kind: output, shape index: {1}]  }
   0x1   :  { %s2458_s29 = smov 0   ;;  %s2460_s30 = smov 0  }
   0x2   :  { %s2462_s9 = smov 0  }
   0x3 LB: > { %s28_s10 = sadd.s32 1, %s2397_s29  ;;  %s31_s11 = sadd.s32 1, %s2401_s30  ;;  %s2405_s9 = sphi %s2462_s9, %s19_s9   ;;  %s2401_s30 = sphi %s2460_s30, %s3203_s30   ;;  %s2397_s29 = sphi %s2458_s29, %s3202_s29   ;;  %s2393_s28 = sphi %s2456_s28, %s3201_s28   ;;  %s2389_s27 = sphi %s2454_s27, %s3200_s27  }
   0x4   : > { %p29_p0 = scmp.ge.s32.totalorder %s28_s10, 2  ;;  %p1992_p1 = scmp.ge.s32.totalorder %s2405_s9, 1 }
   0x5   : > { %p351_p2 = scmp.lt.s32.totalorder %s2405_s9, 5 }
   0x6   : > { %s3205_s10 = smov (%p29_p0, %s28_s10), 0  ;;  %s3207_s11 = smov (!%p29_p0, %s31_s11), %s2401_s30 }
   0x7   : > { %p352_p3 = pnand %p1992_p1, %p351_p2  ;;  %p33_p4 = scmp.ge.s32.totalorder %s3207_s11, 2 }
   0x8   : > { %s2490_s14 = sshll.u32 (!%p352_p3), %s2389_s27, 3  ;;  %p426_p5 = scmp.lt.s32.totalorder (!%p352_p3), %s2393_s28, 1 }
   0x9   : > { %s3209_s11 = smov (%p33_p4, %s3207_s11), 0  ;;  %355 = sbr.rel (%p352_p3) target bundleno = 411 (0x19b), region = 48 }
   0xa   : > { %p428_p6 = scmp.lt.s32.totalorder (!%p352_p3), %s2490_s14, 15  ;;  %s2563_s23 = sadd.s32 (!%p352_p3), 4294967295, %s2490_s14 }
   0xb   : > { %p438_p7 = scmp.gt.s32.totalorder (!%p352_p3), %s2563_s23, 0  ;;  %p1999_p8 = scmp.lt.s32.totalorder (!%p352_p3), %s2563_s23, 15 }
   0xc   : > { %p605_p9 = scmp.gt.s32.totalorder (!%p352_p3), %s2389_s27, 0  ;;  %p634_p11 = scmp.lt.s32.totalorder (!%p352_p3), %s2389_s27, 1 }
   0xd   : > { %p2106_p12 = scmp.ne.s32.totalorder (!%p352_p3), %s2389_s27, 0 }
   0xe   : > { %v2271_v0 = vld [vmem:[%s3189_s5 + $0xac] ss:$12 sps:$4 sm:$0xff]   ;;  %v2407_v2 = vmov 0   ;;  %v2275_v3 = vld [vmem:[%s3189_s5 + $0xa8] ss:$12 sps:$4 sm:$0xff]   ;;  %s3211_s28 = smov (!%p426_p5, %s2393_s28), 1 }
   0xf   : > { %v2273_v1 = vld [vmem:[%s3189_s5 + $0x22c] ss:$12 sps:$4 sm:$0xff]   ;;  %1268 = vmatprep.mubr.bf16.mxu1 %v2407_v2  ;;  %1123 = vmatprep.subr.bf16.mxu0 %v2271_v0  ;;  %v2276_v4 = vld [vmem:[%s3189_s5 + $0x228] ss:$12 sps:$4 sm:$0xff]   ;;  %v2281_v7 = vld [vmem:[%s3189_s5 + $0x90] ss:$12 sps:$4 sm:$0xff]  }
  0x10   : > { %1236 = vmatprep.subr.bf16.mxu1 %v2273_v1  ;;  %v2277_v5 = vld [vmem:[%s3189_s5 + $0x94] ss:$12 sps:$4 sm:$0xff]   ;;  %1124 = vmatpush1.bf16.msra.mxu0 %v2275_v3  ;;  %s429_s12 = scalar_select %p428_p6, %s2490_s14, 15  ;;  %v2282_v8 = vld [vmem:[%s3189_s5 + $0x210] ss:$12 sps:$4 sm:$0xff]  }
  0x11   : > { %1237 = vmatpush1.bf16.msra.mxu1 %v2276_v4  ;;  %v2279_v6 = vld [vmem:[%s3189_s5 + $0x214] ss:$12 sps:$4 sm:$0xff]   ;;  %1125 = vmatprep.subr.bf16.mxu0 %v2277_v5  ;;  %s2018_s16 = sshll.u32 %s3211_s28, 1  ;;  %v2283_v9 = vld [vmem:[%s3189_s5 + $0x7c] ss:$12 sps:$4 sm:$0xff]   ;;  %s2539_s20 = sshll.u32 %s3211_s28, 5 }
  0x12   : > { %1238 = vmatprep.subr.bf16.mxu1 %v2279_v6  ;;  %s2522_s21 = scalar_lea.vmem %s3192_s8, %s2018_s16  ;;  %v2285_v10 = vld [vmem:[%s3189_s5 + $0x1fc] ss:$12 sps:$4 sm:$0xff]   ;;  %v2287_v11 = vld [vmem:[%s3189_s5 + $0x78] ss:$12 sps:$4 sm:$0xff]   ;;  %s1994_s19 = sshll.u32 %s429_s12, 1 }
  0x13   : > { %v2288_v12 = vld [vmem:[%s3189_s5 + $0x1f8] ss:$12 sps:$4 sm:$0xff]   ;;  %v2293_v15 = vld [vmem:[%s3189_s5 + $0x60] ss:$12 sps:$4 sm:$0xff]   ;;  %s2554_s15 = sadd.s32 %s2539_s20, %s1994_s19  ;;  %v2299_v19 = vld [vmem:[%s3189_s5 + $0x48] ss:$12 sps:$4 sm:$0xff]  }
  0x14   : > { %1126 = vmatpush1.bf16.msra.mxu0 %v2281_v7  ;;  %v2289_v13 = vld [vmem:[%s3189_s5 + $0x64] ss:$12 sps:$4 sm:$0xff]   ;;  %v2294_v16 = vld [vmem:[%s3189_s5 + $0x1e0] ss:$12 sps:$4 sm:$0xff]   ;;  %v2300_v20 = vld [vmem:[%s3189_s5 + $0x1c8] ss:$12 sps:$4 sm:$0xff]  }
  0x15   : > { %1239 = vmatpush1.bf16.msra.mxu1 %v2282_v8  ;;  %1127 = vmatprep.subr.bf16.mxu0 %v2283_v9  ;;  %v2291_v14 = vld [vmem:[%s3189_s5 + $0x1e4] ss:$12 sps:$4 sm:$0xff]   ;;  %v2295_v17 = vld [vmem:[%s3189_s5 + $0x4c] ss:$12 sps:$4 sm:$0xff]   ;;  %v2301_v21 = vld [vmem:[%s3189_s5 + $0x34] ss:$12 sps:$4 sm:$0xff]  }
  0x16   : > { %1240 = vmatprep.subr.bf16.mxu1 %v2285_v10  ;;  %v2297_v18 = vld [vmem:[%s3189_s5 + $0x1cc] ss:$12 sps:$4 sm:$0xff]   ;;  %s3193_s19 = sshll.u32 %s2554_s15, 3  ;;  %v2303_v22 = vld [vmem:[%s3189_s5 + $0x1b4] ss:$12 sps:$4 sm:$0xff]   ;;  %s2116_s12 = sadd.s32 8, %s2490_s14 }
  0x17   : > { %v2305_v23 = vld [vmem:[%s3189_s5 + $0x30] ss:$12 sps:$4 sm:$0xff]   ;;  %s2581_s18 = scalar_lea.vmem %s3184_s0, %s3193_s19  ;;  %v2311_v27 = vld [vmem:[%s3189_s5 + $0x18] ss:$12 sps:$4 sm:$0xff]   ;;  %v2607_v31 = vld [vmem:[%s3187_s3] ss:$0 sm:$0xff] }
  0x18   : > { %1128 = vmatpush1.bf16.msra.mxu0 %v2287_v11  ;;  %v2306_v24 = vld [vmem:[%s3189_s5 + $0x1b0] ss:$12 sps:$4 sm:$0xff]   ;;  %s439_s16 = scalar_select %p438_p7, %s2563_s23, 0  ;;  %v2312_v30 = vld [vmem:[%s3189_s5 + $0x198] ss:$12 sps:$4 sm:$0xff]   ;;  %v491_v46 = vld [vmem:[%s2581_s18 + $0x28] sm:$0xff] }
  0x19   : > { %1241 = vmatpush1.bf16.msra.mxu1 %v2288_v12  ;;  %1129 = vmatprep.subr.bf16.mxu0 %v2289_v13  ;;  %v2307_v25 = vld [vmem:[%s3189_s5 + $0x1c] ss:$12 sps:$4 sm:$0xff]   ;;  %v488_v28 = vld [vmem:[%s2581_s18 + $0x10] sm:$0xff]  ;;  %v2612_v32 = vld [vmem:[%s3188_s4] ss:$0 sm:$0xff]  ;;  %v656_v50 = vmul.f32 %v2607_v31, %v491_v46  ;;  %p2682_p10 = scmp.lt.s32.totalorder %s2116_s12, 15 }
  0x1a   : > { %1242 = vmatprep.subr.bf16.mxu1 %v2291_v14  ;;  %v2309_v26 = vld [vmem:[%s3189_s5 + $0x19c] ss:$12 sps:$4 sm:$0xff]   ;;  %v2313_v33 = vld [vmem:[%s3189_s5 + $0x4] ss:$12 sps:$4 sm:$0xff]   ;;  %v653_v34 = vmul.f32 %v2607_v31, %v488_v28  ;;  %v2317_v37 = vld [vmem:[%s3189_s5] ss:$12 sps:$4 sm:$0xff]  }
  0x1b   : > { %v489_v29 = vld [vmem:[%s2581_s18 + $0x18] sm:$0xff]  ;;  %v2315_v36 = vld [vmem:[%s3189_s5 + $0x184] ss:$12 sps:$4 sm:$0xff]   ;;  %v2318_v38 = vld [vmem:[%s3189_s5 + $0x180] ss:$12 sps:$4 sm:$0xff]   ;;  %s3213_s16 = smov (!%p1999_p8, %s439_s16), 15  ;;  %v672_v55 = vadd.f32 %v2612_v32, %v656_v50 }
  0x1c   : > { %1130 = vmatpush1.bf16.msra.mxu0 %v2293_v15  ;;  %v654_v35 = vmul.f32 %v2607_v31, %v489_v29  ;;  %v669_v39 = vadd.f32 %v2612_v32, %v653_v34  ;;  %v2319_v41 = vld [vmem:[%s3189_s5 + $0x16c] ss:$12 sps:$4 sm:$0xff]   ;;  %v2322_v44 = vld [vmem:[%s3189_s5 + $0x170] ss:$12 sps:$4 sm:$0xff]   ;;  %v490_v45 = vld [vmem:[%s2581_s18 + $0x20] sm:$0xff]  ;;  %s2004_s25 = sshll.u32 %s3213_s16, 1 }
  0x1d   : > { %1243 = vmatpush1.bf16.msra.mxu1 %v2294_v16  ;;  %1131 = vmatprep.subr.bf16.mxu0 %v2295_v17  ;;  %v655_v49 = vmul.f32 %v2607_v31, %v490_v45  ;;  %v2321_v52 = vld [vmem:[%s3189_s5 + $0x168] ss:$12 sps:$4 sm:$0xff]   ;;  %v2323_v53 = vld [vmem:[%s3189_s5 + $0xb0] ss:$12 sps:$4 sm:$0xff]   ;;  %v2330_v57 = vld [vmem:[%s3189_s5 + $0x158] ss:$12 sps:$4 sm:$0xff]   ;;  %s2692_s23 = sadd.s32 %s2004_s25, %s2539_s20 }
  0x1e   : > { %1244 = vmatprep.subr.bf16.mxu1 %v2297_v18  ;;  %v670_v40 = vadd.f32 %v2612_v32, %v654_v35  ;;  %vm685_vm0 = vcmp.ge.f32.partialorder %v669_v39, 0.0  ;;  %v701_v42 = vmul.f32 0.01, %v669_v39  ;;  %v2324_v56 = vld [vmem:[%s3189_s5 + $0x154] ss:$12 sps:$4 sm:$0xff]   ;;  %vm688_vm3 = vcmp.ge.f32.partialorder %v672_v55, 0.0 }
  0x1f   : > { %v671_v54 = vadd.f32 %v2612_v32, %v655_v49  ;;  %v2326_v58 = vld [vmem:[%s3189_s5 + $0x150] ss:$12 sps:$4 sm:$0xff]   ;;  %v704_v60 = vmul.f32 0.01, %v672_v55  ;;  %s2673_s17 = scalar_select %p605_p9, 1, 0 }
  0x20   : > { %1132 = vmatpush1.bf16.msra.mxu0 %v2299_v19  ;;  %vm686_vm1 = vcmp.ge.f32.partialorder %v670_v40, 0.0  ;;  %v702_v43 = vmul.f32 0.01, %v670_v40  ;;  %v717_v47 = vsel %vm685_vm0, %v669_v39, %v701_v42  ;;  %v2327_v61 = vld [vmem:[%s3189_s5 + $0x13c] ss:$12 sps:$4 sm:$0xff]   ;;  %v492_v62 = vld [vmem:[%s2581_s18 + $0x30] sm:$0xff] }
  0x21   : > { %1245 = vmatpush1.bf16.msra.mxu1 %v2300_v20  ;;  %1133 = vmatprep.subr.bf16.mxu0 %v2301_v21  ;;  %vm687_vm2 = vcmp.ge.f32.partialorder %v671_v54, 0.0  ;;  %v703_v59 = vmul.f32 0.01, %v671_v54  ;;  %v720_v0 = vsel %vm688_vm3, %v672_v55, %v704_v60  ;;  %v2331_v1 = vld [vmem:[%s3189_s5 + $0x98] ss:$12 sps:$4 sm:$0xff]   ;;  %v657_v4 = vmul.f32 %v2607_v31, %v492_v62  ;;  %s2006_s13 = sshll.u32 %s2692_s23, 3 }
  0x22   : > { %1246 = vmatprep.subr.bf16.mxu1 %v2303_v22  ;;  %v718_v48 = vsel %vm686_vm1, %v670_v40, %v702_v43  ;;  %v493_v3 = vld [vmem:[%s2581_s18 + $0x38] sm:$0xff]  ;;  %v2338_v6 = vld [vmem:[%s3189_s5 + $0x140] ss:$12 sps:$4 sm:$0xff]   ;;  %v2332_v10 = vld [vmem:[%s3189_s5 + $0x124] ss:$12 sps:$4 sm:$0xff]   ;;  %s3215_s12 = smov (!%p2682_p10, %s2116_s12), 15  ;;  %s448_s19 = scalar_lea.vmem %s3185_s1, %s2006_s13 }
  0x23   : > { %v2645_v51 = vpack.c.bf16 %v718_v48, %v717_v47  ;;  %v719_v63 = vsel %vm687_vm2, %v671_v54, %v703_v59  ;;  %v658_v5 = vmul.f32 %v2607_v31, %v493_v3  ;;  %v2329_v7 = vld [vmem:[%s3189_s5 + $0x138] ss:$12 sps:$4 sm:$0xff]   ;;  %v673_v8 = vadd.f32 %v2612_v32, %v657_v4  ;;  %v2339_v12 = vld [vmem:[%s3189_s5 + $0x80] ss:$12 sps:$4 sm:$0xff]   ;;  %v2346_v21 = vld [vmem:[%s3189_s5 + $0x128] ss:$12 sps:$4 sm:$0xff]  }
  0x24   : > { %1134 = vmatpush1.bf16.msra.mxu0 %v2305_v23  ;;  %v2698_v9 = vpack.c.bf16 %v720_v0, %v719_v63  ;;  %v494_v14 = vld [vmem:[%s2581_s18 + $0x40] sm:$0xff]  ;;  %v495_v16 = vld [vmem:[%s2581_s18 + $0x48] sm:$0xff]  ;;  %v496_v39 = vld [vmem:[%s2581_s18 + $0x50] sm:$0xff]  ;;  %s3217_s12 = smov (!%p2682_p10, %s3215_s12), 15  ;;  %s3199_s22 = sshll.u32 %s2554_s15, 3 }
  0x25   : > { %1247 = vmatpush1.bf16.msra.mxu1 %v2306_v24  ;;  %1135 = vmatprep.subr.bf16.mxu0 %v2307_v25  ;;  %v674_v11 = vadd.f32 %v2612_v32, %v658_v5  ;;  %v705_v13 = vmul.f32 0.01, %v673_v8  ;;  %vm689_vm4 = vcmp.ge.f32.partialorder %v673_v8, 0.0  ;;  %v659_v17 = vmul.f32 %v2607_v31, %v494_v14  ;;  %v2334_v18 = vld [vmem:[%s3189_s5 + $0x120] ss:$12 sps:$4 sm:$0xff]   ;;  %s2772_s28 = sshll.u32 %s3217_s12, 1 }
  0x26   : > { %1248 = vmatprep.subr.bf16.mxu1 %v2309_v26  ;;  %v660_v19 = vmul.f32 %v2607_v31, %v495_v16  ;;  %v2335_v22 = vld [vmem:[%s3189_s5 + $0x10c] ss:$12 sps:$4 sm:$0xff]   ;;  %v486_v28 = vld [vmem:[%s2581_s18] sm:$0xff]  ;;  %v2337_v29 = vld [vmem:[%s3189_s5 + $0x108] ss:$12 sps:$4 sm:$0xff]   ;;  %v661_v48 = vmul.f32 %v2607_v31, %v496_v39  ;;  %s463_s14 = sadd.s32 %s2772_s28, %s2539_s20 }
  0x27   : > { %vm690_vm5 = vcmp.ge.f32.partialorder %v674_v11, 0.0  ;;  %v706_v15 = vmul.f32 0.01, %v674_v11  ;;  %v675_v20 = vadd.f32 %v2612_v32, %v659_v17  ;;  %v721_v23 = vsel %vm689_vm4, %v673_v8, %v705_v13  ;;  %v2340_v45 = vld [vmem:[%s3189_s5 + $0xf4] ss:$12 sps:$4 sm:$0xff]   ;;  %s2013_s20 = sshll.u32 %s463_s14, 3 }
  0x28   : > { %1136 = vmatpush1.bf16.msra.mxu0 %v2311_v27  ;;  %v676_v25 = vadd.f32 %v2612_v32, %v660_v19  ;;  %v2347_v27 = vld [vmem:[%s3189_s5 + $0x68] ss:$12 sps:$4 sm:$0xff]   ;;  %v651_v34 = vmul.f32 %v2607_v31, %v486_v28  ;;  %v2342_v49 = vld [vmem:[%s3189_s5 + $0xf0] ss:$12 sps:$4 sm:$0xff]   ;;  %v498_v60 = vld [vmem:[%s2581_s18 + $0x60] sm:$0xff]  ;;  %s465_s16 = scalar_lea.vmem %s3186_s2, %s2013_s20 }
  0x29   : > { %1249 = vmatpush1.bf16.msra.mxu1 %v2312_v30  ;;  %1137 = vmatprep.subr.bf16.mxu0 %v2313_v33  ;;  %v722_v24 = vsel %vm690_vm5, %v674_v11, %v706_v15  ;;  %vm691_vm6 = vcmp.ge.f32.partialorder %v675_v20, 0.0  ;;  %v707_v26 = vmul.f32 0.01, %v675_v20  ;;  %v487_v33 = vld [vmem:[%s2581_s18 + $0x8] sm:$0xff]  ;;  %v2352_v54 = vld [vmem:[%s3189_s5 + $0x110] ss:$12 sps:$4 sm:$0xff]   ;;  %v663_v11 = vmul.f32 %v2607_v31, %v498_v60 }
  0x2a   : > { %1250 = vmatprep.subr.bf16.mxu1 %v2315_v36  ;;  %vm692_vm7 = vcmp.ge.f32.partialorder %v676_v25, 0.0  ;;  %v708_v30 = vmul.f32 0.01, %v676_v25  ;;  %v2743_v35 = vpack.c.bf16 %v722_v24, %v721_v23  ;;  %v652_v36 = vmul.f32 %v2607_v31, %v487_v33  ;;  %v2353_v0 = vld [vmem:[%s3189_s5 + $0x50] ss:$12 sps:$4 sm:$0xff]   ;;  %v504_v39 = vld [vmem:[%s465_s16] sm:$0xff] }
  0x2b   : > { %v723_v40 = vsel %vm691_vm6, %v675_v20, %v707_v26  ;;  %v2345_v4 = vld [vmem:[%s3189_s5 + $0xd8] ss:$12 sps:$4 sm:$0xff]   ;;  %v629_v15 = vstv %s2673_s17  ;;  %v2350_v16 = vld [vmem:[%s3189_s5 + $0xc0] ss:$12 sps:$4 sm:$0xff]   ;;  %v500_v23 = vld [vmem:[%s2581_s18 + $0x70] sm:$0xff] }
  0x2c   : > { %1138 = vmatpush1.bf16.msra.mxu0 %v2317_v37  ;;  %v502_v37 = vld [vmem:[%s448_s19] sm:$0xff]  ;;  %v724_v46 = vsel %vm692_vm7, %v676_v25, %v708_v30  ;;  %v668_v47 = vadd.f32 %v2612_v32, %v652_v36  ;;  %vm2818_vm14 = vcmp.eq.s32.totalorder %v629_v15, 1  ;;  %v2351_v25 = vld [vmem:[%s3189_s5 + $0x230] ss:$12 sps:$4 sm:$0xff]   ;;  %v665_v30 = vmul.f32 %v2607_v31, %v500_v23  ;;  %s645_s26 = scalar_select %p634_p11, 1, 0 }
  0x2d   : > { %1251 = vmatpush1.bf16.msra.mxu1 %v2318_v38  ;;  %1139 = vmatprep.subr.bf16.mxu0 %v2319_v41  ;;  %v503_v38 = vld [vmem:[%s448_s19 + $0x8] sm:$0xff]  ;;  %v667_v41 = vadd.f32 %v2612_v32, %v651_v34  ;;  %v612_v42 = vmul.f32 %v2607_v31, %v502_v37  ;;  %v2784_v3 = vpack.c.bf16 %v724_v46, %v723_v40  ;;  %v2355_v13 = vld [vmem:[%s3189_s5 + $0xf8] ss:$12 sps:$4 sm:$0xff]   ;;  %vm2093_vm15 = vmpackc.low %vm2818_vm14, %vm2818_vm14 }
  0x2e   : > { %2117 = vmatprep.subr.bf16.mxu1 %v2322_v44  ;;  %v613_v43 = vmul.f32 %v2607_v31, %v503_v38  ;;  %v497_v44 = vld [vmem:[%s2581_s18 + $0x58] sm:$0xff]  ;;  %vm684_vm9 = vcmp.ge.f32.partialorder %v668_v47, 0.0  ;;  %v700_v55 = vmul.f32 0.01, %v668_v47  ;;  %v2359_v33 = vld [vmem:[%s3189_s5 + $0x20] ss:$12 sps:$4 sm:$0xff]  }
  0x2f   : > { %vm683_vm8 = vcmp.ge.f32.partialorder %v667_v41, 0.0  ;;  %v699_v50 = vmul.f32 0.01, %v667_v41  ;;  %v2356_v14 = vld [vmem:[%s3189_s5 + $0x38] ss:$12 sps:$4 sm:$0xff]   ;;  %v505_v46 = vld [vmem:[%s465_s16 + $0x8] sm:$0xff] }
  0x30   : > { %1269 = vmatmul.mubr.bf16.vlgmr.msra.gmra.mxu1 %v2645_v51  ;;  %1140 = vmatpush2.bf16.msra.mxu0 %v2321_v52  ;;  %v620_v52 = vadd.f32 %v2612_v32, %v612_v42  ;;  %v501_v26 = vld [vmem:[%s2581_s18 + $0x78] sm:$0xff]  ;;  %v2361_v40 = vld [vmem:[%s3189_s5 + $0xc8] ss:$12 sps:$4 sm:$0xff]  }
  0x31   : > { %2118 = vmatpush3.bf16.msra.mxu1 %v2323_v53  ;;  %1141 = vmatprep.subr.bf16.mxu0 %v2324_v56  ;;  %v621_v53 = vadd.f32 %v2612_v32, %v613_v43  ;;  %v662_v56 = vmul.f32 %v2607_v31, %v497_v44  ;;  %v715_v59 = vsel %vm683_vm8, %v667_v41, %v699_v50  ;;  %v2354_v37 = vld [vmem:[%s3189_s5 + $0x218] ss:$12 sps:$4 sm:$0xff]   ;;  %v2362_v42 = vld [vmem:[%s3189_s5 + $0x8] ss:$12 sps:$4 sm:$0xff]   ;;  %vm1559_vm8 = vcmask 1040384  }
  0x32   : > { %1278 = vmatprep.mubr.bf16.mxu1 %v2407_v2  ;;  %2119 = vmatprep.subr.bf16.mxu1 %v2330_v57  ;;  %v677_v57 = vadd.f32 %v2612_v32, %v661_v48  ;;  %vm622_vm10 = vcmp.ge.f32.partialorder %v620_v52, 0.0  ;;  %v624_v62 = vmul.f32 0.01, %v620_v52  ;;  %v666_v38 = vmul.f32 %v2607_v31, %v501_v26 }
  0x33   : > { %vm623_vm11 = vcmp.ge.f32.partialorder %v621_v53, 0.0  ;;  %v678_v63 = vadd.f32 %v2612_v32, %v662_v56  ;;  %v681_v41 = vadd.f32 %v2612_v32, %v665_v30 }
  0x34   : > { %1142 = vmatpush2.bf16.msra.mxu0 %v2326_v58  ;;  %v2343_v58 = vld [vmem:[%s3189_s5 + $0xdc] ss:$12 sps:$4 sm:$0xff]   ;;  %vm693_vm12 = vcmp.ge.f32.partialorder %v677_v57, 0.0  ;;  %v709_v8 = vmul.f32 0.01, %v677_v57  ;;  %v626_v17 = vsel %vm622_vm10, %v620_v52, %v624_v62  ;;  %v646_v62 = vstv %s645_s26  ;;  %s3096_s26 = scalar_lea.vmem %s3191_s7, %s3199_s22 }
  0x35   : > { %2120 = vmatpush3.bf16.msra.mxu1 %v2331_v1  ;;  %1143 = vmatprep.subr.bf16.mxu0 %v2327_v61  ;;  %v716_v61 = vsel %vm684_vm9, %v668_v47, %v700_v55  ;;  %v499_v1 = vld [vmem:[%s2581_s18 + $0x68] sm:$0xff]  ;;  %vm694_vm13 = vcmp.ge.f32.partialorder %v678_v63, 0.0  ;;  %v713_v50 = vmul.f32 0.01, %v681_v41  ;;  %vm697_vm2 = vcmp.ge.f32.partialorder %v681_v41, 0.0 }
  0x36   : > { %2121 = vmatprep.subr.bf16.mxu1 %v2338_v6  ;;  %v2789_v5 = vpack.c.bf16 %v716_v61, %v715_v59  ;;  %v625_v6 = vmul.f32 0.01, %v621_v53  ;;  %v725_v19 = vsel %vm693_vm12, %v677_v57, %v709_v8  ;;  %v2357_v47 = vld [vmem:[%s3189_s5 + $0x200] ss:$12 sps:$4 sm:$0xff]   ;;  %vm2890_vm6 = vcmp.eq.s32.totalorder %v646_v62, 1 }
  0x37   : > { %v729_v56 = vsel %vm697_vm2, %v681_v41, %v713_v50  ;;  %vm2096_vm7 = vmpackc.low %vm2890_vm6, %vm2890_vm6  ;;  %vm1624_vm9 = vcmask 1046528  }
  0x38   : > { %1279 = vmatmul.mubr.bf16.gmra.mxu1 %v2698_v9  ;;  %1144 = vmatpush2.bf16.msra.mxu0 %v2329_v7  ;;  %v2348_v7 = vld [vmem:[%s3189_s5 + $0xc4] ss:$12 sps:$4 sm:$0xff]  }
  0x39   : > { %1288 = vmatprep.mubr.bf16.mxu1 %v2407_v2  ;;  %1145 = vmatprep.subr.bf16.mxu0 %v2332_v10  ;;  %v710_v10 = vmul.f32 0.01, %v678_v63 }
  0x3a   : > { %2122 = vmatpush3.bf16.msra.mxu1 %v2339_v12  ;;  %1155 = vmatprep.mubr.bf16.mxu0 %v2789_v5  ;;  %v664_v12 = vmul.f32 %v2607_v31, %v499_v1 }
  0x3b   : > { %2123 = vmatprep.subr.bf16.mxu1 %v2346_v21  ;;  %v726_v20 = vsel %vm694_vm13, %v678_v63, %v710_v10  ;;  %v679_v21 = vadd.f32 %v2612_v32, %v663_v11  ;;  %v2364_v63 = vld [vmem:[%s3189_s5 + $0x1b8] ss:$12 sps:$4 sm:$0xff]  }
  0x3c   : > { %1146 = vmatpush2.bf16.msra.mxu0 %v2334_v18  ;;  %v627_v18 = vsel %vm623_vm11, %v621_v53, %v625_v6  ;;  %v636_v53 = vmul.f32 %v2607_v31, %v505_v46 }
  0x3d   : > { %1147 = vmatprep.subr.bf16.mxu0 %v2335_v22  ;;  %v680_v22 = vadd.f32 %v2612_v32, %v664_v12  ;;  %v2829_v28 = vpack.c.bf16 %v627_v18, %v626_v17  ;;  %v711_v34 = vmul.f32 0.01, %v679_v21  ;;  %vm695_vm0 = vcmp.ge.f32.partialorder %v679_v21, 0.0 }
  0x3e   : > { %2124 = vmatpush3.bf16.msra.mxu1 %v2347_v27  ;;  %v2358_v27 = vld [vmem:[%s3189_s5 + $0xe0] ss:$12 sps:$4 sm:$0xff]   ;;  %v638_v57 = vadd.f32 %v2612_v32, %v636_v53 }
  0x3f   : > { %2125 = vmatprep.subr.bf16.mxu1 %v2352_v54  ;;  %v712_v36 = vmul.f32 0.01, %v680_v22  ;;  %vm696_vm1 = vcmp.ge.f32.partialorder %v680_v22, 0.0  ;;  %v727_v43 = vsel %vm695_vm0, %v679_v21, %v711_v34  ;;  %v2360_v54 = vld [vmem:[%s3189_s5 + $0x1e8] ss:$12 sps:$4 sm:$0xff]  }
  0x40   : > { %1289 = vmatmul.mubr.bf16.gmra.mxu1 %v2743_v35  ;;  %1148 = vmatpush2.bf16.msra.mxu0 %v2337_v29  ;;  %v2831_v29 = vpack.c.bf16 %v726_v20, %v725_v19  ;;  %v642_v61 = vmul.f32 0.01, %v638_v57  ;;  %vm640_vm5 = vcmp.ge.f32.partialorder %v638_v57, 0.0 }
  0x41   : > { %1298 = vmatprep.mubr.bf16.mxu1 %v2407_v2  ;;  %1149 = vmatprep.subr.bf16.mxu0 %v2340_v45  ;;  %v728_v44 = vsel %vm696_vm1, %v680_v22, %v712_v36  ;;  %v682_v45 = vadd.f32 %v2612_v32, %v666_v38 }
  0x42   : > { %2126 = vmatpush3.bf16.msra.mxu1 %v2353_v0  ;;  %v2867_v48 = vpack.c.bf16 %v728_v44, %v727_v43  ;;  %v644_v0 = vsel %vm640_vm5, %v638_v57, %v642_v61 }
  0x43   : > { %2127 = vmatprep.subr.bf16.mxu1 %v2355_v13  ;;  %v714_v52 = vmul.f32 0.01, %v682_v45  ;;  %vm698_vm3 = vcmp.ge.f32.partialorder %v682_v45, 0.0 }
  0x44   : > { %1150 = vmatpush2.bf16.msra.mxu0 %v2342_v49  ;;  %v635_v49 = vmul.f32 %v2607_v31, %v504_v39 }
  0x45   : > { %1151 = vmatprep.subr.bf16.mxu0 %v2343_v58  ;;  %v730_v31 = vsel %vm698_vm3, %v682_v45, %v714_v52  ;;  %v2363_v58 = vld [vmem:[%s3189_s5 + $0x1d0] ss:$12 sps:$4 sm:$0xff]  }
  0x46   : > { %2128 = vmatpush3.bf16.msra.mxu1 %v2356_v14  ;;  %v637_v55 = vadd.f32 %v2612_v32, %v635_v49  ;;  %v738_v59 = vpack.c.bf16 %v730_v31, %v729_v56 }
  0x47   : > { %2129 = vmatprep.subr.bf16.mxu1 %v2358_v27 }
  0x48   : > { %1299 = vmatmul.mubr.bf16.gmra.mxu1 %v2784_v3  ;;  %1152 = vmatpush2.bf16.msra.mxu0 %v2345_v4  ;;  %v641_v60 = vmul.f32 0.01, %v637_v55  ;;  %vm639_vm4 = vcmp.ge.f32.partialorder %v637_v55, 0.0  ;;  %v2365_v4 = vld [vmem:[%s3189_s5 + $0x1a0] ss:$12 sps:$4 sm:$0xff]  }
  0x49   : > { %1308 = vmatprep.mubr.bf16.mxu1 %v2407_v2  ;;  %1153 = vmatprep.subr.bf16.mxu0 %v2348_v7 }
  0x4a   : > { %2130 = vmatpush3.bf16.msra.mxu1 %v2359_v33  ;;  %v643_v32 = vsel %vm639_vm4, %v637_v55, %v641_v60 }
  0x4b   : > { %2131 = vmatprep.subr.bf16.mxu1 %v2361_v40  ;;  %v2097_v6 = vpack.c.bf16 %v644_v0, %v643_v32 }
  0x4c   : > { %1154 = vmatpush2.bf16.msra.mxu0 %v2350_v16 }
  0x4d   : > { %2197 = vmatprep.subr.bf16.mxu0 %v2351_v25 }
  0x4e   : > { %2132 = vmatpush3.bf16.msra.mxu1 %v2362_v42 }
  0x4f   : > { %2095 = vmatmul.mubr.msk.bf16.vlgmr.msra.gmra.mxu0 %vm2093_vm15, %v2829_v28 }
  0x50   : > { %1309 = vmatmul.mubr.bf16.gmra.mxu1 %v2831_v29  ;;  %2198 = vmatpush3.bf16.msra.mxu0 %v2351_v25 }
  0x51   : > { %1165 = vmatprep.mubr.bf16.mxu0 %v2645_v51  ;;  %1318 = vmatprep.mubr.bf16.mxu1 %v2407_v2 }
  0x52   : > { %2199 = vmatprep.subr.bf16.mxu0 %v2354_v37 }
  0x54   : > { %2200 = vmatpush3.bf16.msra.mxu0 %v2354_v37 }
  0x55   : > { %2201 = vmatprep.subr.bf16.mxu0 %v2357_v47 }
  0x57   : > { %1166 = vmatmul.mubr.bf16.gmra.mxu0 %v2789_v5 }
  0x58   : > { %1319 = vmatmul.mubr.bf16.gmra.mxu1 %v2867_v48  ;;  %1175 = vmatprep.mubr.bf16.mxu0 %v2698_v9 }
  0x59   : > { %1328 = vmatprep.mubr.bf16.mxu1 %v2407_v2  ;;  %2202 = vmatpush3.bf16.msra.mxu0 %v2357_v47 }
  0x5a   : > { %2203 = vmatprep.subr.bf16.mxu0 %v2360_v54 }
  0x5d   : > { %2204 = vmatpush3.bf16.msra.mxu0 %v2360_v54 }
  0x5e   : > { %2205 = vmatprep.subr.bf16.mxu0 %v2363_v58 }
  0x5f   : > { %1176 = vmatmul.mubr.bf16.gmra.mxu0 %v2645_v51 }
  0x60   : > { %1329 = vmatmul.mubr.bf16.gmra.mxu1 %v738_v59  ;;  %1185 = vmatprep.mubr.bf16.mxu0 %v2743_v35 }
  0x61   : > { %1338 = vmatprep.mubr.bf16.mxu1 %v2407_v2  ;;  %2206 = vmatpush3.bf16.msra.mxu0 %v2363_v58  ;;  %v2366_v2 = vld [vmem:[%s3189_s5 + $0x188] ss:$12 sps:$4 sm:$0xff]  }
  0x62   : > { %2207 = vmatprep.subr.bf16.mxu0 %v2364_v63 }
  0x65   : > { %2208 = vmatpush3.bf16.msra.mxu0 %v2364_v63 }
  0x66   : > { %2209 = vmatprep.subr.bf16.mxu0 %v2365_v4 }
  0x67   : > { %1186 = vmatmul.mubr.bf16.gmra.mxu0 %v2698_v9 }
  0x68   : > { %2098 = vmatmul.mubr.msk.bf16.gmra.mxu1 %vm2096_vm7, %v2097_v6  ;;  %1195 = vmatprep.mubr.bf16.mxu0 %v2784_v3 }
  0x69   : > { %1381 = vmatprep.mubr.bf16.mxu1 %v2789_v5  ;;  %2210 = vmatpush3.bf16.msra.mxu0 %v2365_v4 }
  0x6a   : > { %2211 = vmatprep.subr.bf16.mxu0 %v2366_v2 }
  0x6d   : > { %2212 = vmatpush3.bf16.msra.mxu0 %v2366_v2 }
  0x6f   : > { %1196 = vmatmul.mubr.bf16.gmra.mxu0 %v2743_v35 }
  0x70   : > { %2101 = vmatmul.mubr.msk.bf16.vlgmr.msra.gmra.mxu1 %vm2093_vm15, %v2829_v28  ;;  %1205 = vmatprep.mubr.bf16.mxu0 %v2831_v29 }
  0x71   : > { %1389 = vmatprep.mubr.bf16.mxu1 %v2645_v51 }
  0x77   : > { %1206 = vmatmul.mubr.bf16.gmra.mxu0 %v2784_v3 }
  0x78   : > { %1390 = vmatmul.mubr.bf16.gmra.mxu1 %v2789_v5  ;;  %1215 = vmatprep.mubr.bf16.mxu0 %v2867_v48 }
  0x79   : > { %1397 = vmatprep.mubr.bf16.mxu1 %v2698_v9 }
  0x7f   : > { %1216 = vmatmul.mubr.bf16.gmra.mxu0 %v2831_v29 }
  0x80   : > { %1398 = vmatmul.mubr.bf16.gmra.mxu1 %v2645_v51  ;;  %1225 = vmatprep.mubr.bf16.mxu0 %v738_v59 }
  0x81   : > { %1405 = vmatprep.mubr.bf16.mxu1 %v2743_v35 }
  0x87   : > { %1226 = vmatmul.mubr.bf16.gmra.mxu0 %v2867_v48 }
  0x88   : > { %1406 = vmatmul.mubr.bf16.gmra.mxu1 %v2698_v9  ;;  %2213 = vmatprep.mubr.bf16.mxu0 %v2645_v51 }
  0x89   : > { %1413 = vmatprep.mubr.bf16.mxu1 %v2784_v3 }
  0x8f   : > { %2214 = vmatmul.mubr.bf16.vlgmr.msra.gmra.mxu0 %v2698_v9 }
  0x90   : > { %1414 = vmatmul.mubr.bf16.gmra.mxu1 %v2743_v35  ;;  %2217 = vmatprep.mubr.bf16.mxu0 %v2743_v35 }
  0x91   : > { %1421 = vmatprep.mubr.bf16.mxu1 %v2831_v29 }
  0x97   : > { %2218 = vmatmul.mubr.bf16.gmra.mxu0 %v2784_v3 }
  0x98   : > { %1422 = vmatmul.mubr.bf16.gmra.mxu1 %v2784_v3  ;;  %2221 = vmatprep.mubr.bf16.mxu0 %v2831_v29 }
  0x99   : > { %1429 = vmatprep.mubr.bf16.mxu1 %v2867_v48 }
  0x9f   : > { %2222 = vmatmul.mubr.bf16.gmra.mxu0 %v2867_v48 }
  0xa0   : > { %1430 = vmatmul.mubr.bf16.gmra.mxu1 %v2831_v29  ;;  %2225 = vmatprep.mubr.bf16.mxu0 %v738_v59 }
  0xa1   : > { %1437 = vmatprep.mubr.bf16.mxu1 %v738_v59 }
  0xa7   : > { %2226 = vmatmul.mubr.msk.bf16.gmra.mxu0 %vm2096_vm7, %v2097_v6 }
  0xa8   : > { %1438 = vmatmul.mubr.bf16.gmra.mxu1 %v2867_v48 }
  0xf0   : > { %v1270_v51 = vpop.f32.mrf.mxu1 }
  0xf2   : > { %v1272_v9 = vpop.f32.mrf.mxu1 }
  0xf4   : > { %v1274_v35 = vpop.f32.mrf.mxu1 }
  0xf6   : > { %v1276_v3 = vpop.f32.mrf.mxu1 }
  0xf8   : > { %v1280_v5 = vpop.f32.mrf.mxu1 }
  0xfa   : > { %v1282_v7 = vpop.f32.mrf.mxu1 }
  0xfc   : > { %v1284_v8 = vpop.f32.mrf.mxu1 }
  0xfe   : > { %v1286_v10 = vpop.f32.mrf.mxu1 }
 0x100   : > { %v1290_v11 = vpop.f32.mrf.mxu1 }
 0x102   : > { %v1292_v12 = vpop.f32.mrf.mxu1 }
 0x104   : > { %v1294_v13 = vpop.f32.mrf.mxu1 }
 0x106   : > { %v1296_v14 = vpop.f32.mrf.mxu1 }
 0x108   : > { %v1300_v15 = vpop.f32.mrf.mxu1 }
 0x10a   : > { %v2947_v16 = vpop.f32.mrf.mxu1 }
 0x10c   : > { %v2949_v17 = vpop.f32.mrf.mxu1 }
 0x10e   : > { %v2951_v18 = vpop.f32.mrf.mxu1 }
 0x10f   : > { %v1157_v19 = vpop.f32.mrf.mxu0 }
 0x110   : > { %v2953_v20 = vpop.f32.mrf.mxu1  ;;  %v1271_v21 = vadd.f32 %v1270_v51, %v1157_v19 }
 0x111   : > { %v1159_v22 = vpop.f32.mrf.mxu0 }
 0x112   : > { %v2955_v23 = vpop.f32.mrf.mxu1  ;;  %v1560_v24 = vrot.slane %v1271_v21, 7  ;;  %v1273_v25 = vadd.f32 %v1272_v9, %v1159_v22 }
 0x113   : > { %v1161_v26 = vpop.f32.mrf.mxu0 }
 0x114   : > { %v2957_v27 = vpop.f32.mrf.mxu1  ;;  %v1600_v28 = vsel %vm1559_vm8, 0.0, %v1560_v24  ;;  %v1275_v29 = vadd.f32 %v1274_v35, %v1161_v26 }
 0x115   : > { %v2960_v30 = vadd.f32 %v1600_v28, %v1273_v25  ;;  %v1163_v33 = vpop.f32.mrf.mxu0 }
 0x116   : > { %v2962_v34 = vpop.f32.mrf.mxu1  ;;  %v1561_v36 = vrot.slane %v1275_v29, 7  ;;  %v1277_v37 = vadd.f32 %v1276_v3, %v1163_v33 }
 0x117   : > { %v1167_v38 = vpop.f32.mrf.mxu0 }
 0x118   : > { %v2964_v39 = vpop.f32.mrf.mxu1  ;;  %v1562_v40 = vsel %vm1559_vm8, %v1560_v24, %v1561_v36  ;;  %v1281_v41 = vadd.f32 %v1280_v5, %v1167_v38 }
 0x119   : > { %v2967_v42 = vadd.f32 %v1562_v40, %v1277_v37  ;;  %v1169_v43 = vpop.f32.mrf.mxu0 }
 0x11a   : > { %v2969_v44 = vpop.f32.mrf.mxu1  ;;  %v1563_v45 = vrot.slane %v1281_v41, 7  ;;  %v1283_v46 = vadd.f32 %v1282_v7, %v1169_v43 }
 0x11b   : > { %v1171_v47 = vpop.f32.mrf.mxu0 }
 0x11c   : > { %v2971_v48 = vpop.f32.mrf.mxu1  ;;  %v1601_v49 = vsel %vm1559_vm8, 0.0, %v1563_v45  ;;  %v1285_v50 = vadd.f32 %v1284_v8, %v1171_v47 }
 0x11d   : > { %v2974_v52 = vadd.f32 %v1601_v49, %v1283_v46  ;;  %v1173_v53 = vpop.f32.mrf.mxu0 }
 0x11e   : > { %v2976_v54 = vpop.f32.mrf.mxu1  ;;  %v1564_v55 = vrot.slane %v1285_v50, 7  ;;  %v1287_v56 = vadd.f32 %v1286_v10, %v1173_v53 }
 0x11f   : > { %v1177_v31 = vpop.f32.mrf.mxu0 }
 0x120   : > { %v2978_v57 = vpop.f32.mrf.mxu1  ;;  %v1565_v58 = vsel %vm1559_vm8, %v1563_v45, %v1564_v55  ;;  %v1291_v59 = vadd.f32 %v1290_v11, %v1177_v31 }
 0x121   : > { %v2981_v60 = vadd.f32 %v1565_v58, %v1287_v56  ;;  %v1179_v61 = vpop.f32.mrf.mxu0 }
 0x122   : > { %v2983_v62 = vpop.f32.mrf.mxu1  ;;  %v1566_v63 = vrot.slane %v1291_v59, 7  ;;  %v1293_v32 = vadd.f32 %v1292_v12, %v1179_v61 }
 0x123   : > { %v1181_v0 = vpop.f32.mrf.mxu0 }
 0x124   : > { %v2985_v1 = vpop.f32.mrf.mxu1  ;;  %v1602_v4 = vsel %vm1559_vm8, 0.0, %v1566_v63  ;;  %v1295_v6 = vadd.f32 %v1294_v13, %v1181_v0 }
 0x125   : > { %v2988_v2 = vadd.f32 %v1602_v4, %v1293_v32  ;;  %v1183_v51 = vpop.f32.mrf.mxu0 }
 0x126   : > { %v2990_v9 = vpop.f32.mrf.mxu1  ;;  %v1567_v35 = vrot.slane %v1295_v6, 7  ;;  %v1297_v3 = vadd.f32 %v1296_v14, %v1183_v51 }
 0x127   : > { %v1187_v5 = vpop.f32.mrf.mxu0 }
 0x128   : > { %v2992_v7 = vpop.f32.mrf.mxu1  ;;  %v1568_v8 = vsel %vm1559_vm8, %v1566_v63, %v1567_v35  ;;  %v1301_v10 = vadd.f32 %v1300_v15, %v1187_v5 }
 0x129   : > { %v2995_v11 = vadd.f32 %v1568_v8, %v1297_v3  ;;  %v1189_v12 = vpop.f32.mrf.mxu0 }
 0x12a   : > { %v2997_v19 = vpop.f32.mrf.mxu1  ;;  %v1569_v21 = vrot.slane %v1301_v10, 7  ;;  %v1303_v13 = vadd.f32 %v2947_v16, %v1189_v12 }
 0x12b   : > { %v1191_v22 = vpop.f32.mrf.mxu0 }
 0x12c   : > { %v3000_v24 = vpop.f32.mrf.mxu1  ;;  %v1603_v25 = vsel %vm1559_vm8, 0.0, %v1569_v21  ;;  %v1305_v14 = vadd.f32 %v2949_v17, %v1191_v22 }
 0x12d   : > { %v3004_v26 = vadd.f32 %v1603_v25, %v1303_v13  ;;  %v1193_v28 = vpop.f32.mrf.mxu0 }
 0x12e   : > { %v3006_v29 = vpop.f32.mrf.mxu1  ;;  %v1570_v15 = vrot.slane %v1305_v14, 7  ;;  %v1307_v33 = vadd.f32 %v2951_v18, %v1193_v28 }
 0x12f   : > { %v1197_v36 = vpop.f32.mrf.mxu0 }
 0x130   : > { %v3009_v37 = vpop.f32.mrf.mxu1  ;;  %v1571_v16 = vsel %vm1559_vm8, %v1569_v21, %v1570_v15  ;;  %v1311_v38 = vadd.f32 %v2953_v20, %v1197_v36 }
 0x131   : > { %v3013_v40 = vadd.f32 %v1571_v16, %v1307_v33  ;;  %v1199_v41 = vpop.f32.mrf.mxu0 }
 0x132   : > { %v3015_v43 = vpop.f32.mrf.mxu1  ;;  %v1572_v17 = vrot.slane %v1311_v38, 7  ;;  %v1313_v45 = vadd.f32 %v2955_v23, %v1199_v41 }
 0x133   : > { %v1201_v46 = vpop.f32.mrf.mxu0 }
 0x134   : > { %v3018_v47 = vpop.f32.mrf.mxu1  ;;  %v1604_v18 = vsel %vm1559_vm8, 0.0, %v1572_v17  ;;  %v1315_v49 = vadd.f32 %v2957_v27, %v1201_v46 }
 0x135   : > { %v3022_v50 = vadd.f32 %v1604_v18, %v1313_v45  ;;  %v1203_v53 = vpop.f32.mrf.mxu0 }
 0x136   : > { %v3024_v55 = vpop.f32.mrf.mxu1  ;;  %v1573_v20 = vrot.slane %v1315_v49, 7  ;;  %v1317_v56 = vadd.f32 %v2962_v34, %v1203_v53 }
 0x137   : > { %v1207_v31 = vpop.f32.mrf.mxu0 }
 0x138   : > { %v2139_v58 = vpop.f32.mrf.mxu1  ;;  %v1574_v59 = vsel %vm1559_vm8, %v1572_v17, %v1573_v20  ;;  %v1321_v23 = vadd.f32 %v2964_v39, %v1207_v31 }
 0x139   : > { %v3029_v61 = vadd.f32 %v1574_v59, %v1317_v56  ;;  %v1209_v63 = vpop.f32.mrf.mxu0 }
 0x13a   : > { %v2140_v32 = vpop.f32.mrf.mxu1  ;;  %v1575_v0 = vrot.slane %v1321_v23, 7  ;;  %v1323_v27 = vadd.f32 %v2969_v44, %v1209_v63 }
 0x13b   : > { %v1211_v4 = vpop.f32.mrf.mxu0 }
 0x13c   : > { %v2142_v6 = vpop.f32.mrf.mxu1  ;;  %v1605_v51 = vsel %vm1559_vm8, 0.0, %v1575_v0  ;;  %v1325_v35 = vadd.f32 %v2971_v48, %v1211_v4 }
 0x13d   : > { %v3034_v34 = vadd.f32 %v1605_v51, %v1323_v27  ;;  %v1213_v3 = vpop.f32.mrf.mxu0 }
 0x13e   : > { %v2143_v5 = vpop.f32.mrf.mxu1  ;;  %v1576_v8 = vrot.slane %v1325_v35, 7  ;;  %v1327_v39 = vadd.f32 %v2976_v54, %v1213_v3  ;;  %v2141_v35 = vadd.f32 %v2140_v32, %v2139_v58 }
 0x13f   : > { %v1217_v10 = vpop.f32.mrf.mxu0 }
 0x140   : > { %v3037_v12 = vpop.f32.mrf.mxu1  ;;  %v1577_v21 = vsel %vm1559_vm8, %v1575_v0, %v1576_v8  ;;  %v1331_v44 = vadd.f32 %v2978_v57, %v1217_v10  ;;  %v2144_v10 = vadd.f32 %v2143_v5, %v2142_v6  ;;  %v3083_v5 = vld [vmem:[%s3190_s6] ss:$0 sm:$0xff] }
 0x141   : > { %v3041_v13 = vadd.f32 %v1577_v21, %v1327_v39  ;;  %v1219_v22 = vpop.f32.mrf.mxu0 }
 0x142   : > { %v3043_v25 = vpop.f32.mrf.mxu1  ;;  %v1578_v48 = vrot.slane %v1331_v44, 7  ;;  %v1333_v14 = vadd.f32 %v2983_v62, %v1219_v22 }
 0x143   : > { %v1221_v28 = vpop.f32.mrf.mxu0 }
 0x144   : > { %v3046_v15 = vpop.f32.mrf.mxu1  ;;  %v1606_v54 = vsel %vm1559_vm8, 0.0, %v1578_v48  ;;  %v1335_v33 = vadd.f32 %v2985_v1, %v1221_v28 }
 0x145   : > { %v3050_v36 = vadd.f32 %v1606_v54, %v1333_v14  ;;  %v1223_v16 = vpop.f32.mrf.mxu0 }
 0x146   : > { %v3052_v38 = vpop.f32.mrf.mxu1  ;;  %v1579_v57 = vrot.slane %v1335_v33, 7  ;;  %v1337_v41 = vadd.f32 %v2990_v9, %v1223_v16 }
 0x147   : > { %v1227_v17 = vpop.f32.mrf.mxu0 }
 0x148   : > { %v2151_v45 = vpop.f32.mrf.mxu1  ;;  %v1580_v46 = vsel %vm1559_vm8, %v1578_v48, %v1579_v57  ;;  %v1341_v62 = vadd.f32 %v2992_v7, %v1227_v17 }
 0x149   : > { %v3057_v18 = vadd.f32 %v1580_v46, %v1337_v41  ;;  %v1229_v49 = vpop.f32.mrf.mxu0 }
 0x14a   : > { %v2152_v53 = vpop.f32.mrf.mxu1  ;;  %v1581_v20 = vrot.slane %v1341_v62, 7  ;;  %v1343_v1 = vadd.f32 %v2997_v19, %v1229_v49  ;;  %v2147_v49 = vadd.f32 %v3043_v25, %v3037_v12 }
 0x14b   : > { %v1231_v56 = vpop.f32.mrf.mxu0  ;;  %v2153_v16 = vadd.f32 %v2152_v53, %v2151_v45 }
 0x14c   : > { %v2154_v31 = vpop.f32.mrf.mxu1  ;;  %v1607_v59 = vsel %vm1559_vm8, 0.0, %v1581_v20  ;;  %v1345_v23 = vadd.f32 %v3000_v24, %v1231_v56  ;;  %v2135_v24 = vadd.f32 %v3015_v43, %v3009_v37 }
 0x14d   : > { %v3062_v9 = vadd.f32 %v1607_v59, %v1343_v1  ;;  %v1233_v63 = vpop.f32.mrf.mxu0  ;;  %v2150_v59 = vadd.f32 %v3052_v38, %v3046_v15 }
 0x14e   : > { %v2155_v0 = vpop.f32.mrf.mxu1  ;;  %v1582_v27 = vrot.slane %v1345_v23, 7  ;;  %v1347_v7 = vadd.f32 %v3006_v29, %v1233_v63  ;;  %v2138_v29 = vadd.f32 %v3024_v55, %v3018_v47 }
 0x14f   : > { %v2215_v51 = vpop.f32.mrf.mxu0  ;;  %v2156_v53 = vadd.f32 %v2155_v0, %v2154_v31 }
 0x150   : > { %v3065_v4 = vpop.f32.mrf.mxu1  ;;  %v1583_v3 = vsel %vm1559_vm8, %v1581_v20, %v1582_v27  ;;  %v1489_v21 = vadd.f32 %v2215_v51, %v2141_v35 }
 0x151   : > { %v3068_v19 = vadd.f32 %v1583_v3, %v1347_v7  ;;  %v1480_v39 = vpop.f32.mrf.mxu0 }
 0x152   : > { %v3070_v8 = vpop.f32.mrf.mxu1  ;;  %v1481_v48 = vadd.f32 %v2135_v24, %v1480_v39  ;;  %v1628_v28 = vrot.slane %v1489_v21, 1 }
 0x153   : > { %v2216_v22 = vpop.f32.mrf.mxu0 }
 0x154   : > { %v3074_v44 = vpop.f32.mrf.mxu1  ;;  %v1492_v58 = vadd.f32 %v2216_v22, %v2144_v10  ;;  %v1625_v6 = vrot.slane %v1481_v48, 1 }
 0x155   : > { %v1483_v14 = vpop.f32.mrf.mxu0 }
 0x156   : > { %v3078_v32 = vpop.f32.mrf.mxu1  ;;  %v1629_v54 = vrot.slane %v1492_v58, 1  ;;  %v1484_v33 = vadd.f32 %v2138_v29, %v1483_v14 }
 0x157   : > { %v2219_v43 = vpop.f32.mrf.mxu0 }
 0x158   : > { %v2163_v37 = vpop.f32.mrf.mxu1  ;;  %v1630_v47 = vsel %vm1624_vm9, %v1628_v28, %v1629_v54  ;;  %v1666_v55 = vsel %vm1624_vm9, %v1629_v54, 0.0  ;;  %v1626_v57 = vrot.slane %v1484_v33, 1  ;;  %v1505_v46 = vadd.f32 %v2219_v43, %v2153_v16 }
 0x159   : > { %v1691_v41 = vadd.f32 %v2974_v52, %v1630_v47  ;;  %v1692_v17 = vadd.f32 %v2981_v60, %v1666_v55  ;;  %v1496_v45 = vpop.f32.mrf.mxu0 }
 0x15a   : > { %v2164_v62 = vpop.f32.mrf.mxu1  ;;  %v1627_v20 = vsel %vm1624_vm9, %v1625_v6, %v1626_v57  ;;  %v1665_v52 = vsel %vm1624_vm9, %v1626_v57, 0.0  ;;  %v1497_v23 = vadd.f32 %v2147_v49, %v1496_v45  ;;  %v1634_v7 = vrot.slane %v1505_v46, 1 }
 0x15b   : > { %v1713_v60 = vadd.f32 %v3083_v5, %v1691_v41  ;;  %v1714_v1 = vadd.f32 %v3083_v5, %v1692_v17  ;;  %v1689_v56 = vadd.f32 %v2960_v30, %v1627_v20  ;;  %v1690_v12 = vadd.f32 %v2967_v42, %v1665_v52  ;;  %v2220_v31 = vpop.f32.mrf.mxu0 }
 0x15c   : > { %v2166_v25 = vpop.f32.mrf.mxu1  ;;  %v1508_v63 = vadd.f32 %v2220_v31, %v2156_v53  ;;  %v2165_v42 = vadd.f32 %v2164_v62, %v2163_v37  ;;  %v1631_v29 = vrot.slane %v1497_v23, 1  ;;  %v2162_v52 = vadd.f32 %v3078_v32, %v3074_v44 }
 0x15d   : > { %1729 = vst [vmem:[%s3096_s26 + $0x10] sm:$0xff] %v1713_v60  ;;  %1730 = vst [vmem:[%s3096_s26 + $0x18] sm:$0xff] %v1714_v1  ;;  %v1711_v0 = vadd.f32 %v3083_v5, %v1689_v56  ;;  %v1712_v27 = vadd.f32 %v3083_v5, %v1690_v12  ;;  %v1499_v30 = vpop.f32.mrf.mxu0  ;;  %v1767_v35 = vmul.f32 %v1713_v60, %v1713_v60 }
 0x15e   : > { %v2167_v51 = vpop.f32.mrf.mxu1  ;;  %v1635_v3 = vrot.slane %v1508_v63, 1  ;;  %v1500_v39 = vadd.f32 %v2150_v59, %v1499_v30  ;;  %v1768_v24 = vmul.f32 %v1714_v1, %v1714_v1 }
 0x15f   : > { %1727 = vst [vmem:[%s3096_s26] sm:$0xff] %v1711_v0  ;;  %1728 = vst [vmem:[%s3096_s26 + $0x8] sm:$0xff] %v1712_v27  ;;  %v1744_v15 = vadd.f32 %v1712_v27, %v1711_v0  ;;  %v1765_v38 = vmul.f32 %v1711_v0, %v1711_v0  ;;  %v1766_v10 = vmul.f32 %v1712_v27, %v1712_v27  ;;  %v2223_v22 = vpop.f32.mrf.mxu0 }
 0x160   : > { %v2169_v21 = vpop.f32.mrf.mxu1  ;;  %v1636_v48 = vsel %vm1624_vm9, %v1634_v7, %v1635_v3  ;;  %v1668_v58 = vsel %vm1624_vm9, %v1635_v3, 0.0  ;;  %v1632_v14 = vrot.slane %v1500_v39, 1  ;;  %v2168_v6 = vadd.f32 %v2167_v51, %v2166_v25 }
 0x161   : > { %v1745_v28 = vadd.f32 %v1744_v15, %v1713_v60  ;;  %v1781_v54 = vadd.f32 %v1766_v10, %v1765_v38  ;;  %v1695_v33 = vadd.f32 %v3004_v26, %v1636_v48  ;;  %v1696_v16 = vadd.f32 %v3013_v40, %v1668_v58  ;;  %v1512_v43 = vpop.f32.mrf.mxu0 }
 0x162   : > { %v2170_v37 = vpop.f32.mrf.mxu1  ;;  %v1633_v47 = vsel %vm1624_vm9, %v1631_v29, %v1632_v14  ;;  %v1667_v55 = vsel %vm1624_vm9, %v1632_v14, 0.0  ;;  %v1521_v57 = vadd.f32 %v2223_v22, %v2165_v42  ;;  %v2159_v40 = vadd.f32 %v3070_v8, %v3065_v4 }
 0x163   : > { %v1782_v41 = vadd.f32 %v1781_v54, %v1767_v35  ;;  %v1717_v17 = vadd.f32 %v3083_v5, %v1695_v33  ;;  %v1718_v46 = vadd.f32 %v3083_v5, %v1696_v16  ;;  %v1693_v62 = vadd.f32 %v2988_v2, %v1633_v47  ;;  %v2224_v45 = vpop.f32.mrf.mxu0 }
 0x164   : > { %v2172_v26 = vpop.f32.mrf.mxu1  ;;  %v1694_v49 = vadd.f32 %v2995_v11, %v1667_v55  ;;  %v1746_v53 = vadd.f32 %v1745_v28, %v1714_v1  ;;  %v1524_v20 = vadd.f32 %v2224_v45, %v2168_v6  ;;  %v1640_v31 = vrot.slane %v1521_v57, 1 }
 0x165   : > { %1733 = vst [vmem:[%s3096_s26 + $0x30] sm:$0xff] %v1717_v17  ;;  %1734 = vst [vmem:[%s3096_s26 + $0x38] sm:$0xff] %v1718_v46  ;;  %v1715_v60 = vadd.f32 %v3083_v5, %v1693_v62  ;;  %v1783_v56 = vadd.f32 %v1782_v41, %v1768_v24  ;;  %v1515_v12 = vpop.f32.mrf.mxu0  ;;  %v1513_v59 = vadd.f32 %v2159_v40, %v1512_v43 }
 0x166   : > { %v2173_v2 = vpop.f32.mrf.mxu1  ;;  %v1716_v25 = vadd.f32 %v3083_v5, %v1694_v49  ;;  %v1641_v4 = vrot.slane %v1524_v20, 1  ;;  %v1516_v1 = vadd.f32 %v2162_v52, %v1515_v12  ;;  %v2171_v32 = vadd.f32 %v2170_v37, %v2169_v21 }
 0x167   : > { %1731 = vst [vmem:[%s3096_s26 + $0x20] sm:$0xff] %v1715_v60  ;;  %v1747_v11 = vadd.f32 %v1746_v53, %v1715_v60  ;;  %v1769_v8 = vmul.f32 %v1715_v60, %v1715_v60  ;;  %v2227_v63 = vpop.f32.mrf.mxu0  ;;  %v1771_v39 = vmul.f32 %v1717_v17, %v1717_v17  ;;  %v1637_v24 = vrot.slane %v1513_v59, 1 }
 0x168   : > { %v2175_v23 = vpop.f32.mrf.mxu1  ;;  %1732 = vst [vmem:[%s3096_s26 + $0x28] sm:$0xff] %v1716_v25  ;;  %v1770_v44 = vmul.f32 %v1716_v25, %v1716_v25  ;;  %v1642_v0 = vsel %vm1624_vm9, %v1640_v31, %v1641_v4  ;;  %v1670_v27 = vsel %vm1624_vm9, %v1641_v4, 0.0  ;;  %v1638_v15 = vrot.slane %v1516_v1, 1 }
 0x169   : > { %v1748_v7 = vadd.f32 %v1747_v11, %v1716_v25  ;;  %v1784_v51 = vadd.f32 %v1783_v56, %v1769_v8  ;;  %v1699_v30 = vadd.f32 %v3034_v34, %v1642_v0  ;;  %v1700_v35 = vadd.f32 %v3041_v13, %v1670_v27  ;;  %v1528_v3 = vpop.f32.mrf.mxu0 }
 0x16a   : > { %v2176_v42 = vpop.f32.mrf.mxu1  ;;  %v1772_v14 = vmul.f32 %v1718_v46, %v1718_v46  ;;  %v1639_v34 = vsel %vm1624_vm9, %v1637_v24, %v1638_v15  ;;  %v1669_v13 = vsel %vm1624_vm9, %v1638_v15, 0.0  ;;  %v2174_v54 = vadd.f32 %v2173_v2, %v2172_v26 }
 0x16b   : > { %v2177_v38 = vadd.f32 %v2176_v42, %v2175_v23  ;;  %v1749_v10 = vadd.f32 %v1748_v7, %v1717_v17  ;;  %v1785_v21 = vadd.f32 %v1784_v51, %v1770_v44  ;;  %v1721_v22 = vadd.f32 %v3083_v5, %v1699_v30  ;;  %v2228_v58 = vpop.f32.mrf.mxu0 }
 0x16c   : > { %v1722_v29 = vadd.f32 %v3083_v5, %v1700_v35  ;;  %v2178_v48 = vpop.f32.mrf.mxu1  ;;  %v1697_v33 = vadd.f32 %v3022_v50, %v1639_v34  ;;  %v1529_v16 = vadd.f32 %v2171_v32, %v1528_v3  ;;  %v1698_v6 = vadd.f32 %v3029_v61, %v1669_v13 }
 0x16d   : > { %v1786_v28 = vadd.f32 %v1785_v21, %v1771_v39  ;;  %1737 = vst [vmem:[%s3096_s26 + $0x50] sm:$0xff] %v1721_v22  ;;  %v1531_v43 = vpop.f32.mrf.mxu0  ;;  %v1750_v47 = vadd.f32 %v1749_v10, %v1718_v46  ;;  %v1537_v55 = vadd.f32 %v2227_v63, %v2177_v38  ;;  %v1775_v20 = vmul.f32 %v1721_v22, %v1721_v22 }
 0x16e   : > { %1738 = vst [vmem:[%s3096_s26 + $0x58] sm:$0xff] %v1722_v29  ;;  %v2179_v37 = vpop.f32.mrf.mxu1  ;;  %v1719_v41 = vadd.f32 %v3083_v5, %v1697_v33  ;;  %v1532_v62 = vadd.f32 %v2174_v54, %v1531_v43  ;;  %v1720_v45 = vadd.f32 %v3083_v5, %v1698_v6  ;;  %v1643_v50 = vrot.slane %v1529_v16, 1 }
 0x16f   : > { %v2180_v57 = vadd.f32 %v2179_v37, %v2178_v48  ;;  %v1787_v17 = vadd.f32 %v1786_v28, %v1772_v14  ;;  %v1646_v60 = vrot.slane %v1537_v55, 1  ;;  %v1776_v63 = vmul.f32 %v1722_v29, %v1722_v29 }
 0x170   : > { %1735 = vst [vmem:[%s3096_s26 + $0x40] sm:$0xff] %v1719_v41  ;;  %v1751_v26 = vadd.f32 %v1750_v47, %v1719_v41  ;;  %v1773_v49 = vmul.f32 %v1719_v41, %v1719_v41  ;;  %v1644_v53 = vrot.slane %v1532_v62, 1  ;;  %1736 = vst [vmem:[%s3096_s26 + $0x48] sm:$0xff] %v1720_v45  ;;  %v1774_v52 = vmul.f32 %v1720_v45, %v1720_v45 }
 0x171   : > { %v1540_v40 = vadd.f32 %v2228_v58, %v2180_v57 }
 0x172   : > { %v1752_v46 = vadd.f32 %v1751_v26, %v1720_v45  ;;  %v1788_v56 = vadd.f32 %v1787_v17, %v1773_v49  ;;  %v1645_v2 = vsel %vm1624_vm9, %v1643_v50, %v1644_v53  ;;  %v1671_v12 = vsel %vm1624_vm9, %v1644_v53, 0.0 }
 0x173   : > { %v1647_v61 = vrot.slane %v1540_v40, 1  ;;  %v1701_v59 = vadd.f32 %v3050_v36, %v1645_v2  ;;  %v1702_v4 = vadd.f32 %v3057_v18, %v1671_v12 }
 0x174   : > { %v1753_v11 = vadd.f32 %v1752_v46, %v1721_v22  ;;  %v1789_v8 = vadd.f32 %v1788_v56, %v1774_v52 }
 0x175   : > { %v1648_v25 = vsel %vm1624_vm9, %v1646_v60, %v1647_v61  ;;  %v1672_v31 = vsel %vm1624_vm9, %v1647_v61, 0.0  ;;  %v1723_v44 = vadd.f32 %v3083_v5, %v1701_v59  ;;  %v1724_v32 = vadd.f32 %v3083_v5, %v1702_v4 }
 0x176   : > { %v1703_v1 = vadd.f32 %v3062_v9, %v1648_v25  ;;  %v1704_v23 = vadd.f32 %v3068_v19, %v1672_v31  ;;  %v1790_v0 = vadd.f32 %v1789_v8, %v1775_v20  ;;  %v1754_v7 = vadd.f32 %v1753_v11, %v1722_v29 }
 0x177   : > { %1739 = vst [vmem:[%s3096_s26 + $0x60] sm:$0xff] %v1723_v44  ;;  %1740 = vst [vmem:[%s3096_s26 + $0x68] sm:$0xff] %v1724_v32  ;;  %v1777_v18 = vmul.f32 %v1723_v44, %v1723_v44  ;;  %v1778_v19 = vmul.f32 %v1724_v32, %v1724_v32 }
 0x178   : > { %v1725_v27 = vadd.f32 %v3083_v5, %v1703_v1  ;;  %v1726_v36 = vadd.f32 %v3083_v5, %v1704_v23  ;;  %v1755_v51 = vadd.f32 %v1754_v7, %v1723_v44  ;;  %v1791_v9 = vadd.f32 %v1790_v0, %v1776_v63 }
 0x17a   : > { %1741 = vst [vmem:[%s3096_s26 + $0x70] sm:$0xff] %v1725_v27  ;;  %1742 = vst [vmem:[%s3096_s26 + $0x78] sm:$0xff] %v1726_v36  ;;  %v1756_v30 = vadd.f32 %v1755_v51, %v1724_v32  ;;  %v1792_v35 = vadd.f32 %v1791_v9, %v1777_v18  ;;  %v1779_v42 = vmul.f32 %v1725_v27, %v1725_v27 }
 0x17b   : > { %v1780_v24 = vmul.f32 %v1726_v36, %v1726_v36 }
 0x17c   : > { %v1757_v3 = vadd.f32 %v1756_v30, %v1725_v27  ;;  %v1793_v39 = vadd.f32 %v1792_v35, %v1778_v19 }
 0x17e   : > { %v1758_v15 = vadd.f32 %v1757_v3, %v1726_v36  ;;  %v1794_v38 = vadd.f32 %v1793_v39, %v1779_v42 }
 0x180   : > { %v1759_v10 = vrot.slane %v1758_v15, 4  ;;  %v1795_v21 = vadd.f32 %v1794_v38, %v1780_v24 }
 0x182   : > { %v1760_v5 = vadd.f32 %v1759_v10, %v1758_v15  ;;  %v1796_v22 = vrot.slane %v1795_v21, 4 }
 0x184   : > { %v1761_v29 = vrot.slane %v1760_v5, 2  ;;  %v1797_v48 = vadd.f32 %v1796_v22, %v1795_v21 }
 0x186   : > { %v1762_v58 = vadd.f32 %v1761_v29, %v1760_v5  ;;  %v1798_v14 = vrot.slane %v1797_v48, 2 }
 0x188   : > { %v1763_v34 = vrot.slane %v1762_v58, 1  ;;  %v1799_v13 = vadd.f32 %v1798_v14, %v1797_v48 }
 0x18a   : > { %v1800_v28 = vrot.slane %v1799_v13, 1  ;;  %v1764_v54 = vadd.f32 %v1763_v34, %v1762_v58  ;;  %1805 = sbr.rel (%p2106_p12) target bundleno = 401 (0x191), region = 52 }
 0x18c   : > { %v1801_v33 = vadd.f32 %v1800_v28, %v1799_v13 }
 0x18e   : > { %v1802_v16 = vsel %vm1559_vm8, %v1764_v54, %v1801_v33 }
 0x18f   : > { %v2408_v37 = vmov 0.0  }
 0x190   : > { %1806 = vst [vmem:[%s2522_s21] sm:$0x3] %v2408_v37 }
 0x191 PF:  {}
 0x197   : > { %v1807_v43 = vld [vmem:[%s2522_s21] sm:$0x3] }
 0x198   : > { %v1808_v6 = vadd.f32 %v1807_v43, %v1802_v16 }
 0x19a   : > { %1809 = vst [vmem:[%s2522_s21] sm:$0x3] %v1808_v6 }
 0x19b PF: > { %s19_s9 = sadd.s32 1, %s2405_s9   ;;  %s3200_s27 = smov %s2397_s29 }
 0x19c   : > { %p16_p13 = scmp.ge.s32.totalorder %s19_s9, 6   ;;  %s3201_s28 = smov %s2401_s30 }
 0x19d   : > { %s3202_s29 = smov %s3205_s10  ;;  %s3203_s30 = smov %s3209_s11 }
 0x19e   :  { %18 = sbr.rel (!%p16_p13) target bundleno = 3 (0x3), region = 100 }

// kernel: resblock2d_pallas_nhwc.5
= control target key start
LH: loop header
LB: loop body
LE: loop exit
PB: predicated region body
PF: predicated region fallthrough
CT: control target
= control target key end

     0   :  { %s2437_s27 = smov 0   ;;  %s2439_s28 = smov 0   ;;  %s3181_s0 = inlined_call_operand.vmem [shape: f32[2,16,16,128], index: 0, kind: input, shape index: {}, may-alias: {0,1,2}]   ;;  %s3182_s1 = inlined_call_operand.vmem [shape: f32[2,16,16,128], index: 1, kind: input, shape index: {}, may-alias: {0,1,2}]   ;;  %s3183_s2 = inlined_call_operand.vmem [shape: f32[2,16,16,128], index: 2, kind: input, shape index: {}, may-alias: {0,1,2}]   ;;  %s3184_s3 = inlined_call_operand.vmem [shape: f32[2,16,16,128], index: 3, kind: input, shape index: {}]   ;;  %s3185_s4 = inlined_call_operand.vmem [shape: f32[1,128], index: 4, kind: input, shape index: {}]   ;;  %s3186_s5 = inlined_call_operand.vmem [shape: f32[1,128], index: 5, kind: input, shape index: {}]   ;;  %s3187_s6 = inlined_call_operand.vmem [shape: bf16[384,384], index: 6, kind: input, shape index: {}]   ;;  %s3188_s7 = inlined_call_operand.vmem [shape: f32[1,128], index: 7, kind: input, shape index: {}]   ;;  %s3189_s8 = inlined_call_operand.vmem [shape: f32[2,16,16,128], index: 8, kind: output, shape index: {}]  }
   0x1   :  { %s2441_s29 = smov 0   ;;  %s2443_s30 = smov 0  }
   0x2   :  { %s2445_s9 = smov 0  }
   0x3 LB: > { %s27_s10 = sadd.s32 1, %s2381_s29  ;;  %s30_s11 = sadd.s32 1, %s2385_s30  ;;  %s2389_s9 = sphi %s2445_s9, %s18_s9   ;;  %s2385_s30 = sphi %s2443_s30, %s3198_s30   ;;  %s2381_s29 = sphi %s2441_s29, %s3197_s29   ;;  %s2377_s28 = sphi %s2439_s28, %s3196_s28   ;;  %s2373_s27 = sphi %s2437_s27, %s3195_s27  }
   0x4   : > { %p28_p0 = scmp.ge.s32.totalorder %s27_s10, 2  ;;  %p1975_p1 = scmp.ge.s32.totalorder %s2389_s9, 1 }
   0x5   : > { %p366_p2 = scmp.lt.s32.totalorder %s2389_s9, 5 }
   0x6   : > { %s3200_s10 = smov (%p28_p0, %s27_s10), 0  ;;  %s3202_s11 = smov (!%p28_p0, %s30_s11), %s2385_s30 }
   0x7   : > { %p367_p3 = pnand %p1975_p1, %p366_p2  ;;  %p32_p4 = scmp.ge.s32.totalorder %s3202_s11, 2 }
   0x8   : > { %s2475_s14 = sshll.u32 (!%p367_p3), %s2373_s27, 3  ;;  %p447_p5 = scmp.lt.s32.totalorder (!%p367_p3), %s2377_s28, 1 }
   0x9   : > { %s3204_s11 = smov (%p32_p4, %s3202_s11), 0  ;;  %370 = sbr.rel (%p367_p3) target bundleno = 381 (0x17d), region = 52 }
   0xa   : > { %p449_p6 = scmp.lt.s32.totalorder (!%p367_p3), %s2475_s14, 15  ;;  %s2543_s16 = sadd.s32 (!%p367_p3), 4294967295, %s2475_s14 }
   0xb   : > { %p459_p7 = scmp.gt.s32.totalorder (!%p367_p3), %s2543_s16, 0  ;;  %p1982_p8 = scmp.lt.s32.totalorder (!%p367_p3), %s2543_s16, 15 }
   0xc   : > { %p633_p10 = scmp.gt.s32.totalorder (!%p367_p3), %s2373_s27, 0  ;;  %p662_p11 = scmp.lt.s32.totalorder (!%p367_p3), %s2373_s27, 1 }
   0xe   : > { %v2255_v0 = vld [vmem:[%s3187_s6 + $0xac] ss:$12 sps:$4 sm:$0xff]   ;;  %v2391_v2 = vmov 0   ;;  %v2259_v3 = vld [vmem:[%s3187_s6 + $0xa8] ss:$12 sps:$4 sm:$0xff]   ;;  %s3206_s28 = smov (!%p447_p5, %s2377_s28), 1 }
   0xf   : > { %v2257_v1 = vld [vmem:[%s3187_s6 + $0x22c] ss:$12 sps:$4 sm:$0xff]   ;;  %1296 = vmatprep.mubr.bf16.mxu1 %v2391_v2  ;;  %1151 = vmatprep.subr.bf16.mxu0 %v2255_v0  ;;  %v2260_v4 = vld [vmem:[%s3187_s6 + $0x228] ss:$12 sps:$4 sm:$0xff]   ;;  %v2265_v7 = vld [vmem:[%s3187_s6 + $0x90] ss:$12 sps:$4 sm:$0xff]  }
  0x10   : > { %1264 = vmatprep.subr.bf16.mxu1 %v2257_v1  ;;  %v2261_v5 = vld [vmem:[%s3187_s6 + $0x94] ss:$12 sps:$4 sm:$0xff]   ;;  %1152 = vmatpush1.bf16.msra.mxu0 %v2259_v3  ;;  %v2266_v8 = vld [vmem:[%s3187_s6 + $0x210] ss:$12 sps:$4 sm:$0xff]   ;;  %s450_s17 = scalar_select %p449_p6, %s2475_s14, 15 }
  0x11   : > { %1265 = vmatpush1.bf16.msra.mxu1 %v2260_v4  ;;  %v2263_v6 = vld [vmem:[%s3187_s6 + $0x214] ss:$12 sps:$4 sm:$0xff]   ;;  %1153 = vmatprep.subr.bf16.mxu0 %v2261_v5  ;;  %v2267_v9 = vld [vmem:[%s3187_s6 + $0x7c] ss:$12 sps:$4 sm:$0xff]   ;;  %v2271_v11 = vld [vmem:[%s3187_s6 + $0x78] ss:$12 sps:$4 sm:$0xff]  }
  0x12   : > { %1266 = vmatprep.subr.bf16.mxu1 %v2263_v6  ;;  %v2269_v10 = vld [vmem:[%s3187_s6 + $0x1fc] ss:$12 sps:$4 sm:$0xff]   ;;  %v2272_v12 = vld [vmem:[%s3187_s6 + $0x1f8] ss:$12 sps:$4 sm:$0xff]   ;;  %s1977_s13 = sshll.u32 %s450_s17, 1  ;;  %s2521_s15 = sshll.u32 %s3206_s28, 5 }
  0x13   : > { %v2273_v13 = vld [vmem:[%s3187_s6 + $0x64] ss:$12 sps:$4 sm:$0xff]   ;;  %v2277_v15 = vld [vmem:[%s3187_s6 + $0x60] ss:$12 sps:$4 sm:$0xff]   ;;  %s453_s23 = sadd.s32 %s2521_s15, %s1977_s13  ;;  %v2283_v19 = vld [vmem:[%s3187_s6 + $0x48] ss:$12 sps:$4 sm:$0xff]  }
  0x14   : > { %1154 = vmatpush1.bf16.msra.mxu0 %v2265_v7  ;;  %v2275_v14 = vld [vmem:[%s3187_s6 + $0x1e4] ss:$12 sps:$4 sm:$0xff]   ;;  %v2278_v16 = vld [vmem:[%s3187_s6 + $0x1e0] ss:$12 sps:$4 sm:$0xff]   ;;  %v2284_v20 = vld [vmem:[%s3187_s6 + $0x1c8] ss:$12 sps:$4 sm:$0xff]  }
  0x15   : > { %1267 = vmatpush1.bf16.msra.mxu1 %v2266_v8  ;;  %1155 = vmatprep.subr.bf16.mxu0 %v2267_v9  ;;  %v2279_v17 = vld [vmem:[%s3187_s6 + $0x4c] ss:$12 sps:$4 sm:$0xff]   ;;  %v2285_v21 = vld [vmem:[%s3187_s6 + $0x34] ss:$12 sps:$4 sm:$0xff]   ;;  %s2548_s20 = sshll.u32 %s453_s23, 3 }
  0x16   : > { %1268 = vmatprep.subr.bf16.mxu1 %v2269_v10  ;;  %v2281_v18 = vld [vmem:[%s3187_s6 + $0x1cc] ss:$12 sps:$4 sm:$0xff]   ;;  %v2287_v22 = vld [vmem:[%s3187_s6 + $0x1b4] ss:$12 sps:$4 sm:$0xff]   ;;  %v2289_v23 = vld [vmem:[%s3187_s6 + $0x30] ss:$12 sps:$4 sm:$0xff]   ;;  %s2561_s25 = scalar_lea.vmem %s3181_s0, %s2548_s20 }
  0x17   : > { %v2290_v24 = vld [vmem:[%s3187_s6 + $0x1b0] ss:$12 sps:$4 sm:$0xff]   ;;  %v2295_v27 = vld [vmem:[%s3187_s6 + $0x18] ss:$12 sps:$4 sm:$0xff]   ;;  %s460_s17 = scalar_select %p459_p7, %s2543_s16, 0  ;;  %v519_v46 = vld [vmem:[%s2561_s25 + $0x28] sm:$0xff] }
  0x18   : > { %1156 = vmatpush1.bf16.msra.mxu0 %v2271_v11  ;;  %v2291_v25 = vld [vmem:[%s3187_s6 + $0x1c] ss:$12 sps:$4 sm:$0xff]   ;;  %v516_v28 = vld [vmem:[%s2561_s25 + $0x10] sm:$0xff]  ;;  %v2584_v30 = vld [vmem:[%s3185_s4] ss:$0 sm:$0xff]  ;;  %s2101_s16 = sadd.s32 8, %s2475_s14 }
  0x19   : > { %1269 = vmatpush1.bf16.msra.mxu1 %v2272_v12  ;;  %1157 = vmatprep.subr.bf16.mxu0 %v2273_v13  ;;  %v2293_v26 = vld [vmem:[%s3187_s6 + $0x19c] ss:$12 sps:$4 sm:$0xff]   ;;  %v2589_v31 = vld [vmem:[%s3186_s5] ss:$0 sm:$0xff]  ;;  %v2296_v32 = vld [vmem:[%s3187_s6 + $0x198] ss:$12 sps:$4 sm:$0xff]   ;;  %v681_v34 = vmul.f32 %v2584_v30, %v516_v28  ;;  %v684_v50 = vmul.f32 %v2584_v30, %v519_v46 }
  0x1a   : > { %1270 = vmatprep.subr.bf16.mxu1 %v2275_v14  ;;  %v517_v29 = vld [vmem:[%s2561_s25 + $0x18] sm:$0xff]  ;;  %v2297_v33 = vld [vmem:[%s3187_s6 + $0x4] ss:$12 sps:$4 sm:$0xff]   ;;  %v2301_v37 = vld [vmem:[%s3187_s6] ss:$12 sps:$4 sm:$0xff]   ;;  %s3208_s17 = smov (!%p1982_p8, %s460_s17), 15 }
  0x1b   : > { %v682_v35 = vmul.f32 %v2584_v30, %v517_v29  ;;  %v2299_v36 = vld [vmem:[%s3187_s6 + $0x184] ss:$12 sps:$4 sm:$0xff]   ;;  %v2302_v38 = vld [vmem:[%s3187_s6 + $0x180] ss:$12 sps:$4 sm:$0xff]   ;;  %v697_v39 = vadd.f32 %v2589_v31, %v681_v34  ;;  %v2306_v52 = vld [vmem:[%s3187_s6 + $0x168] ss:$12 sps:$4 sm:$0xff]   ;;  %v700_v55 = vadd.f32 %v2589_v31, %v684_v50 }
  0x1c   : > { %1158 = vmatpush1.bf16.msra.mxu0 %v2277_v15  ;;  %v2303_v41 = vld [vmem:[%s3187_s6 + $0x16c] ss:$12 sps:$4 sm:$0xff]   ;;  %v2305_v44 = vld [vmem:[%s3187_s6 + $0x170] ss:$12 sps:$4 sm:$0xff]   ;;  %v518_v45 = vld [vmem:[%s2561_s25 + $0x20] sm:$0xff]  ;;  %s1987_s19 = sshll.u32 %s3208_s17, 1 }
  0x1d   : > { %1271 = vmatpush1.bf16.msra.mxu1 %v2278_v16  ;;  %1159 = vmatprep.subr.bf16.mxu0 %v2279_v17  ;;  %v698_v40 = vadd.f32 %v2589_v31, %v682_v35  ;;  %vm713_vm0 = vcmp.ge.f32.partialorder %v697_v39, 0.0  ;;  %v729_v42 = vmul.f32 0.01, %v697_v39  ;;  %v683_v49 = vmul.f32 %v2584_v30, %v518_v45  ;;  %v2307_v53 = vld [vmem:[%s3187_s6 + $0xb0] ss:$12 sps:$4 sm:$0xff]   ;;  %p2654_p9 = scmp.lt.s32.totalorder %s2101_s16, 15  ;;  %s2667_s18 = sadd.s32 %s1987_s19, %s2521_s15 }
  0x1e   : > { %1272 = vmatprep.subr.bf16.mxu1 %v2281_v18  ;;  %v2308_v56 = vld [vmem:[%s3187_s6 + $0x154] ss:$12 sps:$4 sm:$0xff]   ;;  %v2313_v57 = vld [vmem:[%s3187_s6 + $0x158] ss:$12 sps:$4 sm:$0xff]   ;;  %v2310_v58 = vld [vmem:[%s3187_s6 + $0x150] ss:$12 sps:$4 sm:$0xff]  }
  0x1f   : > { %vm714_vm1 = vcmp.ge.f32.partialorder %v698_v40, 0.0  ;;  %v730_v43 = vmul.f32 0.01, %v698_v40  ;;  %v745_v47 = vsel %vm713_vm0, %v697_v39, %v729_v42  ;;  %v699_v54 = vadd.f32 %v2589_v31, %v683_v49  ;;  %v2315_v61 = vld [vmem:[%s3187_s6 + $0x98] ss:$12 sps:$4 sm:$0xff]   ;;  %v520_v62 = vld [vmem:[%s2561_s25 + $0x30] sm:$0xff] }
  0x20   : > { %1160 = vmatpush1.bf16.msra.mxu0 %v2283_v19  ;;  %vm716_vm3 = vcmp.ge.f32.partialorder %v700_v55, 0.0  ;;  %v732_v60 = vmul.f32 0.01, %v700_v55  ;;  %v521_v1 = vld [vmem:[%s2561_s25 + $0x38] sm:$0xff]  ;;  %v685_v3 = vmul.f32 %v2584_v30, %v520_v62  ;;  %v2321_v6 = vld [vmem:[%s3187_s6 + $0x140] ss:$12 sps:$4 sm:$0xff]  }
  0x21   : > { %1273 = vmatpush1.bf16.msra.mxu1 %v2284_v20  ;;  %1161 = vmatprep.subr.bf16.mxu0 %v2285_v21  ;;  %v746_v48 = vsel %vm714_vm1, %v698_v40, %v730_v43  ;;  %vm715_vm2 = vcmp.ge.f32.partialorder %v699_v54, 0.0  ;;  %v731_v59 = vmul.f32 0.01, %v699_v54  ;;  %v2311_v4 = vld [vmem:[%s3187_s6 + $0x13c] ss:$12 sps:$4 sm:$0xff]   ;;  %v686_v5 = vmul.f32 %v2584_v30, %v521_v1  ;;  %v522_v14 = vld [vmem:[%s2561_s25 + $0x40] sm:$0xff] }
  0x22   : > { %1274 = vmatprep.subr.bf16.mxu1 %v2287_v22  ;;  %v2624_v51 = vpack.c.bf16 %v746_v48, %v745_v47  ;;  %v748_v0 = vsel %vm716_vm3, %v700_v55, %v732_v60  ;;  %v2314_v7 = vld [vmem:[%s3187_s6 + $0x138] ss:$12 sps:$4 sm:$0xff]   ;;  %v701_v8 = vadd.f32 %v2589_v31, %v685_v3  ;;  %v2323_v12 = vld [vmem:[%s3187_s6 + $0x80] ss:$12 sps:$4 sm:$0xff]   ;;  %s1989_s23 = sshll.u32 %s2667_s18, 3  ;;  %v687_v17 = vmul.f32 %v2584_v30, %v522_v14  ;;  %s3210_s16 = smov (!%p2654_p9, %s2101_s16), 15 }
  0x23   : > { %v747_v63 = vsel %vm715_vm2, %v699_v54, %v731_v59  ;;  %v2316_v10 = vld [vmem:[%s3187_s6 + $0x124] ss:$12 sps:$4 sm:$0xff]   ;;  %v702_v11 = vadd.f32 %v2589_v31, %v686_v5  ;;  %v523_v16 = vld [vmem:[%s2561_s25 + $0x48] sm:$0xff]  ;;  %s2701_s18 = scalar_select %p633_p10, 1, 0 }
  0x24   : > { %1162 = vmatpush1.bf16.msra.mxu0 %v2289_v23  ;;  %v2673_v9 = vpack.c.bf16 %v748_v0, %v747_v63  ;;  %v733_v13 = vmul.f32 0.01, %v701_v8  ;;  %vm717_vm4 = vcmp.ge.f32.partialorder %v701_v8, 0.0  ;;  %v688_v18 = vmul.f32 %v2584_v30, %v523_v16  ;;  %v2329_v19 = vld [vmem:[%s3187_s6 + $0x128] ss:$12 sps:$4 sm:$0xff]   ;;  %s469_s28 = scalar_lea.vmem %s3182_s1, %s1989_s23  ;;  %v526_v1 = vld [vmem:[%s2561_s25 + $0x60] sm:$0xff] }
  0x25   : > { %1275 = vmatpush1.bf16.msra.mxu1 %v2290_v24  ;;  %1163 = vmatprep.subr.bf16.mxu0 %v2291_v25  ;;  %vm718_vm5 = vcmp.ge.f32.partialorder %v702_v11, 0.0  ;;  %v734_v15 = vmul.f32 0.01, %v702_v11  ;;  %v703_v20 = vadd.f32 %v2589_v31, %v687_v17  ;;  %v2318_v21 = vld [vmem:[%s3187_s6 + $0x120] ss:$12 sps:$4 sm:$0xff]   ;;  %s481_s23 = scalar_select %p2654_p9, %s3210_s16, 15 }
  0x26   : > { %1276 = vmatprep.subr.bf16.mxu1 %v2293_v26  ;;  %v749_v22 = vsel %vm717_vm4, %v701_v8, %v733_v13  ;;  %v704_v24 = vadd.f32 %v2589_v31, %v688_v18  ;;  %v2319_v25 = vld [vmem:[%s3187_s6 + $0x10c] ss:$12 sps:$4 sm:$0xff]   ;;  %v2331_v26 = vld [vmem:[%s3187_s6 + $0x68] ss:$12 sps:$4 sm:$0xff]   ;;  %v2335_v47 = vld [vmem:[%s3187_s6 + $0x110] ss:$12 sps:$4 sm:$0xff]  }
  0x27   : > { %v750_v23 = vsel %vm718_vm5, %v702_v11, %v734_v15  ;;  %v2322_v28 = vld [vmem:[%s3187_s6 + $0x108] ss:$12 sps:$4 sm:$0xff]   ;;  %v735_v29 = vmul.f32 0.01, %v703_v20  ;;  %vm719_vm6 = vcmp.ge.f32.partialorder %v703_v20, 0.0  ;;  %s2764_s22 = sshll.u32 %s481_s23, 1  ;;  %v657_v15 = vstv %s2701_s18 }
  0x28   : > { %1164 = vmatpush1.bf16.msra.mxu0 %v2295_v27  ;;  %v514_v27 = vld [vmem:[%s2561_s25] sm:$0xff]  ;;  %v2726_v34 = vpack.c.bf16 %v750_v23, %v749_v22  ;;  %v531_v39 = vld [vmem:[%s469_s28 + $0x8] sm:$0xff]  ;;  %v524_v40 = vld [vmem:[%s2561_s25 + $0x50] sm:$0xff]  ;;  %vm720_vm7 = vcmp.ge.f32.partialorder %v704_v24, 0.0  ;;  %s484_s14 = sadd.s32 %s2764_s22, %s2521_s15  ;;  %vm2805_vm14 = vcmp.eq.s32.totalorder %v657_v15, 1 }
  0x29   : > { %1277 = vmatpush1.bf16.msra.mxu1 %v2296_v32  ;;  %1165 = vmatprep.subr.bf16.mxu0 %v2297_v33  ;;  %v515_v32 = vld [vmem:[%s2561_s25 + $0x8] sm:$0xff]  ;;  %v679_v33 = vmul.f32 %v2584_v30, %v514_v27  ;;  %v2324_v35 = vld [vmem:[%s3187_s6 + $0xf4] ss:$12 sps:$4 sm:$0xff]   ;;  %v641_v43 = vmul.f32 %v2584_v30, %v531_v39  ;;  %v689_v46 = vmul.f32 %v2584_v30, %v524_v40  ;;  %v2326_v48 = vld [vmem:[%s3187_s6 + $0xf0] ss:$12 sps:$4 sm:$0xff]   ;;  %s1996_s15 = sshll.u32 %s484_s14, 3 }
  0x2a   : > { %1278 = vmatprep.subr.bf16.mxu1 %v2299_v36  ;;  %v736_v36 = vmul.f32 0.01, %v704_v24  ;;  %v527_v3 = vld [vmem:[%s2561_s25 + $0x68] sm:$0xff]  ;;  %v2338_v11 = vld [vmem:[%s3187_s6 + $0xf8] ss:$12 sps:$4 sm:$0xff]   ;;  %s486_s26 = scalar_lea.vmem %s3183_s2, %s1996_s15  ;;  %vm2079_vm15 = vmpackc.low %vm2805_vm14, %vm2805_vm14  ;;  %s3066_s15 = scalar_lea.vmem %s3184_s3, %s2548_s20 }
  0x2b   : > { %v692_v13 = vmul.f32 %v2584_v30, %v527_v3  ;;  %v2339_v14 = vld [vmem:[%s3187_s6 + $0x38] ss:$12 sps:$4 sm:$0xff]   ;;  %v2334_v16 = vld [vmem:[%s3187_s6 + $0xc0] ss:$12 sps:$4 sm:$0xff]   ;;  %v2344_v40 = vld [vmem:[%s3187_s6 + $0xc8] ss:$12 sps:$4 sm:$0xff]  }
  0x2c   : > { %1166 = vmatpush1.bf16.msra.mxu0 %v2301_v37  ;;  %v680_v37 = vmul.f32 %v2584_v30, %v515_v32  ;;  %v752_v59 = vsel %vm720_vm7, %v704_v24, %v736_v36  ;;  %v2341_v24 = vld [vmem:[%s3187_s6 + $0xe0] ss:$12 sps:$4 sm:$0xff]   ;;  %v529_v27 = vld [vmem:[%s2561_s25 + $0x78] sm:$0xff]  ;;  %s673_s27 = scalar_select %p662_p11, 1, 0 }
  0x2d   : > { %1279 = vmatpush1.bf16.msra.mxu1 %v2302_v38  ;;  %1167 = vmatprep.subr.bf16.mxu0 %v2303_v41  ;;  %v530_v38 = vld [vmem:[%s469_s28] sm:$0xff]  ;;  %v695_v41 = vadd.f32 %v2589_v31, %v679_v33  ;;  %v708_v23 = vadd.f32 %v2589_v31, %v692_v13 }
  0x2e   : > { %2102 = vmatprep.subr.bf16.mxu1 %v2305_v44  ;;  %v640_v42 = vmul.f32 %v2584_v30, %v530_v38  ;;  %v525_v44 = vld [vmem:[%s2561_s25 + $0x58] sm:$0xff]  ;;  %v696_v45 = vadd.f32 %v2589_v31, %v680_v37  ;;  %v694_v38 = vmul.f32 %v2584_v30, %v529_v27  ;;  %v532_v39 = vld [vmem:[%s486_s26] sm:$0xff] }
  0x2f   : > { %vm711_vm8 = vcmp.ge.f32.partialorder %v695_v41, 0.0  ;;  %v727_v49 = vmul.f32 0.01, %v695_v41  ;;  %v690_v55 = vmul.f32 %v2584_v30, %v525_v44  ;;  %v740_v36 = vmul.f32 0.01, %v708_v23 }
  0x30   : > { %1297 = vmatmul.mubr.bf16.vlgmr.msra.gmra.mxu1 %v2624_v51  ;;  %1168 = vmatpush2.bf16.msra.mxu0 %v2306_v52  ;;  %v648_v50 = vadd.f32 %v2589_v31, %v640_v42  ;;  %v649_v52 = vadd.f32 %v2589_v31, %v641_v43  ;;  %vm712_vm9 = vcmp.ge.f32.partialorder %v696_v45, 0.0  ;;  %v728_v54 = vmul.f32 0.01, %v696_v45  ;;  %v2340_v37 = vld [vmem:[%s3187_s6 + $0x218] ss:$12 sps:$4 sm:$0xff]  }
  0x31   : > { %2103 = vmatpush3.bf16.msra.mxu1 %v2307_v53  ;;  %1169 = vmatprep.subr.bf16.mxu0 %v2308_v56  ;;  %v2336_v53 = vld [vmem:[%s3187_s6 + $0x50] ss:$12 sps:$4 sm:$0xff]   ;;  %v705_v56 = vadd.f32 %v2589_v31, %v689_v46  ;;  %v743_v60 = vsel %vm711_vm8, %v695_v41, %v727_v49  ;;  %v706_v0 = vadd.f32 %v2589_v31, %v690_v55  ;;  %vm724_vm1 = vcmp.ge.f32.partialorder %v708_v23, 0.0  ;;  %v2345_v42 = vld [vmem:[%s3187_s6 + $0x8] ss:$12 sps:$4 sm:$0xff]  }
  0x32   : > { %1306 = vmatprep.mubr.bf16.mxu1 %v2391_v2  ;;  %2104 = vmatprep.subr.bf16.mxu1 %v2313_v57  ;;  %v2327_v57 = vld [vmem:[%s3187_s6 + $0xdc] ss:$12 sps:$4 sm:$0xff]   ;;  %vm650_vm10 = vcmp.ge.f32.partialorder %v648_v50, 0.0  ;;  %v652_v62 = vmul.f32 0.01, %v648_v50  ;;  %vm651_vm11 = vcmp.ge.f32.partialorder %v649_v52, 0.0  ;;  %v756_v44 = vsel %vm724_vm1, %v708_v23, %v740_v36 }
  0x33   : > { %v653_v63 = vmul.f32 0.01, %v649_v52  ;;  %vm721_vm12 = vcmp.ge.f32.partialorder %v705_v56, 0.0  ;;  %v737_v8 = vmul.f32 0.01, %v705_v56  ;;  %vm722_vm13 = vcmp.ge.f32.partialorder %v706_v0, 0.0 }
  0x34   : > { %1170 = vmatpush2.bf16.msra.mxu0 %v2310_v58  ;;  %v751_v58 = vsel %vm719_vm6, %v703_v20, %v735_v29  ;;  %v654_v17 = vsel %vm650_vm10, %v648_v50, %v652_v62  ;;  %v528_v20 = vld [vmem:[%s2561_s25 + $0x70] sm:$0xff]  ;;  %v533_v46 = vld [vmem:[%s486_s26 + $0x8] sm:$0xff]  ;;  %v663_v49 = vmul.f32 %v2584_v30, %v532_v39  ;;  %v674_v62 = vstv %s673_s27  ;;  %s3092_s27 = scalar_lea.vmem %s3189_s8, %s2548_s20 }
  0x35   : > { %2105 = vmatpush3.bf16.msra.mxu1 %v2315_v61  ;;  %1171 = vmatprep.subr.bf16.mxu0 %v2311_v4  ;;  %v744_v61 = vsel %vm712_vm9, %v696_v45, %v728_v54  ;;  %v2330_v4 = vld [vmem:[%s3187_s6 + $0xd8] ss:$12 sps:$4 sm:$0xff]   ;;  %v655_v18 = vsel %vm651_vm11, %v649_v52, %v653_v63  ;;  %v693_v33 = vmul.f32 %v2584_v30, %v528_v20  ;;  %v2346_v54 = vld [vmem:[%s3187_s6 + $0x1e8] ss:$12 sps:$4 sm:$0xff]   ;;  %vm2874_vm6 = vcmp.eq.s32.totalorder %v674_v62, 1 }
  0x36   : > { %2106 = vmatprep.subr.bf16.mxu1 %v2321_v6  ;;  %v2772_v5 = vpack.c.bf16 %v744_v61, %v743_v60  ;;  %v2774_v6 = vpack.c.bf16 %v752_v59, %v751_v58  ;;  %v2816_v29 = vpack.c.bf16 %v655_v18, %v654_v17  ;;  %v710_v45 = vadd.f32 %v2589_v31, %v694_v38  ;;  %v2347_v58 = vld [vmem:[%s3187_s6 + $0x1d0] ss:$12 sps:$4 sm:$0xff]   ;;  %v2348_v63 = vld [vmem:[%s3187_s6 + $0x1b8] ss:$12 sps:$4 sm:$0xff]   ;;  %v2349_v3 = vld [vmem:[%s3187_s6 + $0x1a0] ss:$12 sps:$4 sm:$0xff]  }
  0x37   : > { %v709_v41 = vadd.f32 %v2589_v31, %v693_v33  ;;  %v665_v55 = vadd.f32 %v2589_v31, %v663_v49  ;;  %vm2082_vm7 = vmpackc.low %vm2874_vm6, %vm2874_vm6  ;;  %vm1587_vm8 = vcmask 1040384   ;;  %vm1652_vm9 = vcmask 1046528  }
  0x38   : > { %1307 = vmatmul.mubr.bf16.gmra.mxu1 %v2673_v9  ;;  %1172 = vmatpush2.bf16.msra.mxu0 %v2314_v7  ;;  %v2332_v7 = vld [vmem:[%s3187_s6 + $0xc4] ss:$12 sps:$4 sm:$0xff]   ;;  %v742_v52 = vmul.f32 0.01, %v710_v45  ;;  %vm726_vm3 = vcmp.ge.f32.partialorder %v710_v45, 0.0 }
  0x39   : > { %1316 = vmatprep.mubr.bf16.mxu1 %v2391_v2  ;;  %1173 = vmatprep.subr.bf16.mxu0 %v2316_v10  ;;  %v738_v10 = vmul.f32 0.01, %v706_v0  ;;  %v741_v50 = vmul.f32 0.01, %v709_v41  ;;  %vm725_vm2 = vcmp.ge.f32.partialorder %v709_v41, 0.0  ;;  %vm667_vm4 = vcmp.ge.f32.partialorder %v665_v55, 0.0 }
  0x3a   : > { %2107 = vmatpush3.bf16.msra.mxu1 %v2323_v12  ;;  %1183 = vmatprep.mubr.bf16.mxu0 %v2772_v5  ;;  %v691_v12 = vmul.f32 %v2584_v30, %v526_v1  ;;  %v669_v60 = vmul.f32 0.01, %v665_v55 }
  0x3b   : > { %2108 = vmatprep.subr.bf16.mxu1 %v2329_v19  ;;  %v753_v19 = vsel %vm721_vm12, %v705_v56, %v737_v8  ;;  %v757_v56 = vsel %vm725_vm2, %v709_v41, %v741_v50 }
  0x3c   : > { %1174 = vmatpush2.bf16.msra.mxu0 %v2318_v21  ;;  %v754_v21 = vsel %vm722_vm13, %v706_v0, %v738_v10  ;;  %v707_v22 = vadd.f32 %v2589_v31, %v691_v12 }
  0x3d   : > { %1175 = vmatprep.subr.bf16.mxu0 %v2319_v25  ;;  %v2818_v32 = vpack.c.bf16 %v754_v21, %v753_v19 }
  0x3e   : > { %2109 = vmatpush3.bf16.msra.mxu1 %v2331_v26  ;;  %v2337_v26 = vld [vmem:[%s3187_s6 + $0x230] ss:$12 sps:$4 sm:$0xff]   ;;  %vm723_vm0 = vcmp.ge.f32.partialorder %v707_v22, 0.0 }
  0x3f   : > { %2110 = vmatprep.subr.bf16.mxu1 %v2335_v47  ;;  %v2343_v47 = vld [vmem:[%s3187_s6 + $0x200] ss:$12 sps:$4 sm:$0xff]  }
  0x40   : > { %1317 = vmatmul.mubr.bf16.gmra.mxu1 %v2726_v34  ;;  %1176 = vmatpush2.bf16.msra.mxu0 %v2322_v28  ;;  %v2342_v28 = vld [vmem:[%s3187_s6 + $0x20] ss:$12 sps:$4 sm:$0xff]  }
  0x41   : > { %1326 = vmatprep.mubr.bf16.mxu1 %v2391_v2  ;;  %1177 = vmatprep.subr.bf16.mxu0 %v2324_v35  ;;  %v739_v35 = vmul.f32 0.01, %v707_v22 }
  0x42   : > { %2111 = vmatpush3.bf16.msra.mxu1 %v2336_v53  ;;  %v664_v53 = vmul.f32 %v2584_v30, %v533_v46  ;;  %v758_v30 = vsel %vm726_vm3, %v710_v45, %v742_v52 }
  0x43   : > { %2112 = vmatprep.subr.bf16.mxu1 %v2338_v11  ;;  %v755_v43 = vsel %vm723_vm0, %v707_v22, %v739_v35  ;;  %v766_v59 = vpack.c.bf16 %v758_v30, %v757_v56 }
  0x44   : > { %1178 = vmatpush2.bf16.msra.mxu0 %v2326_v48  ;;  %v2851_v48 = vpack.c.bf16 %v756_v44, %v755_v43 }
  0x45   : > { %1179 = vmatprep.subr.bf16.mxu0 %v2327_v57  ;;  %v666_v57 = vadd.f32 %v2589_v31, %v664_v53  ;;  %v671_v31 = vsel %vm667_vm4, %v665_v55, %v669_v60 }
  0x46   : > { %2113 = vmatpush3.bf16.msra.mxu1 %v2339_v14 }
  0x47   : > { %2114 = vmatprep.subr.bf16.mxu1 %v2341_v24  ;;  %v670_v61 = vmul.f32 0.01, %v666_v57  ;;  %vm668_vm5 = vcmp.ge.f32.partialorder %v666_v57, 0.0 }
  0x48   : > { %1327 = vmatmul.mubr.bf16.gmra.mxu1 %v2774_v6  ;;  %1180 = vmatpush2.bf16.msra.mxu0 %v2330_v4 }
  0x49   : > { %1336 = vmatprep.mubr.bf16.mxu1 %v2391_v2  ;;  %1181 = vmatprep.subr.bf16.mxu0 %v2332_v7  ;;  %v672_v0 = vsel %vm668_vm5, %v666_v57, %v670_v61 }
  0x4a   : > { %2115 = vmatpush3.bf16.msra.mxu1 %v2342_v28  ;;  %v2083_v4 = vpack.c.bf16 %v672_v0, %v671_v31 }
  0x4b   : > { %2116 = vmatprep.subr.bf16.mxu1 %v2344_v40 }
  0x4c   : > { %1182 = vmatpush2.bf16.msra.mxu0 %v2334_v16 }
  0x4d   : > { %2182 = vmatprep.subr.bf16.mxu0 %v2337_v26 }
  0x4e   : > { %2117 = vmatpush3.bf16.msra.mxu1 %v2345_v42 }
  0x4f   : > { %2081 = vmatmul.mubr.msk.bf16.vlgmr.msra.gmra.mxu0 %vm2079_vm15, %v2816_v29 }
  0x50   : > { %1337 = vmatmul.mubr.bf16.gmra.mxu1 %v2818_v32  ;;  %2183 = vmatpush3.bf16.msra.mxu0 %v2337_v26 }
  0x51   : > { %1193 = vmatprep.mubr.bf16.mxu0 %v2624_v51  ;;  %1346 = vmatprep.mubr.bf16.mxu1 %v2391_v2 }
  0x52   : > { %2184 = vmatprep.subr.bf16.mxu0 %v2340_v37 }
  0x54   : > { %2185 = vmatpush3.bf16.msra.mxu0 %v2340_v37 }
  0x55   : > { %2186 = vmatprep.subr.bf16.mxu0 %v2343_v47 }
  0x57   : > { %1194 = vmatmul.mubr.bf16.gmra.mxu0 %v2772_v5 }
  0x58   : > { %1347 = vmatmul.mubr.bf16.gmra.mxu1 %v2851_v48  ;;  %1203 = vmatprep.mubr.bf16.mxu0 %v2673_v9 }
  0x59   : > { %1356 = vmatprep.mubr.bf16.mxu1 %v2391_v2  ;;  %2187 = vmatpush3.bf16.msra.mxu0 %v2343_v47 }
  0x5a   : > { %2188 = vmatprep.subr.bf16.mxu0 %v2346_v54 }
  0x5d   : > { %2189 = vmatpush3.bf16.msra.mxu0 %v2346_v54 }
  0x5e   : > { %2190 = vmatprep.subr.bf16.mxu0 %v2347_v58 }
  0x5f   : > { %1204 = vmatmul.mubr.bf16.gmra.mxu0 %v2624_v51 }
  0x60   : > { %1357 = vmatmul.mubr.bf16.gmra.mxu1 %v766_v59  ;;  %1213 = vmatprep.mubr.bf16.mxu0 %v2726_v34 }
  0x61   : > { %1366 = vmatprep.mubr.bf16.mxu1 %v2391_v2  ;;  %2191 = vmatpush3.bf16.msra.mxu0 %v2347_v58  ;;  %v2350_v2 = vld [vmem:[%s3187_s6 + $0x188] ss:$12 sps:$4 sm:$0xff]  }
  0x62   : > { %2192 = vmatprep.subr.bf16.mxu0 %v2348_v63 }
  0x65   : > { %2193 = vmatpush3.bf16.msra.mxu0 %v2348_v63 }
  0x66   : > { %2194 = vmatprep.subr.bf16.mxu0 %v2349_v3 }
  0x67   : > { %1214 = vmatmul.mubr.bf16.gmra.mxu0 %v2673_v9 }
  0x68   : > { %2084 = vmatmul.mubr.msk.bf16.gmra.mxu1 %vm2082_vm7, %v2083_v4  ;;  %1223 = vmatprep.mubr.bf16.mxu0 %v2774_v6 }
  0x69   : > { %1409 = vmatprep.mubr.bf16.mxu1 %v2772_v5  ;;  %2195 = vmatpush3.bf16.msra.mxu0 %v2349_v3 }
  0x6a   : > { %2196 = vmatprep.subr.bf16.mxu0 %v2350_v2 }
  0x6d   : > { %2197 = vmatpush3.bf16.msra.mxu0 %v2350_v2 }
  0x6f   : > { %1224 = vmatmul.mubr.bf16.gmra.mxu0 %v2726_v34 }
  0x70   : > { %2087 = vmatmul.mubr.msk.bf16.vlgmr.msra.gmra.mxu1 %vm2079_vm15, %v2816_v29  ;;  %1233 = vmatprep.mubr.bf16.mxu0 %v2818_v32 }
  0x71   : > { %1417 = vmatprep.mubr.bf16.mxu1 %v2624_v51 }
  0x77   : > { %1234 = vmatmul.mubr.bf16.gmra.mxu0 %v2774_v6 }
  0x78   : > { %1418 = vmatmul.mubr.bf16.gmra.mxu1 %v2772_v5  ;;  %1243 = vmatprep.mubr.bf16.mxu0 %v2851_v48 }
  0x79   : > { %1425 = vmatprep.mubr.bf16.mxu1 %v2673_v9 }
  0x7f   : > { %1244 = vmatmul.mubr.bf16.gmra.mxu0 %v2818_v32 }
  0x80   : > { %1426 = vmatmul.mubr.bf16.gmra.mxu1 %v2624_v51  ;;  %1253 = vmatprep.mubr.bf16.mxu0 %v766_v59 }
  0x81   : > { %1433 = vmatprep.mubr.bf16.mxu1 %v2726_v34 }
  0x87   : > { %1254 = vmatmul.mubr.bf16.gmra.mxu0 %v2851_v48 }
  0x88   : > { %1434 = vmatmul.mubr.bf16.gmra.mxu1 %v2673_v9  ;;  %2198 = vmatprep.mubr.bf16.mxu0 %v2624_v51 }
  0x89   : > { %1441 = vmatprep.mubr.bf16.mxu1 %v2774_v6 }
  0x8f   : > { %2199 = vmatmul.mubr.bf16.vlgmr.msra.gmra.mxu0 %v2673_v9 }
  0x90   : > { %1442 = vmatmul.mubr.bf16.gmra.mxu1 %v2726_v34  ;;  %2202 = vmatprep.mubr.bf16.mxu0 %v2726_v34 }
  0x91   : > { %1449 = vmatprep.mubr.bf16.mxu1 %v2818_v32 }
  0x97   : > { %2203 = vmatmul.mubr.bf16.gmra.mxu0 %v2774_v6 }
  0x98   : > { %1450 = vmatmul.mubr.bf16.gmra.mxu1 %v2774_v6  ;;  %2206 = vmatprep.mubr.bf16.mxu0 %v2818_v32 }
  0x99   : > { %1457 = vmatprep.mubr.bf16.mxu1 %v2851_v48 }
  0x9f   : > { %2207 = vmatmul.mubr.bf16.gmra.mxu0 %v2851_v48 }
  0xa0   : > { %1458 = vmatmul.mubr.bf16.gmra.mxu1 %v2818_v32  ;;  %2210 = vmatprep.mubr.bf16.mxu0 %v766_v59 }
  0xa1   : > { %1465 = vmatprep.mubr.bf16.mxu1 %v766_v59 }
  0xa7   : > { %2211 = vmatmul.mubr.msk.bf16.gmra.mxu0 %vm2082_vm7, %v2083_v4 }
  0xa8   : > { %1466 = vmatmul.mubr.bf16.gmra.mxu1 %v2851_v48 }
  0xf0   : > { %v1298_v51 = vpop.f32.mrf.mxu1 }
  0xf2   : > { %v1300_v9 = vpop.f32.mrf.mxu1 }
  0xf4   : > { %v1302_v34 = vpop.f32.mrf.mxu1 }
  0xf6   : > { %v1304_v5 = vpop.f32.mrf.mxu1 }
  0xf8   : > { %v1308_v6 = vpop.f32.mrf.mxu1 }
  0xfa   : > { %v1310_v7 = vpop.f32.mrf.mxu1 }
  0xfc   : > { %v1312_v8 = vpop.f32.mrf.mxu1 }
  0xfe   : > { %v1314_v10 = vpop.f32.mrf.mxu1 }
 0x100   : > { %v1318_v11 = vpop.f32.mrf.mxu1 }
 0x102   : > { %v1320_v12 = vpop.f32.mrf.mxu1 }
 0x104   : > { %v1322_v13 = vpop.f32.mrf.mxu1 }
 0x106   : > { %v1324_v14 = vpop.f32.mrf.mxu1 }
 0x108   : > { %v1328_v15 = vpop.f32.mrf.mxu1 }
 0x10a   : > { %v2931_v16 = vpop.f32.mrf.mxu1 }
 0x10c   : > { %v2933_v17 = vpop.f32.mrf.mxu1 }
 0x10e   : > { %v2935_v18 = vpop.f32.mrf.mxu1 }
 0x10f   : > { %v1185_v19 = vpop.f32.mrf.mxu0 }
 0x110   : > { %v2937_v20 = vpop.f32.mrf.mxu1  ;;  %v1299_v21 = vadd.f32 %v1298_v51, %v1185_v19 }
 0x111   : > { %v1187_v22 = vpop.f32.mrf.mxu0 }
 0x112   : > { %v2939_v23 = vpop.f32.mrf.mxu1  ;;  %v1588_v24 = vrot.slane %v1299_v21, 7  ;;  %v1301_v25 = vadd.f32 %v1300_v9, %v1187_v22 }
 0x113   : > { %v1189_v26 = vpop.f32.mrf.mxu0 }
 0x114   : > { %v2941_v27 = vpop.f32.mrf.mxu1  ;;  %v1628_v28 = vsel %vm1587_vm8, 0.0, %v1588_v24  ;;  %v1303_v29 = vadd.f32 %v1302_v34, %v1189_v26 }
 0x115   : > { %v2944_v32 = vadd.f32 %v1628_v28, %v1301_v25  ;;  %v1191_v33 = vpop.f32.mrf.mxu0 }
 0x116   : > { %v2946_v35 = vpop.f32.mrf.mxu1  ;;  %v1589_v36 = vrot.slane %v1303_v29, 7  ;;  %v1305_v37 = vadd.f32 %v1304_v5, %v1191_v33 }
 0x117   : > { %v1195_v38 = vpop.f32.mrf.mxu0 }
 0x118   : > { %v2948_v39 = vpop.f32.mrf.mxu1  ;;  %v1590_v40 = vsel %vm1587_vm8, %v1588_v24, %v1589_v36  ;;  %v1309_v41 = vadd.f32 %v1308_v6, %v1195_v38 }
 0x119   : > { %v2951_v42 = vadd.f32 %v1590_v40, %v1305_v37  ;;  %v1197_v43 = vpop.f32.mrf.mxu0 }
 0x11a   : > { %v2953_v44 = vpop.f32.mrf.mxu1  ;;  %v1591_v45 = vrot.slane %v1309_v41, 7  ;;  %v1311_v46 = vadd.f32 %v1310_v7, %v1197_v43 }
 0x11b   : > { %v1199_v47 = vpop.f32.mrf.mxu0 }
 0x11c   : > { %v2955_v48 = vpop.f32.mrf.mxu1  ;;  %v1629_v49 = vsel %vm1587_vm8, 0.0, %v1591_v45  ;;  %v1313_v50 = vadd.f32 %v1312_v8, %v1199_v47 }
 0x11d   : > { %v2958_v52 = vadd.f32 %v1629_v49, %v1311_v46  ;;  %v1201_v53 = vpop.f32.mrf.mxu0 }
 0x11e   : > { %v2960_v54 = vpop.f32.mrf.mxu1  ;;  %v1592_v55 = vrot.slane %v1313_v50, 7  ;;  %v1315_v56 = vadd.f32 %v1314_v10, %v1201_v53 }
 0x11f   : > { %v1205_v30 = vpop.f32.mrf.mxu0 }
 0x120   : > { %v2962_v57 = vpop.f32.mrf.mxu1  ;;  %v1593_v58 = vsel %vm1587_vm8, %v1591_v45, %v1592_v55  ;;  %v1319_v59 = vadd.f32 %v1318_v11, %v1205_v30 }
 0x121   : > { %v2965_v60 = vadd.f32 %v1593_v58, %v1315_v56  ;;  %v1207_v61 = vpop.f32.mrf.mxu0 }
 0x122   : > { %v2967_v62 = vpop.f32.mrf.mxu1  ;;  %v1594_v63 = vrot.slane %v1319_v59, 7  ;;  %v1321_v31 = vadd.f32 %v1320_v12, %v1207_v61 }
 0x123   : > { %v1209_v0 = vpop.f32.mrf.mxu0 }
 0x124   : > { %v2969_v1 = vpop.f32.mrf.mxu1  ;;  %v1630_v3 = vsel %vm1587_vm8, 0.0, %v1594_v63  ;;  %v1323_v4 = vadd.f32 %v1322_v13, %v1209_v0 }
 0x125   : > { %v2972_v2 = vadd.f32 %v1630_v3, %v1321_v31  ;;  %v1211_v51 = vpop.f32.mrf.mxu0 }
 0x126   : > { %v2974_v9 = vpop.f32.mrf.mxu1  ;;  %v1595_v34 = vrot.slane %v1323_v4, 7  ;;  %v1325_v5 = vadd.f32 %v1324_v14, %v1211_v51 }
 0x127   : > { %v1215_v6 = vpop.f32.mrf.mxu0 }
 0x128   : > { %v2976_v7 = vpop.f32.mrf.mxu1  ;;  %v1596_v8 = vsel %vm1587_vm8, %v1594_v63, %v1595_v34  ;;  %v1329_v10 = vadd.f32 %v1328_v15, %v1215_v6 }
 0x129   : > { %v2979_v11 = vadd.f32 %v1596_v8, %v1325_v5  ;;  %v1217_v12 = vpop.f32.mrf.mxu0 }
 0x12a   : > { %v2981_v19 = vpop.f32.mrf.mxu1  ;;  %v1597_v21 = vrot.slane %v1329_v10, 7  ;;  %v1331_v13 = vadd.f32 %v2931_v16, %v1217_v12 }
 0x12b   : > { %v1219_v22 = vpop.f32.mrf.mxu0 }
 0x12c   : > { %v2984_v24 = vpop.f32.mrf.mxu1  ;;  %v1631_v25 = vsel %vm1587_vm8, 0.0, %v1597_v21  ;;  %v1333_v14 = vadd.f32 %v2933_v17, %v1219_v22 }
 0x12d   : > { %v2988_v26 = vadd.f32 %v1631_v25, %v1331_v13  ;;  %v1221_v28 = vpop.f32.mrf.mxu0 }
 0x12e   : > { %v2990_v29 = vpop.f32.mrf.mxu1  ;;  %v1598_v15 = vrot.slane %v1333_v14, 7  ;;  %v1335_v33 = vadd.f32 %v2935_v18, %v1221_v28 }
 0x12f   : > { %v1225_v36 = vpop.f32.mrf.mxu0 }
 0x130   : > { %v2993_v37 = vpop.f32.mrf.mxu1  ;;  %v1599_v16 = vsel %vm1587_vm8, %v1597_v21, %v1598_v15  ;;  %v1339_v38 = vadd.f32 %v2937_v20, %v1225_v36 }
 0x131   : > { %v2997_v40 = vadd.f32 %v1599_v16, %v1335_v33  ;;  %v1227_v41 = vpop.f32.mrf.mxu0 }
 0x132   : > { %v2999_v43 = vpop.f32.mrf.mxu1  ;;  %v1600_v17 = vrot.slane %v1339_v38, 7  ;;  %v1341_v45 = vadd.f32 %v2939_v23, %v1227_v41 }
 0x133   : > { %v1229_v46 = vpop.f32.mrf.mxu0 }
 0x134   : > { %v3002_v47 = vpop.f32.mrf.mxu1  ;;  %v1632_v18 = vsel %vm1587_vm8, 0.0, %v1600_v17  ;;  %v1343_v49 = vadd.f32 %v2941_v27, %v1229_v46 }
 0x135   : > { %v3006_v50 = vadd.f32 %v1632_v18, %v1341_v45  ;;  %v1231_v53 = vpop.f32.mrf.mxu0 }
 0x136   : > { %v3008_v55 = vpop.f32.mrf.mxu1  ;;  %v1601_v20 = vrot.slane %v1343_v49, 7  ;;  %v1345_v56 = vadd.f32 %v2946_v35, %v1231_v53 }
 0x137   : > { %v1235_v30 = vpop.f32.mrf.mxu0 }
 0x138   : > { %v2124_v58 = vpop.f32.mrf.mxu1  ;;  %v1602_v59 = vsel %vm1587_vm8, %v1600_v17, %v1601_v20  ;;  %v1349_v23 = vadd.f32 %v2948_v39, %v1235_v30 }
 0x139   : > { %v3013_v61 = vadd.f32 %v1602_v59, %v1345_v56  ;;  %v1237_v63 = vpop.f32.mrf.mxu0 }
 0x13a   : > { %v2125_v31 = vpop.f32.mrf.mxu1  ;;  %v1603_v0 = vrot.slane %v1349_v23, 7  ;;  %v1351_v27 = vadd.f32 %v2953_v44, %v1237_v63 }
 0x13b   : > { %v1239_v3 = vpop.f32.mrf.mxu0 }
 0x13c   : > { %v2127_v4 = vpop.f32.mrf.mxu1  ;;  %v1633_v51 = vsel %vm1587_vm8, 0.0, %v1603_v0  ;;  %v1353_v34 = vadd.f32 %v2955_v48, %v1239_v3 }
 0x13d   : > { %v3018_v35 = vadd.f32 %v1633_v51, %v1351_v27  ;;  %v1241_v5 = vpop.f32.mrf.mxu0 }
 0x13e   : > { %v2128_v6 = vpop.f32.mrf.mxu1  ;;  %v1604_v8 = vrot.slane %v1353_v34, 7  ;;  %v1355_v39 = vadd.f32 %v2960_v54, %v1241_v5  ;;  %v2126_v34 = vadd.f32 %v2125_v31, %v2124_v58 }
 0x13f   : > { %v1245_v10 = vpop.f32.mrf.mxu0 }
 0x140   : > { %v3021_v12 = vpop.f32.mrf.mxu1  ;;  %v1605_v21 = vsel %vm1587_vm8, %v1603_v0, %v1604_v8  ;;  %v1359_v44 = vadd.f32 %v2962_v57, %v1245_v10  ;;  %v2129_v10 = vadd.f32 %v2128_v6, %v2127_v4 }
 0x141   : > { %v3025_v13 = vadd.f32 %v1605_v21, %v1355_v39  ;;  %v1247_v22 = vpop.f32.mrf.mxu0 }
 0x142   : > { %v2131_v25 = vpop.f32.mrf.mxu1  ;;  %v1606_v14 = vrot.slane %v1359_v44, 7  ;;  %v1361_v48 = vadd.f32 %v2967_v62, %v1247_v22  ;;  %v2123_v22 = vadd.f32 %v3008_v55, %v3002_v47  ;;  %v3071_v55 = vld [vmem:[%s3188_s7] ss:$0 sm:$0xff] }
 0x143   : > { %v1249_v28 = vpop.f32.mrf.mxu0 }
 0x144   : > { %v3028_v15 = vpop.f32.mrf.mxu1  ;;  %v1634_v33 = vsel %vm1587_vm8, 0.0, %v1606_v14  ;;  %v1363_v54 = vadd.f32 %v2969_v1, %v1249_v28 }
 0x145   : > { %v3032_v36 = vadd.f32 %v1634_v33, %v1361_v48  ;;  %v1251_v16 = vpop.f32.mrf.mxu0 }
 0x146   : > { %v3034_v38 = vpop.f32.mrf.mxu1  ;;  %v1607_v57 = vrot.slane %v1363_v54, 7  ;;  %v1365_v41 = vadd.f32 %v2974_v9, %v1251_v16 }
 0x147   : > { %v1255_v17 = vpop.f32.mrf.mxu0 }
 0x148   : > { %v2136_v45 = vpop.f32.mrf.mxu1  ;;  %v1608_v46 = vsel %vm1587_vm8, %v1606_v14, %v1607_v57  ;;  %v1369_v62 = vadd.f32 %v2976_v7, %v1255_v17 }
 0x149   : > { %v3039_v18 = vadd.f32 %v1608_v46, %v1365_v41  ;;  %v1257_v49 = vpop.f32.mrf.mxu0  ;;  %v2132_v41 = vadd.f32 %v2131_v25, %v3021_v12 }
 0x14a   : > { %v2137_v53 = vpop.f32.mrf.mxu1  ;;  %v1609_v20 = vrot.slane %v1369_v62, 7  ;;  %v1371_v1 = vadd.f32 %v2981_v19, %v1257_v49 }
 0x14b   : > { %v1259_v56 = vpop.f32.mrf.mxu0  ;;  %v2138_v16 = vadd.f32 %v2137_v53, %v2136_v45  ;;  %v1757_v53 = vld [vmem:[%s3066_s15 + $0x10] sm:$0xff] }
 0x14c   : > { %v2139_v30 = vpop.f32.mrf.mxu1  ;;  %v1635_v59 = vsel %vm1587_vm8, 0.0, %v1609_v20  ;;  %v1373_v23 = vadd.f32 %v2984_v24, %v1259_v56  ;;  %v2120_v24 = vadd.f32 %v2999_v43, %v2993_v37 }
 0x14d   : > { %v3044_v9 = vadd.f32 %v1635_v59, %v1371_v1  ;;  %v1261_v63 = vpop.f32.mrf.mxu0 }
 0x14e   : > { %v2140_v0 = vpop.f32.mrf.mxu1  ;;  %v1610_v27 = vrot.slane %v1373_v23, 7  ;;  %v1375_v7 = vadd.f32 %v2990_v29, %v1261_v63 }
 0x14f   : > { %v2200_v51 = vpop.f32.mrf.mxu0  ;;  %v2141_v49 = vadd.f32 %v2140_v0, %v2139_v30  ;;  %v2135_v30 = vadd.f32 %v3034_v38, %v3028_v15  ;;  %v1755_v0 = vld [vmem:[%s3066_s15] sm:$0xff] }
 0x150   : > { %v3047_v3 = vpop.f32.mrf.mxu1  ;;  %v1611_v5 = vsel %vm1587_vm8, %v1609_v20, %v1610_v27  ;;  %v1517_v21 = vadd.f32 %v2200_v51, %v2126_v34  ;;  %v1758_v20 = vld [vmem:[%s3066_s15 + $0x18] sm:$0xff]  ;;  %v1756_v27 = vld [vmem:[%s3066_s15 + $0x8] sm:$0xff] }
 0x151   : > { %v3050_v19 = vadd.f32 %v1611_v5, %v1375_v7  ;;  %v1508_v39 = vpop.f32.mrf.mxu0 }
 0x152   : > { %v3052_v8 = vpop.f32.mrf.mxu1  ;;  %v1509_v58 = vadd.f32 %v2120_v24, %v1508_v39  ;;  %v1656_v28 = vrot.slane %v1517_v21, 1 }
 0x153   : > { %v2201_v29 = vpop.f32.mrf.mxu0 }
 0x154   : > { %v3056_v44 = vpop.f32.mrf.mxu1  ;;  %v1520_v31 = vadd.f32 %v2201_v29, %v2129_v10  ;;  %v1653_v47 = vrot.slane %v1509_v58, 1 }
 0x155   : > { %v1511_v48 = vpop.f32.mrf.mxu0 }
 0x156   : > { %v3060_v14 = vpop.f32.mrf.mxu1  ;;  %v1657_v33 = vrot.slane %v1520_v31, 1  ;;  %v1512_v54 = vadd.f32 %v2123_v22, %v1511_v48 }
 0x157   : > { %v2204_v43 = vpop.f32.mrf.mxu0 }
 0x158   : > { %v2148_v37 = vpop.f32.mrf.mxu1  ;;  %v1658_v4 = vsel %vm1652_vm9, %v1656_v28, %v1657_v33  ;;  %v1694_v6 = vsel %vm1652_vm9, %v1657_v33, 0.0  ;;  %v1654_v57 = vrot.slane %v1512_v54, 1  ;;  %v1533_v59 = vadd.f32 %v2204_v43, %v2138_v16 }
 0x159   : > { %v1719_v17 = vadd.f32 %v2958_v52, %v1658_v4  ;;  %v1720_v45 = vadd.f32 %v2965_v60, %v1694_v6  ;;  %v1524_v62 = vpop.f32.mrf.mxu0  ;;  %v2144_v16 = vadd.f32 %v3052_v8, %v3047_v3  ;;  %v1761_v6 = vld [vmem:[%s3066_s15 + $0x30] sm:$0xff] }
 0x15a   : > { %v2149_v46 = vpop.f32.mrf.mxu1  ;;  %v1655_v1 = vsel %vm1652_vm9, %v1653_v47, %v1654_v57  ;;  %v1693_v56 = vsel %vm1652_vm9, %v1654_v57, 0.0  ;;  %v1525_v7 = vadd.f32 %v2132_v41, %v1524_v62  ;;  %v1662_v15 = vrot.slane %v1533_v59, 1  ;;  %v1762_v57 = vld [vmem:[%s3066_s15 + $0x38] sm:$0xff] }
 0x15b   : > { %v1741_v23 = vadd.f32 %v3071_v55, %v1719_v17  ;;  %v1742_v12 = vadd.f32 %v3071_v55, %v1720_v45  ;;  %v1717_v52 = vadd.f32 %v2944_v32, %v1655_v1  ;;  %v1718_v60 = vadd.f32 %v2951_v42, %v1693_v56  ;;  %v2205_v63 = vpop.f32.mrf.mxu0  ;;  %v1760_v1 = vld [vmem:[%s3066_s15 + $0x28] sm:$0xff] }
 0x15c   : > { %v2151_v25 = vpop.f32.mrf.mxu1  ;;  %v1536_v51 = vadd.f32 %v2205_v63, %v2141_v49  ;;  %v2150_v22 = vadd.f32 %v2149_v46, %v2148_v37  ;;  %v1659_v48 = vrot.slane %v1525_v7, 1 }
 0x15d   : > { %v1773_v34 = vadd.f32 %v1757_v53, %v1741_v23  ;;  %v1774_v32 = vadd.f32 %v1758_v20, %v1742_v12  ;;  %v1739_v42 = vadd.f32 %v3071_v55, %v1717_v52  ;;  %v1740_v5 = vadd.f32 %v3071_v55, %v1718_v60  ;;  %v1527_v24 = vpop.f32.mrf.mxu0  ;;  %v1759_v20 = vld [vmem:[%s3066_s15 + $0x20] sm:$0xff] }
 0x15e   : > { %v2152_v39 = vpop.f32.mrf.mxu1  ;;  %v1663_v38 = vrot.slane %v1536_v51, 1  ;;  %v1528_v10 = vadd.f32 %v2135_v30, %v1527_v24  ;;  %v2147_v53 = vadd.f32 %v3060_v14, %v3056_v44 }
 0x15f   : > { %1789 = vst [vmem:[%s3092_s27 + $0x10] sm:$0xff] %v1773_v34  ;;  %1790 = vst [vmem:[%s3092_s27 + $0x18] sm:$0xff] %v1774_v32  ;;  %v1771_v21 = vadd.f32 %v1755_v0, %v1739_v42  ;;  %v1772_v29 = vadd.f32 %v1756_v27, %v1740_v5  ;;  %v2208_v31 = vpop.f32.mrf.mxu0  ;;  %v2153_v41 = vadd.f32 %v2152_v39, %v2151_v25 }
 0x160   : > { %v2154_v58 = vpop.f32.mrf.mxu1  ;;  %v1664_v28 = vsel %vm1652_vm9, %v1662_v15, %v1663_v38  ;;  %v1696_v33 = vsel %vm1652_vm9, %v1663_v38, 0.0  ;;  %v1660_v54 = vrot.slane %v1528_v10, 1  ;;  %v1549_v46 = vadd.f32 %v2208_v31, %v2150_v22  ;;  %v1765_v38 = vld [vmem:[%s3066_s15 + $0x50] sm:$0xff]  ;;  %v1766_v10 = vld [vmem:[%s3066_s15 + $0x58] sm:$0xff] }
 0x161   : > { %1787 = vst [vmem:[%s3092_s27] sm:$0xff] %v1771_v21  ;;  %1788 = vst [vmem:[%s3092_s27 + $0x8] sm:$0xff] %v1772_v29  ;;  %v1723_v43 = vadd.f32 %v2988_v26, %v1664_v28  ;;  %v1724_v47 = vadd.f32 %v2997_v40, %v1696_v33  ;;  %v1540_v37 = vpop.f32.mrf.mxu0 }
 0x162   : > { %v2155_v4 = vpop.f32.mrf.mxu1  ;;  %v1661_v17 = vsel %vm1652_vm9, %v1659_v48, %v1660_v54  ;;  %v1695_v45 = vsel %vm1652_vm9, %v1660_v54, 0.0  ;;  %v1541_v56 = vadd.f32 %v2144_v16, %v1540_v37  ;;  %v1668_v25 = vrot.slane %v1549_v46, 1  ;;  %v1763_v54 = vld [vmem:[%s3066_s15 + $0x40] sm:$0xff]  ;;  %v1764_v16 = vld [vmem:[%s3066_s15 + $0x48] sm:$0xff] }
 0x163   : > { %v1745_v3 = vadd.f32 %v3071_v55, %v1723_v43  ;;  %v1746_v8 = vadd.f32 %v3071_v55, %v1724_v47  ;;  %v1721_v26 = vadd.f32 %v2972_v2, %v1661_v17  ;;  %v1722_v40 = vadd.f32 %v2979_v11, %v1695_v45  ;;  %v2209_v49 = vpop.f32.mrf.mxu0 }
 0x164   : > { %v2157_v62 = vpop.f32.mrf.mxu1  ;;  %v1552_v59 = vadd.f32 %v2209_v49, %v2153_v41  ;;  %v1665_v7 = vrot.slane %v1541_v56, 1  ;;  %v2156_v15 = vadd.f32 %v2155_v4, %v2154_v58 }
 0x165   : > { %v1777_v23 = vadd.f32 %v1761_v6, %v1745_v3  ;;  %v1778_v12 = vadd.f32 %v1762_v57, %v1746_v8  ;;  %v1743_v52 = vadd.f32 %v3071_v55, %v1721_v26  ;;  %v1744_v60 = vadd.f32 %v3071_v55, %v1722_v40  ;;  %v1543_v11 = vpop.f32.mrf.mxu0 }
 0x166   : > { %v2158_v2 = vpop.f32.mrf.mxu1  ;;  %v1669_v63 = vrot.slane %v1552_v59, 1  ;;  %v1544_v30 = vadd.f32 %v2147_v53, %v1543_v11  ;;  %v1769_v11 = vld [vmem:[%s3066_s15 + $0x70] sm:$0xff] }
 0x167   : > { %1793 = vst [vmem:[%s3092_s27 + $0x30] sm:$0xff] %v1777_v23  ;;  %1794 = vst [vmem:[%s3092_s27 + $0x38] sm:$0xff] %v1778_v12  ;;  %v1775_v44 = vadd.f32 %v1759_v20, %v1743_v52  ;;  %v1776_v14 = vadd.f32 %v1760_v1, %v1744_v60  ;;  %v2212_v27 = vpop.f32.mrf.mxu0  ;;  %v2159_v58 = vadd.f32 %v2158_v2, %v2157_v62  ;;  %v1767_v23 = vld [vmem:[%s3066_s15 + $0x60] sm:$0xff]  ;;  %v1768_v12 = vld [vmem:[%s3066_s15 + $0x68] sm:$0xff] }
 0x168   : > { %v2160_v0 = vpop.f32.mrf.mxu1  ;;  %v1670_v51 = vsel %vm1652_vm9, %v1668_v25, %v1669_v63  ;;  %v1698_v34 = vsel %vm1652_vm9, %v1669_v63, 0.0  ;;  %v1666_v32 = vrot.slane %v1544_v30, 1 }
 0x169   : > { %1791 = vst [vmem:[%s3092_s27 + $0x20] sm:$0xff] %v1775_v44  ;;  %1792 = vst [vmem:[%s3092_s27 + $0x28] sm:$0xff] %v1776_v14  ;;  %v1727_v42 = vadd.f32 %v3018_v35, %v1670_v51  ;;  %v1728_v5 = vadd.f32 %v3025_v13, %v1698_v34  ;;  %v1556_v24 = vpop.f32.mrf.mxu0 }
 0x16a   : > { %v2161_v39 = vpop.f32.mrf.mxu1  ;;  %v1667_v21 = vsel %vm1652_vm9, %v1665_v7, %v1666_v32  ;;  %v1697_v29 = vsel %vm1652_vm9, %v1666_v32, 0.0  ;;  %v1557_v43 = vadd.f32 %v2156_v15, %v1556_v24 }
 0x16b   : > { %v2162_v22 = vadd.f32 %v2161_v39, %v2160_v0  ;;  %v1749_v31 = vadd.f32 %v3071_v55, %v1727_v42  ;;  %v1750_v48 = vadd.f32 %v3071_v55, %v1728_v5  ;;  %v1725_v35 = vadd.f32 %v3006_v50, %v1667_v21  ;;  %v2213_v33 = vpop.f32.mrf.mxu0 }
 0x16c   : > { %v1726_v13 = vadd.f32 %v3013_v61, %v1697_v29  ;;  %v2163_v28 = vpop.f32.mrf.mxu1  ;;  %v1671_v3 = vrot.slane %v1557_v43, 1 }
 0x16d   : > { %v1781_v47 = vadd.f32 %v1765_v38, %v1749_v31  ;;  %v1782_v4 = vadd.f32 %v1766_v10, %v1750_v48  ;;  %v1747_v37 = vadd.f32 %v3071_v55, %v1725_v35  ;;  %v1559_v50 = vpop.f32.mrf.mxu0  ;;  %v1565_v41 = vadd.f32 %v2212_v27, %v2162_v22 }
 0x16e   : > { %v1748_v6 = vadd.f32 %v3071_v55, %v1726_v13  ;;  %v2164_v57 = vpop.f32.mrf.mxu1  ;;  %v1560_v17 = vadd.f32 %v2159_v58, %v1559_v50 }
 0x16f   : > { %v2165_v61 = vadd.f32 %v2164_v57, %v2163_v28  ;;  %1797 = vst [vmem:[%s3092_s27 + $0x50] sm:$0xff] %v1781_v47  ;;  %1798 = vst [vmem:[%s3092_s27 + $0x58] sm:$0xff] %v1782_v4  ;;  %v1779_v45 = vadd.f32 %v1763_v54, %v1747_v37  ;;  %v1674_v40 = vrot.slane %v1565_v41, 1 }
 0x170   : > { %v1780_v46 = vadd.f32 %v1764_v16, %v1748_v6  ;;  %v1672_v26 = vrot.slane %v1560_v17, 1 }
 0x171   : > { %v1568_v8 = vadd.f32 %v2213_v33, %v2165_v61  ;;  %1795 = vst [vmem:[%s3092_s27 + $0x40] sm:$0xff] %v1779_v45 }
 0x172   : > { %1796 = vst [vmem:[%s3092_s27 + $0x48] sm:$0xff] %v1780_v46  ;;  %v1673_v49 = vsel %vm1652_vm9, %v1671_v3, %v1672_v26  ;;  %v1699_v53 = vsel %vm1652_vm9, %v1672_v26, 0.0 }
 0x173   : > { %v1675_v62 = vrot.slane %v1568_v8, 1  ;;  %v1729_v20 = vadd.f32 %v3032_v36, %v1673_v49  ;;  %v1730_v1 = vadd.f32 %v3039_v18, %v1699_v53  ;;  %v1770_v18 = vld [vmem:[%s3066_s15 + $0x78] sm:$0xff] }
 0x175   : > { %v1676_v56 = vsel %vm1652_vm9, %v1674_v40, %v1675_v62  ;;  %v1700_v59 = vsel %vm1652_vm9, %v1675_v62, 0.0  ;;  %v1751_v2 = vadd.f32 %v3071_v55, %v1729_v20  ;;  %v1752_v36 = vadd.f32 %v3071_v55, %v1730_v1 }
 0x176   : > { %v1731_v52 = vadd.f32 %v3044_v9, %v1676_v56  ;;  %v1732_v60 = vadd.f32 %v3050_v19, %v1700_v59 }
 0x177   : > { %v1783_v30 = vadd.f32 %v1767_v23, %v1751_v2  ;;  %v1784_v44 = vadd.f32 %v1768_v12, %v1752_v36 }
 0x178   : > { %v1753_v25 = vadd.f32 %v3071_v55, %v1731_v52  ;;  %v1754_v63 = vadd.f32 %v3071_v55, %v1732_v60 }
 0x179   : > { %1799 = vst [vmem:[%s3092_s27 + $0x60] sm:$0xff] %v1783_v30  ;;  %1800 = vst [vmem:[%s3092_s27 + $0x68] sm:$0xff] %v1784_v44 }
 0x17a   : > { %v1785_v14 = vadd.f32 %v1769_v11, %v1753_v25  ;;  %v1786_v0 = vadd.f32 %v1770_v18, %v1754_v63 }
 0x17c   : > { %1801 = vst [vmem:[%s3092_s27 + $0x70] sm:$0xff] %v1785_v14  ;;  %1802 = vst [vmem:[%s3092_s27 + $0x78] sm:$0xff] %v1786_v0 }
 0x17d PF: > { %s18_s9 = sadd.s32 1, %s2389_s9   ;;  %s3195_s27 = smov %s2381_s29 }
 0x17e   : > { %p15_p12 = scmp.ge.s32.totalorder %s18_s9, 6   ;;  %s3196_s28 = smov %s2385_s30 }
 0x17f   : > { %s3197_s29 = smov %s3200_s10  ;;  %s3198_s30 = smov %s3204_s11 }
 0x180   :  { %17 = sbr.rel (!%p15_p12) target bundleno = 3 (0x3), region = 91 }

</bundles_post_ra>
